<compile_context>
chip_gen: v7x
topology: tpu7x:2x2x1
jax: 0.10.0
libtpu: 0.0.40
codegen_flags: <defaults>
</compile_context>

<pallas_src>
import functools
import jax
import jax.numpy as jnp
from jax import lax
from jax.experimental import pallas as pl
from jax.experimental.pallas import tpu as pltpu

# MXU operands use bf16 with f32 accumulation on ALL TPU generations (v5e's MXU is also
# bf16-native; only the elementwise/EUP path needs f32 there). Weights are stored bf16.
MXU_DTYPE = jnp.bfloat16


def _mxu(x):
    return x.astype(MXU_DTYPE)


def _round_up(x, m):
    return ((x + m - 1) // m) * m


# ----------------------------------------------------------------------------
# Pallas kernel 1: row-tiled fused linear (x @ W + b, optional tanh)
# ----------------------------------------------------------------------------
def _linear_kernel(x_ref, w_ref, b_ref, o_ref, *, act):
    y = jnp.dot(_mxu(x_ref[...]), w_ref[...],
                preferred_element_type=jnp.float32) + b_ref[...]
    if act == "tanh":
        y = jnp.tanh(y)
    o_ref[...] = y


def pallas_linear(x, w, b, act=None, tile_n=512):
    """x: (N, K) f32/bf16, w: (K, M) bf16, b: (M,) f32 -> (N, M) f32. Row-tiled over N."""
    N, K = x.shape
    M = w.shape[1]
    b2 = b.reshape(1, M).astype(jnp.float32)

    if N <= tile_n:
        tn, Np = N, N                     # single full block (block == full array dims)
    else:
        tn = tile_n                       # multiple of 8 -> valid sublane tiling
        Np = _round_up(N, tn)
        if Np != N:
            x = jnp.pad(x, ((0, Np - N), (0, 0)))

    kernel = functools.partial(_linear_kernel, act=act)
    out = pl.pallas_call(
        kernel,
        grid=(Np // tn,),
        in_specs=[
            pl.BlockSpec((tn, K), lambda i: (i, 0)),
            pl.BlockSpec((K, M), lambda i: (0, 0)),       # resident bf16 weight
            pl.BlockSpec((1, M), lambda i: (0, 0)),
        ],
        out_specs=pl.BlockSpec((tn, M), lambda i: (i, 0)),
        out_shape=jax.ShapeDtypeStruct((Np, M), jnp.float32),
        compiler_params=pltpu.CompilerParams(
            dimension_semantics=("parallel",),
            vmem_limit_bytes=48 * 1024 * 1024),
        cost_estimate=pl.CostEstimate(
            flops=int(2 * Np * K * M),
            transcendentals=int(Np * M) if act == "tanh" else 0,
            bytes_accessed=int(x.dtype.itemsize * Np * K + 2 * K * M + 4 * Np * M)),
    )(x, w, b2)
    return out if Np == N else out[:N]


# ----------------------------------------------------------------------------
# Pallas kernel 2: time-major LSTM recurrence (resident W_hh, h/c carried in
# constant-index output blocks). Input projections (x@Wih+b) are precomputed.
# ----------------------------------------------------------------------------
def _lstm_rec_kernel(xg_ref, whh_ref, m_ref, h0_ref, c0_ref,
                     o_ref, hT_ref, cT_ref, *, H):
    t = pl.program_id(0)

    @pl.when(t == 0)
    def _():
        hT_ref[...] = h0_ref[...]
        cT_ref[...] = c0_ref[...]

    h = hT_ref[...]                                           # (B, H) carry
    c = cT_ref[...]
    g = xg_ref[0] + jnp.dot(_mxu(h), whh_ref[...],
                            preferred_element_type=jnp.float32)   # (B, 4H)
    i = jax.nn.sigmoid(g[:, 0:H])                             # torch gate order i,f,g,o
    f = jax.nn.sigmoid(g[:, H:2 * H])
    gg = jnp.tanh(g[:, 2 * H:3 * H])
    o = jax.nn.sigmoid(g[:, 3 * H:4 * H])
    c_new = f * c + i * gg
    h_new = o * jnp.tanh(c_new)
    v = m_ref[0]                                              # (B, 1) validity
    hT_ref[...] = v * h_new + (1.0 - v) * h
    cT_ref[...] = v * c_new + (1.0 - v) * c
    o_ref[0] = v * h_new


def lstm_unidir_tm(xg, valid, Whh_T, hidden):
    """xg: (T, B, 4H) f32 gate projections (bias included), valid: (T, B, 1) f32 {0,1},
    Whh_T: (H, 4H) bf16. Returns outputs (T, B, H) (zeros past lens) and (hT, cT)."""
    T, B, fourH = xg.shape
    H = fourH // 4
    h0, c0 = hidden
    out, hT, cT = pl.pallas_call(
        functools.partial(_lstm_rec_kernel, H=H),
        grid=(T,),
        in_specs=[
            pl.BlockSpec((1, B, 4 * H), lambda t: (t, 0, 0)),
            pl.BlockSpec((H, 4 * H), lambda t: (0, 0)),       # resident recurrent weight
            pl.BlockSpec((1, B, 1), lambda t: (t, 0, 0)),
            pl.BlockSpec((B, H), lambda t: (0, 0)),
            pl.BlockSpec((B, H), lambda t: (0, 0)),
        ],
        out_specs=[
            pl.BlockSpec((1, B, H), lambda t: (t, 0, 0)),
            pl.BlockSpec((B, H), lambda t: (0, 0)),           # resident h carry
            pl.BlockSpec((B, H), lambda t: (0, 0)),           # resident c carry
        ],
        out_shape=[
            jax.ShapeDtypeStruct((T, B, H), jnp.float32),
            jax.ShapeDtypeStruct((B, H), jnp.float32),
            jax.ShapeDtypeStruct((B, H), jnp.float32),
        ],
        compiler_params=pltpu.CompilerParams(dimension_semantics=("arbitrary",)),
    )(xg, Whh_T, valid, h0, c0)
    return out, (hT, cT)


# ----------------------------------------------------------------------------
# Pallas kernel 3: co-attention (per batch element)
#   L = Q D^T ; A_Q = softmax(L, q-axis) ; A_D = softmax(L, d-axis)
#   C_Q^T = A_Q D ; C_D^T = [A_D^T Q , A_D^T C_Q^T] ; out = [C_D^T , D, 0-pad]
# A single score matmul; A_D^T contractions use transposed-LHS dimension numbers.
# ----------------------------------------------------------------------------
def _coatt_kernel(q_ref, d_ref, o_ref, *, pad):
    Q = q_ref[0]                           # (mq, H) f32
    D = d_ref[0]                           # (md, H) f32
    Qb = _mxu(Q)
    Db = _mxu(D)
    dn_nt = (((1,), (1,)), ((), ()))       # contract last dims:  X @ Y^T
    dn_tn = (((0,), (0,)), ((), ()))       # contract first dims: X^T @ Y

    L = lax.dot_general(Qb, Db, dn_nt, preferred_element_type=jnp.float32)    # (mq, md)

    # softmax over the question axis (torch dim=1 -> axis 0 here)
    eq = jnp.exp(L - jnp.max(L, axis=0, keepdims=True))
    A_Q = eq * pl.reciprocal(jnp.sum(eq, axis=0, keepdims=True), approx=True)   # (mq, md)
    # softmax over the document axis (torch dim=2 -> lane axis here)
    ed = jnp.exp(L - jnp.max(L, axis=1, keepdims=True))
    A_D = ed * pl.reciprocal(jnp.sum(ed, axis=1, keepdims=True), approx=True)   # (mq, md)

    CQ_t = jnp.dot(_mxu(A_Q), Db, preferred_element_type=jnp.float32)                 # (mq, H)
    cdt1 = lax.dot_general(_mxu(A_D), Qb, dn_tn, preferred_element_type=jnp.float32)  # (md, H)
    cdt2 = lax.dot_general(_mxu(A_D), _mxu(CQ_t), dn_tn,
                           preferred_element_type=jnp.float32)                        # (md, H)

    pieces = [cdt1, cdt2, D]
    if pad:
        pieces.append(jnp.zeros((D.shape[0], pad), jnp.float32))  # lane-dense store
    o_ref[0] = jnp.concatenate(pieces, axis=1).astype(o_ref.dtype)


def pallas_coattention(Q, D):
    """Q: (B, mq, H), D: (B, md, H) -> bf16 (B, md, OUT_W), OUT_W = round_up(3H, 128).
    Columns [0:3H] = [A_D^T Q, A_D^T C_Q^T, D]; remaining columns are zero padding."""
    B, mq, H = Q.shape
    _, md, _ = D.shape
    out_w = _round_up(3 * H, 128)
    pad = out_w - 3 * H
    # TODO(synk): for long documents tile md flash-style (online renormalization of the
    # lane-axis softmax) to bound the O(mq*md) L buffer against v7x's 64 MiB VMEM.
    kernel = functools.partial(_coatt_kernel, pad=pad)
    cost = pl.CostEstimate(
        flops=int(8 * B * mq * md * H),
        transcendentals=int(2 * B * mq * md),
        bytes_accessed=int(4 * B * (mq * H + md * H) + 2 * B * md * out_w))
    return pl.pallas_call(
        kernel,
        grid=(B,),
        in_specs=[
            pl.BlockSpec((1, mq, H), lambda i: (i, 0, 0)),
            pl.BlockSpec((1, md, H), lambda i: (i, 0, 0)),
        ],
        out_specs=pl.BlockSpec((1, md, out_w), lambda i: (i, 0, 0)),
        out_shape=jax.ShapeDtypeStruct((B, md, out_w), jnp.bfloat16),
        compiler_params=pltpu.CompilerParams(
            dimension_semantics=("parallel",),
            vmem_limit_bytes=48 * 1024 * 1024),
        cost_estimate=cost,
    )(Q.astype(jnp.float32), D.astype(jnp.float32))


# ----------------------------------------------------------------------------
# Pallas kernel 4: fully fused dynamic decoder.
# grid=(B, max_dec_steps): outer batch axis "parallel" (v7x dual-core), inner step axis
# "arbitrary". Per step: u_s/u_e one-hot row gathers, GRU cell, start HMN -> argmax,
# re-gather u_s, end HMN -> argmax. U + all weights stay VMEM-resident across steps;
# the only output is a lane-dense (B, 2, 128) int32 block (row 0 = s_i, row 1 = e_i).
# ----------------------------------------------------------------------------
def _decoder_kernel(e0_ref, U_ref, wih_ref, whh_ref, bih_ref, bhh_ref,
                    wr_ref, w1u_ref, w1r_ref, b1_ref, w2_ref, b2_ref, w3_ref, b3_ref,
                    idx_ref, h_sc, u_sc, *, H, P, m):
    b = pl.program_id(0)
    t = pl.program_id(1)
    ids = lax.broadcasted_iota(jnp.int32, (m, 1), 0)
    U = U_ref[0]                                               # (m, 2H) f32
    Ub = _mxu(U)

    def gather_row(idx):
        # one-hot select-sum row gather (no dynamic VMEM indexing needed)
        return jnp.sum(jnp.where(ids == idx, U, 0.0), axis=0, keepdims=True)   # (1, 2H)

    @pl.when(t == 0)
    def _():
        h_sc[...] = jnp.zeros_like(h_sc)
        u_sc[0:1, :] = gather_row(0)                # u_s from s_0 = 0
        u_sc[1:2, :] = gather_row(e0_ref[b])        # u_e from e_0 = len - 1

    u_s = u_sc[0:1, :]
    u_e = u_sc[1:2, :]
    u_cat = jnp.concatenate([u_s, u_e], axis=1)                # (1, 4H)

    # ---- GRU cell (torch gate order r, z, n) ----
    h = h_sc[...]                                              # (1, H)
    gi = jnp.dot(_mxu(u_cat), wih_ref[...],
                 preferred_element_type=jnp.float32) + bih_ref[...]
    gh = jnp.dot(_mxu(h), whh_ref[...],
                 preferred_element_type=jnp.float32) + bhh_ref[...]
    r = jax.nn.sigmoid(gi[:, 0:H] + gh[:, 0:H])
    z = jax.nn.sigmoid(gi[:, H:2 * H] + gh[:, H:2 * H])
    n = jnp.tanh(gi[:, 2 * H:] + r * gh[:, 2 * H:])
    h_new = (1.0 - z) * n + z * h
    h_sc[...] = h_new

    # ---- MaxOutHighway (k=0 start head, k=1 end head) ----
    # TODO(synk): H-wide gate/pool slices are not 128-lane aligned; pad pools to 128
    # lanes (zero weight columns) if H grows beyond toy size.
    def hmn(u_cat_row, k):
        x = jnp.concatenate([h_new, u_cat_row], axis=1)                         # (1, 5H)
        rr = jnp.tanh(jnp.dot(_mxu(x), wr_ref[k],
                              preferred_element_type=jnp.float32))              # (1, H)
        rb1 = jnp.dot(_mxu(rr), w1r_ref[k],
                      preferred_element_type=jnp.float32) + b1_ref[k]           # (1, PH)
        y1 = jnp.dot(Ub, w1u_ref[k], preferred_element_type=jnp.float32) + rb1  # (m, PH)
        mt1 = y1[:, 0:H]
        for kk in range(1, P):
            mt1 = jnp.maximum(mt1, y1[:, kk * H:(kk + 1) * H])                  # (m, H)
        y2 = jnp.dot(_mxu(mt1), w2_ref[k],
                     preferred_element_type=jnp.float32) + b2_ref[k]            # (m, PH)
        mt2 = y2[:, 0:H]
        for kk in range(1, P):
            mt2 = jnp.maximum(mt2, y2[:, kk * H:(kk + 1) * H])                  # (m, H)
        w3k = w3_ref[k]                                                         # (2H, P)
        y3 = (jnp.dot(_mxu(mt1), w3k[0:H], preferred_element_type=jnp.float32)
              + jnp.dot(_mxu(mt2), w3k[H:], preferred_element_type=jnp.float32)
              + b3_ref[k])                                                      # (m, P)
        alpha = jnp.max(y3, axis=1, keepdims=True)                              # (m, 1)
        # log-softmax over m preserves the argmax -> take the first max index directly
        return jnp.min(jnp.where(alpha >= jnp.max(alpha), ids, m))   # scalar int32

    s_new = hmn(u_cat, 0)
    u_s2 = gather_row(s_new)
    u_sc[0:1, :] = u_s2
    u_cat2 = jnp.concatenate([u_s2, u_e], axis=1)
    e_new = hmn(u_cat2, 1)
    u_sc[1:2, :] = gather_row(e_new)

    # lane-dense int32 index writeback (row 0 = s_i, row 1 = e_i); last step wins
    idx_ref[0] = jnp.concatenate(
        [jnp.zeros((1, 128), jnp.int32) + s_new,
         jnp.zeros((1, 128), jnp.int32) + e_new], axis=0)


def pallas_decoder(params, U, e0, max_dec_steps, P):
    """U: (B, m, 2H) f32, e0: (B,) int32 -> (s_i, e_i) int32 (B,)."""
    B, m, twoH = U.shape
    H = twoH // 2
    PH = P * H
    hmn = params["hmn"]
    kernel = functools.partial(_decoder_kernel, H=H, P=P, m=m)
    flops_hmn = 2 * (5 * H * H + H * PH + m * 2 * H * PH + m * H * PH + m * 2 * H * P)
    flops_step = 2 * (4 * H * 3 * H + H * 3 * H) + 2 * flops_hmn
    cost = pl.CostEstimate(
        flops=int(B * max_dec_steps * flops_step),
        transcendentals=int(B * max_dec_steps * 8 * H),
        bytes_accessed=int(4 * B * m * twoH + 2 * (4 * H * 3 * H + H * 3 * H)
                           + 2 * 2 * (5 * H * H + 4 * H * PH + 2 * H * P)
                           + 4 * B * 2 * 128))
    idx = pl.pallas_call(
        kernel,
        grid=(B, max_dec_steps),
        in_specs=[
            pl.BlockSpec(memory_space=pltpu.MemorySpace.SMEM),            # e0 (B,)
            pl.BlockSpec((1, m, twoH), lambda b, t: (b, 0, 0)),           # U (resident/t)
            pl.BlockSpec((4 * H, 3 * H), lambda b, t: (0, 0)),            # gru W_ih^T
            pl.BlockSpec((H, 3 * H), lambda b, t: (0, 0)),                # gru W_hh^T
            pl.BlockSpec((1, 3 * H), lambda b, t: (0, 0)),                # gru b_ih
            pl.BlockSpec((1, 3 * H), lambda b, t: (0, 0)),                # gru b_hh
            pl.BlockSpec((2, 5 * H, H), lambda b, t: (0, 0, 0)),          # hmn Wr
            pl.BlockSpec((2, 2 * H, PH), lambda b, t: (0, 0, 0)),         # hmn W1_U
            pl.BlockSpec((2, H, PH), lambda b, t: (0, 0, 0)),             # hmn W1_r
            pl.BlockSpec((2, 1, PH), lambda b, t: (0, 0, 0)),             # hmn b1
            pl.BlockSpec((2, H, PH), lambda b, t: (0, 0, 0)),             # hmn W2
            pl.BlockSpec((2, 1, PH), lambda b, t: (0, 0, 0)),             # hmn b2
            pl.BlockSpec((2, 2 * H, P), lambda b, t: (0, 0, 0)),          # hmn W3
            pl.BlockSpec((2, 1, P), lambda b, t: (0, 0, 0)),              # hmn b3
        ],
        out_specs=pl.BlockSpec((1, 2, 128), lambda b, t: (b, 0, 0)),
        out_shape=jax.ShapeDtypeStruct((B, 2, 128), jnp.int32),
        scratch_shapes=[pltpu.VMEM((1, H), jnp.float32),       # GRU hidden carry
                        pltpu.VMEM((2, twoH), jnp.float32)],   # u_s / u_e row carry
        compiler_params=pltpu.CompilerParams(
            dimension_semantics=("parallel", "arbitrary")),
        cost_estimate=cost,
    )(e0, U,
      params["gru_Wih_T"], params["gru_Whh_T"],
      params["gru_b_ih"].reshape(1, 3 * H), params["gru_b_hh"].reshape(1, 3 * H),
      hmn["wr"], hmn["w1u"], hmn["w1r"], hmn["b1"],
      hmn["w2"], hmn["b2"], hmn["w3"], hmn["b3"])
    return idx[:, 0, 0], idx[:, 1, 0]


# ----------------------------------------------------------------------------
# Model pieces
# ----------------------------------------------------------------------------
def _valid_mask_tm(mask):
    """(B, T) int mask -> (T, B, 1) f32 validity (t < len)."""
    B, T = mask.shape
    lens = jnp.sum(mask, axis=1)
    return (jnp.arange(T)[:, None] < lens[None, :]).astype(jnp.float32)[:, :, None]


def encoder_forward(params, seq, mask, hidden):
    # TODO(synk): pack_padded_sequence sort/unsort/length-truncation are identity for the
    # equal-length masks used here; general ragged-length packing is not replicated.
    B, T = seq.shape
    H = params["enc_Whh_T"].shape[0]
    emb_tm = params["emb"][seq.T]                          # (T, B, H) time-major
    xg = pallas_linear(emb_tm.reshape(T * B, H), params["enc_Wih_T"],
                       params["enc_b"]).reshape(T, B, 4 * H)
    out_tm, hidden_new = lstm_unidir_tm(xg, _valid_mask_tm(mask),
                                        params["enc_Whh_T"], hidden)
    return out_tm, hidden_new                              # time-major (T, B, H)


def _pad_rows(w, rows):
    return w if w.shape[0] == rows else jnp.pad(w, ((0, rows - w.shape[0]), (0, 0)))


def fusion_bilstm_forward(params, x_bm, mask):
    """x_bm: (B, T, W) bf16 lane-padded co-attention output -> U (B, T, 2H) f32."""
    B, T, W = x_bm.shape
    H = params["fus_Whh_T_f"].shape[0]
    valid = _valid_mask_tm(mask)
    x_tm = jnp.transpose(x_bm, (1, 0, 2))                  # (T, B, W) small relayout
    zeros = (jnp.zeros((B, H), jnp.float32), jnp.zeros((B, H), jnp.float32))

    # zero-padded weight rows absorb the co-attention lane padding (no slice/copy of x)
    w_f = _pad_rows(params["fus_Wih_T_f"], W)
    w_b = _pad_rows(params["fus_Wih_T_b"], W)

    xg_f = pallas_linear(x_tm.reshape(T * B, W), w_f,
                         params["fus_b_f"]).reshape(T, B, 4 * H)
    out_f, _ = lstm_unidir_tm(xg_f, valid, params["fus_Whh_T_f"], zeros)

    # TODO(synk): backward direction uses full time reversal; exact for the full-length
    # masks used in the demo, not for ragged lengths from packing.
    x_rev = x_tm[::-1]
    xg_b = pallas_linear(x_rev.reshape(T * B, W), w_b,
                         params["fus_b_b"]).reshape(T, B, 4 * H)
    out_b, _ = lstm_unidir_tm(xg_b, valid, params["fus_Whh_T_b"], zeros)
    out_b = out_b[::-1]

    # fusion dropout rate is 0.0 -> identity
    U_tm = jnp.concatenate([out_f, out_b], axis=2)         # (T, B, 2H)
    return jnp.transpose(U_tm, (1, 0, 2))                  # (B, T, 2H)


def coattention_forward(params, q_seq, q_mask, d_seq, d_mask,
                        max_dec_steps, maxout_pool_size):
    B = q_seq.shape[0]
    H = params["fcq_b"].shape[0]

    # Encoder is stateful in the reference code: the hidden after encoding D seeds Q.
    h0 = (jnp.zeros((B, H), jnp.float32), jnp.zeros((B, H), jnp.float32))
    D_tm, hidden = encoder_forward(params, d_seq, d_mask, h0)      # (md, B, H)
    Q_tm, _ = encoder_forward(params, q_seq, q_mask, hidden)       # (mq, B, H)

    mq = Q_tm.shape[0]
    Q_tm = pallas_linear(Q_tm.reshape(mq * B, H), params["fcq_W_T"], params["fcq_b"],
                         act="tanh").reshape(mq, B, H)
    Q = jnp.transpose(Q_tm, (1, 0, 2))                             # (B, mq, H)
    D = jnp.transpose(D_tm, (1, 0, 2))                             # (B, md, H)

    bilstm_in = pallas_coattention(Q, D)        # (B, md, round_up(3H,128)) bf16, 0-padded
    U = fusion_bilstm_forward(params, bilstm_in, d_mask)           # (B, md, 2H)

    e0 = (jnp.sum(d_mask, axis=1) - 1).astype(jnp.int32)
    s_i, e_i = pallas_decoder(params, U, e0, max_dec_steps, maxout_pool_size)
    # TODO(synk): CrossEntropyLoss branch (target_span is not None) not implemented.
    return None, s_i, e_i


# ----------------------------------------------------------------------------
# Deterministic parameter init (MXU-feeding weights stored in bf16; biases f32)
# ----------------------------------------------------------------------------
def _maxout_reorder(w_t, b, H, P):
    """Permute maxout columns from unit-major (j*P+k) to pool-major (k*H+j)."""
    In = w_t.shape[0]
    w_r = w_t.reshape(In, H, P).transpose(0, 2, 1).reshape(In, P * H)
    b_r = b.reshape(H, P).T.reshape(P * H)
    return w_r, b_r


def init_params(key, vocab, H, P):
    keys = iter(jax.random.split(key, 64))
    BF = jnp.bfloat16

    def u(shape, fan, dtype=jnp.float32):
        s = 1.0 / (fan ** 0.5)
        return jax.random.uniform(next(keys), shape, jnp.float32, -s, s).astype(dtype)

    def make_hmn():
        wr = u((5 * H, H), 5 * H, BF)
        w1 = u((3 * H, H * P), 3 * H); b1 = u((H * P,), 3 * H)
        w2 = u((H, H * P), H);         b2 = u((H * P,), H)
        w3 = u((2 * H, P), 2 * H, BF); b3 = u((P,), 2 * H)
        w1, b1 = _maxout_reorder(w1, b1, H, P)
        w2, b2 = _maxout_reorder(w2, b2, H, P)
        return {"wr": wr,
                "w1_U": w1[:2 * H].astype(BF), "w1_r": w1[2 * H:].astype(BF), "b1": b1,
                "w2": w2.astype(BF), "b2": b2, "w3": w3, "b3": b3}

    sh, eh = make_hmn(), make_hmn()

    def stack2(a, b):
        return jnp.stack([a, b], axis=0)

    hmn = {
        "wr": stack2(sh["wr"], eh["wr"]),                              # (2, 5H, H) bf16
        "w1u": stack2(sh["w1_U"], eh["w1_U"]),                         # (2, 2H, PH) bf16
        "w1r": stack2(sh["w1_r"], eh["w1_r"]),                         # (2, H, PH) bf16
        "b1": stack2(sh["b1"], eh["b1"]).reshape(2, 1, H * P),
        "w2": stack2(sh["w2"], eh["w2"]),
        "b2": stack2(sh["b2"], eh["b2"]).reshape(2, 1, H * P),
        "w3": stack2(sh["w3"], eh["w3"]),
        "b3": stack2(sh["b3"], eh["b3"]).reshape(2, 1, P),
    }

    params = {
        "emb": u((vocab, H), H),
        "enc_Wih_T": u((H, 4 * H), H, BF),
        "enc_Whh_T": u((H, 4 * H), H, BF),
        "enc_b": u((4 * H,), H),
        "fcq_W_T": u((H, H), H, BF),
        "fcq_b": u((H,), H),
        "fus_Wih_T_f": u((3 * H, 4 * H), H, BF),
        "fus_Whh_T_f": u((H, 4 * H), H, BF),
        "fus_b_f": u((4 * H,), H),
        "fus_Wih_T_b": u((3 * H, 4 * H), H, BF),
        "fus_Whh_T_b": u((H, 4 * H), H, BF),
        "fus_b_b": u((4 * H,), H),
        "gru_Wih_T": u((4 * H, 3 * H), H, BF),
        "gru_Whh_T": u((H, 3 * H), H, BF),
        "gru_b_ih": u((3 * H,), H),
        "gru_b_hh": u((3 * H,), H),
        "hmn": hmn,
    }
    return params


# ----------------------------------------------------------------------------
if __name__ == "__main__":
    # small, self-consistent config
    B = 2            # batch_size
    H = 32           # hidden_size
    VOCAB = 50
    Q_LEN = 8
    D_LEN = 16
    MAX_POOL = 4     # config.max_pool_size
    MAX_DEC_STEPS = 2

    key = jax.random.PRNGKey(0)
    k_param, k_q, k_d = jax.random.split(key, 3)

    params = init_params(k_param, VOCAB, H, MAX_POOL)

    q_seq = jax.random.randint(k_q, (B, Q_LEN), 0, VOCAB, dtype=jnp.int32)
    d_seq = jax.random.randint(k_d, (B, D_LEN), 0, VOCAB, dtype=jnp.int32)
    q_mask = jnp.ones((B, Q_LEN), jnp.int32)
    d_mask = jnp.ones((B, D_LEN), jnp.int32)

    fwd = jax.jit(coattention_forward, static_argnums=(5, 6))
    loss, idx_start, idx_end = fwd(params, q_seq, q_mask, d_seq, d_mask,
                                   MAX_DEC_STEPS, MAX_POOL)

    jax.block_until_ready(idx_start)
    jax.block_until_ready(idx_end)
    assert idx_start.shape == (B,) and idx_end.shape == (B,)
    assert loss is None
    print("KERNEL_OK")
</pallas_src>

<mosaic_0001>
module attributes {stable_mosaic.version = 11 : i64} {
  func.func @_linear_kernel(%arg0: i32, %arg1: memref<16x32xf32, #tpu.memory_space<vmem>>, %arg2: memref<32x128xbf16, #tpu.memory_space<vmem>>, %arg3: memref<1x128xf32, #tpu.memory_space<vmem>>, %arg4: memref<16x128xf32, #tpu.memory_space<vmem>>) attributes {dimension_semantics = [#tpu.dimension_semantics<parallel>], iteration_bounds = array<i64: 1>, scalar_prefetch = 0 : i64, scratch_operands = 0 : i64, tpu.core_type = #tpu.core_type<tc>, window_params = [{transform_indices = @transform_0, window_bounds = array<i64: 16, 32>}, {pipeline_mode = #tpu.pipeline_mode<synchronous>, transform_indices = @transform_1, window_bounds = array<i64: 32, 128>}, {pipeline_mode = #tpu.pipeline_mode<synchronous>, transform_indices = @transform_2, window_bounds = array<i64: 1, 128>}, {transform_indices = @transform_3, window_bounds = array<i64: 16, 128>}]} {
    %c0 = arith.constant 0 : index
    %c0_0 = arith.constant 0 : index
    %0 = vector.load %arg1[%c0, %c0_0] : memref<16x32xf32, #tpu.memory_space<vmem>>, vector<16x32xf32>
    %1 = arith.truncf %0 : vector<16x32xf32> to vector<16x32xbf16>
    %c0_1 = arith.constant 0 : index
    %c0_2 = arith.constant 0 : index
    %2 = vector.load %arg2[%c0_1, %c0_2] : memref<32x128xbf16, #tpu.memory_space<vmem>>, vector<32x128xbf16>
    %cst = arith.constant dense<0.000000e+00> : vector<16x128xf32>
    %3 = tpu.matmul %1, %2, %cst {dimension_numbers = #tpu.dot_dimension_numbers<[1], [0], [0], [1], [0, 0, 1, 1], [], []>} : vector<16x32xbf16>, vector<32x128xbf16>, vector<16x128xf32> -> vector<16x128xf32>
    %c0_3 = arith.constant 0 : index
    %c0_4 = arith.constant 0 : index
    %4 = vector.load %arg3[%c0_3, %c0_4] : memref<1x128xf32, #tpu.memory_space<vmem>>, vector<1x128xf32>
    %5 = vector.broadcast %4 : vector<1x128xf32> to vector<16x128xf32>
    %6 = arith.addf %3, %5 : vector<16x128xf32>
    %c0_5 = arith.constant 0 : index
    %c0_6 = arith.constant 0 : index
    %7 = vector.load %arg4[%c0_5, %c0_6] : memref<16x128xf32, #tpu.memory_space<vmem>>, vector<16x128xf32>
    tpu.vector_store %arg4[%c0_5, %c0_6], %6 {strides = array<i32>} : memref<16x128xf32, #tpu.memory_space<vmem>>, vector<16x128xf32>,
    return
  }
  func.func @transform_0(%arg0: i32) -> (i32, i32) {
    %c0_i32 = arith.constant 0 : i32
    %c0_i32_0 = arith.constant 0 : i32
    return %arg0, %c0_i32 : i32, i32
  }
  func.func @transform_1(%arg0: i32) -> (i32, i32) {
    %c0_i32 = arith.constant 0 : i32
    %c0_i32_0 = arith.constant 0 : i32
    %c0_i32_1 = arith.constant 0 : i32
    return %c0_i32, %c0_i32_0 : i32, i32
  }
  func.func @transform_2(%arg0: i32) -> (i32, i32) {
    %c0_i32 = arith.constant 0 : i32
    %c0_i32_0 = arith.constant 0 : i32
    %c0_i32_1 = arith.constant 0 : i32
    return %c0_i32, %c0_i32_0 : i32, i32
  }
  func.func @transform_3(%arg0: i32) -> (i32, i32) {
    %c0_i32 = arith.constant 0 : i32
    %c0_i32_0 = arith.constant 0 : i32
    return %arg0, %c0_i32 : i32, i32
  }
}

module attributes {stable_mosaic.version = 11 : i64} {
  func.func @_linear_kernel(%arg0: i32, %arg1: memref<32x32xf32, #tpu.memory_space<vmem>>, %arg2: memref<32x128xbf16, #tpu.memory_space<vmem>>, %arg3: memref<1x128xf32, #tpu.memory_space<vmem>>, %arg4: memref<32x128xf32, #tpu.memory_space<vmem>>) attributes {dimension_semantics = [#tpu.dimension_semantics<parallel>], iteration_bounds = array<i64: 1>, scalar_prefetch = 0 : i64, scratch_operands = 0 : i64, tpu.core_type = #tpu.core_type<tc>, window_params = [{transform_indices = @transform_0, window_bounds = array<i64: 32, 32>}, {pipeline_mode = #tpu.pipeline_mode<synchronous>, transform_indices = @transform_1, window_bounds = array<i64: 32, 128>}, {pipeline_mode = #tpu.pipeline_mode<synchronous>, transform_indices = @transform_2, window_bounds = array<i64: 1, 128>}, {transform_indices = @transform_3, window_bounds = array<i64: 32, 128>}]} {
    %c0 = arith.constant 0 : index
    %c0_0 = arith.constant 0 : index
    %0 = vector.load %arg1[%c0, %c0_0] : memref<32x32xf32, #tpu.memory_space<vmem>>, vector<32x32xf32>
    %1 = arith.truncf %0 : vector<32x32xf32> to vector<32x32xbf16>
    %c0_1 = arith.constant 0 : index
    %c0_2 = arith.constant 0 : index
    %2 = vector.load %arg2[%c0_1, %c0_2] : memref<32x128xbf16, #tpu.memory_space<vmem>>, vector<32x128xbf16>
    %cst = arith.constant dense<0.000000e+00> : vector<32x128xf32>
    %3 = tpu.matmul %1, %2, %cst {dimension_numbers = #tpu.dot_dimension_numbers<[1], [0], [0], [1], [0, 0, 1, 1], [], []>} : vector<32x32xbf16>, vector<32x128xbf16>, vector<32x128xf32> -> vector<32x128xf32>
    %c0_3 = arith.constant 0 : index
    %c0_4 = arith.constant 0 : index
    %4 = vector.load %arg3[%c0_3, %c0_4] : memref<1x128xf32, #tpu.memory_space<vmem>>, vector<1x128xf32>
    %5 = vector.broadcast %4 : vector<1x128xf32> to vector<32x128xf32>
    %6 = arith.addf %3, %5 : vector<32x128xf32>
    %c0_5 = arith.constant 0 : index
    %c0_6 = arith.constant 0 : index
    %7 = vector.load %arg4[%c0_5, %c0_6] : memref<32x128xf32, #tpu.memory_space<vmem>>, vector<32x128xf32>
    tpu.vector_store %arg4[%c0_5, %c0_6], %6 {strides = array<i32>} : memref<32x128xf32, #tpu.memory_space<vmem>>, vector<32x128xf32>,
    return
  }
  func.func @transform_0(%arg0: i32) -> (i32, i32) {
    %c0_i32 = arith.constant 0 : i32
    %c0_i32_0 = arith.constant 0 : i32
    return %arg0, %c0_i32 : i32, i32
  }
  func.func @transform_1(%arg0: i32) -> (i32, i32) {
    %c0_i32 = arith.constant 0 : i32
    %c0_i32_0 = arith.constant 0 : i32
    %c0_i32_1 = arith.constant 0 : i32
    return %c0_i32, %c0_i32_0 : i32, i32
  }
  func.func @transform_2(%arg0: i32) -> (i32, i32) {
    %c0_i32 = arith.constant 0 : i32
    %c0_i32_0 = arith.constant 0 : i32
    %c0_i32_1 = arith.constant 0 : i32
    return %c0_i32, %c0_i32_0 : i32, i32
  }
  func.func @transform_3(%arg0: i32) -> (i32, i32) {
    %c0_i32 = arith.constant 0 : i32
    %c0_i32_0 = arith.constant 0 : i32
    return %arg0, %c0_i32 : i32, i32
  }
}

module attributes {stable_mosaic.version = 11 : i64} {
  func.func @_lstm_rec_kernel(%arg0: i32, %arg1: memref<1x2x128xf32, #tpu.memory_space<vmem>>, %arg2: memref<32x128xbf16, #tpu.memory_space<vmem>>, %arg3: memref<1x2x1xf32, #tpu.memory_space<vmem>>, %arg4: memref<2x32xf32, #tpu.memory_space<vmem>>, %arg5: memref<2x32xf32, #tpu.memory_space<vmem>>, %arg6: memref<1x2x32xf32, #tpu.memory_space<vmem>>, %arg7: memref<2x32xf32, #tpu.memory_space<vmem>>, %arg8: memref<2x32xf32, #tpu.memory_space<vmem>>) attributes {dimension_semantics = [#tpu.dimension_semantics<arbitrary>], iteration_bounds = array<i64: 8>, scalar_prefetch = 0 : i64, scratch_operands = 0 : i64, tpu.core_type = #tpu.core_type<tc>, window_params = [{transform_indices = @transform_0, window_bounds = array<i64: 1, 2, 128>}, {pipeline_mode = #tpu.pipeline_mode<synchronous>, transform_indices = @transform_1, window_bounds = array<i64: 32, 128>}, {transform_indices = @transform_2, window_bounds = array<i64: 1, 2, 1>}, {pipeline_mode = #tpu.pipeline_mode<synchronous>, transform_indices = @transform_3, window_bounds = array<i64: 2, 32>}, {pipeline_mode = #tpu.pipeline_mode<synchronous>, transform_indices = @transform_4, window_bounds = array<i64: 2, 32>}, {transform_indices = @transform_5, window_bounds = array<i64: 1, 2, 32>}, {pipeline_mode = #tpu.pipeline_mode<synchronous>, transform_indices = @transform_6, window_bounds = array<i64: 2, 32>}, {pipeline_mode = #tpu.pipeline_mode<synchronous>, transform_indices = @transform_7, window_bounds = array<i64: 2, 32>}]} {
    %c0_i32 = arith.constant 0 : i32
    %0 = arith.cmpi eq, %arg0, %c0_i32 : i32
    %1 = arith.extui %0 : i1 to i32
    %c0_i32_0 = arith.constant 0 : i32
    %2 = arith.cmpi ne, %1, %c0_i32_0 : i32
    scf.if %2 {
      %c0_24 = arith.constant 0 : index
      %c0_25 = arith.constant 0 : index
      %59 = vector.load %arg4[%c0_24, %c0_25] : memref<2x32xf32, #tpu.memory_space<vmem>>, vector<2x32xf32>
      %c0_26 = arith.constant 0 : index
      %c0_27 = arith.constant 0 : index
      %60 = vector.load %arg7[%c0_26, %c0_27] : memref<2x32xf32, #tpu.memory_space<vmem>>, vector<2x32xf32>
      tpu.vector_store %arg7[%c0_26, %c0_27], %59 {strides = array<i32>} : memref<2x32xf32, #tpu.memory_space<vmem>>, vector<2x32xf32>,
      %c0_28 = arith.constant 0 : index
      %c0_29 = arith.constant 0 : index
      %61 = vector.load %arg5[%c0_28, %c0_29] : memref<2x32xf32, #tpu.memory_space<vmem>>, vector<2x32xf32>
      %c0_30 = arith.constant 0 : index
      %c0_31 = arith.constant 0 : index
      %62 = vector.load %arg8[%c0_30, %c0_31] : memref<2x32xf32, #tpu.memory_space<vmem>>, vector<2x32xf32>
      tpu.vector_store %arg8[%c0_30, %c0_31], %61 {strides = array<i32>} : memref<2x32xf32, #tpu.memory_space<vmem>>, vector<2x32xf32>,
    } else {
    }
    %c0 = arith.constant 0 : index
    %c0_1 = arith.constant 0 : index
    %3 = vector.load %arg7[%c0, %c0_1] : memref<2x32xf32, #tpu.memory_space<vmem>>, vector<2x32xf32>
    %c0_2 = arith.constant 0 : index
    %c0_3 = arith.constant 0 : index
    %4 = vector.load %arg8[%c0_2, %c0_3] : memref<2x32xf32, #tpu.memory_space<vmem>>, vector<2x32xf32>
    %c0_4 = arith.constant 0 : index
    %c0_5 = arith.constant 0 : index
    %c0_6 = arith.constant 0 : index
    %5 = vector.load %arg1[%c0_4, %c0_5, %c0_6] : memref<1x2x128xf32, #tpu.memory_space<vmem>>, vector<1x2x128xf32>
    %6 = vector.shape_cast %5 : vector<1x2x128xf32> to vector<2x128xf32>
    %7 = arith.truncf %3 : vector<2x32xf32> to vector<2x32xbf16>
    %c0_7 = arith.constant 0 : index
    %c0_8 = arith.constant 0 : index
    %8 = vector.load %arg2[%c0_7, %c0_8] : memref<32x128xbf16, #tpu.memory_space<vmem>>, vector<32x128xbf16>
    %cst = arith.constant dense<0.000000e+00> : vector<2x128xf32>
    %9 = tpu.matmul %7, %8, %cst {dimension_numbers = #tpu.dot_dimension_numbers<[1], [0], [0], [1], [0, 0, 1, 1], [], []>} : vector<2x32xbf16>, vector<32x128xbf16>, vector<2x128xf32> -> vector<2x128xf32>
    %10 = arith.addf %6, %9 : vector<2x128xf32>
    %11 = vector.extract_strided_slice %10 {offsets = [0, 0], sizes = [2, 32], strides = [1, 1]} : vector<2x128xf32> to vector<2x32xf32>
    %12 = arith.negf %11 : vector<2x32xf32>
    %13 = math.exp %12 : vector<2x32xf32>
    %cst_9 = arith.constant 1.000000e+00 : f32
    %14 = vector.broadcast %cst_9 : f32 to vector<2x32xf32>
    %15 = arith.addf %14, %13 : vector<2x32xf32>
    %16 = arith.divf %14, %15 : vector<2x32xf32>
    %17 = vector.extract_strided_slice %10 {offsets = [0, 32], sizes = [2, 32], strides = [1, 1]} : vector<2x128xf32> to vector<2x32xf32>
    %18 = arith.negf %17 : vector<2x32xf32>
    %19 = math.exp %18 : vector<2x32xf32>
    %cst_10 = arith.constant 1.000000e+00 : f32
    %20 = vector.broadcast %cst_10 : f32 to vector<2x32xf32>
    %21 = arith.addf %20, %19 : vector<2x32xf32>
    %22 = arith.divf %20, %21 : vector<2x32xf32>
    %23 = vector.extract_strided_slice %10 {offsets = [0, 64], sizes = [2, 32], strides = [1, 1]} : vector<2x128xf32> to vector<2x32xf32>
    %24 = math.tanh %23 : vector<2x32xf32>
    %25 = vector.extract_strided_slice %10 {offsets = [0, 96], sizes = [2, 32], strides = [1, 1]} : vector<2x128xf32> to vector<2x32xf32>
    %26 = arith.negf %25 : vector<2x32xf32>
    %27 = math.exp %26 : vector<2x32xf32>
    %cst_11 = arith.constant 1.000000e+00 : f32
    %28 = vector.broadcast %cst_11 : f32 to vector<2x32xf32>
    %29 = arith.addf %28, %27 : vector<2x32xf32>
    %30 = arith.divf %28, %29 : vector<2x32xf32>
    %31 = arith.mulf %22, %4 : vector<2x32xf32>
    %32 = arith.mulf %16, %24 : vector<2x32xf32>
    %33 = arith.addf %31, %32 : vector<2x32xf32>
    %34 = math.tanh %33 : vector<2x32xf32>
    %35 = arith.mulf %30, %34 : vector<2x32xf32>
    %c0_12 = arith.constant 0 : index
    %c0_13 = arith.constant 0 : index
    %c0_14 = arith.constant 0 : index
    %36 = vector.load %arg3[%c0_12, %c0_13, %c0_14] : memref<1x2x1xf32, #tpu.memory_space<vmem>>, vector<1x2x1xf32>
    %37 = vector.shape_cast %36 : vector<1x2x1xf32> to vector<2x1xf32>
    %38 = vector.broadcast %37 : vector<2x1xf32> to vector<2x32xf32>
    %39 = arith.mulf %38, %35 : vector<2x32xf32>
    %cst_15 = arith.constant 1.000000e+00 : f32
    %40 = vector.broadcast %cst_15 : f32 to vector<2x1xf32>
    %41 = arith.subf %40, %37 : vector<2x1xf32>
    %42 = vector.broadcast %41 : vector<2x1xf32> to vector<2x32xf32>
    %43 = arith.mulf %42, %3 : vector<2x32xf32>
    %44 = arith.addf %39, %43 : vector<2x32xf32>
    %c0_16 = arith.constant 0 : index
    %c0_17 = arith.constant 0 : index
    %45 = vector.load %arg7[%c0_16, %c0_17] : memref<2x32xf32, #tpu.memory_space<vmem>>, vector<2x32xf32>
    tpu.vector_store %arg7[%c0_16, %c0_17], %44 {strides = array<i32>} : memref<2x32xf32, #tpu.memory_space<vmem>>, vector<2x32xf32>,
    %46 = vector.broadcast %37 : vector<2x1xf32> to vector<2x32xf32>
    %47 = arith.mulf %46, %33 : vector<2x32xf32>
    %cst_18 = arith.constant 1.000000e+00 : f32
    %48 = vector.broadcast %cst_18 : f32 to vector<2x1xf32>
    %49 = arith.subf %48, %37 : vector<2x1xf32>
    %50 = vector.broadcast %49 : vector<2x1xf32> to vector<2x32xf32>
    %51 = arith.mulf %50, %4 : vector<2x32xf32>
    %52 = arith.addf %47, %51 : vector<2x32xf32>
    %c0_19 = arith.constant 0 : index
    %c0_20 = arith.constant 0 : index
    %53 = vector.load %arg8[%c0_19, %c0_20] : memref<2x32xf32, #tpu.memory_space<vmem>>, vector<2x32xf32>
    tpu.vector_store %arg8[%c0_19, %c0_20], %52 {strides = array<i32>} : memref<2x32xf32, #tpu.memory_space<vmem>>, vector<2x32xf32>,
    %54 = vector.broadcast %37 : vector<2x1xf32> to vector<2x32xf32>
    %55 = arith.mulf %54, %35 : vector<2x32xf32>
    %c0_21 = arith.constant 0 : index
    %c0_22 = arith.constant 0 : index
    %c0_23 = arith.constant 0 : index
    %56 = vector.load %arg6[%c0_21, %c0_22, %c0_23] : memref<1x2x32xf32, #tpu.memory_space<vmem>>, vector<1x2x32xf32>
    %57 = vector.shape_cast %56 : vector<1x2x32xf32> to vector<2x32xf32>
    %58 = vector.shape_cast %55 : vector<2x32xf32> to vector<1x2x32xf32>
    tpu.vector_store %arg6[%c0_21, %c0_22, %c0_23], %58 {strides = array<i32>} : memref<1x2x32xf32, #tpu.memory_space<vmem>>, vector<1x2x32xf32>,
    return
  }
  func.func @transform_0(%arg0: i32) -> (i32, i32, i32) {
    %c0_i32 = arith.constant 0 : i32
    %c0_i32_0 = arith.constant 0 : i32
    %c0_i32_1 = arith.constant 0 : i32
    return %arg0, %c0_i32, %c0_i32_0 : i32, i32, i32
  }
  func.func @transform_1(%arg0: i32) -> (i32, i32) {
    %c0_i32 = arith.constant 0 : i32
    %c0_i32_0 = arith.constant 0 : i32
    %c0_i32_1 = arith.constant 0 : i32
    return %c0_i32, %c0_i32_0 : i32, i32
  }
  func.func @transform_2(%arg0: i32) -> (i32, i32, i32) {
    %c0_i32 = arith.constant 0 : i32
    %c0_i32_0 = arith.constant 0 : i32
    %c0_i32_1 = arith.constant 0 : i32
    return %arg0, %c0_i32, %c0_i32_0 : i32, i32, i32
  }
  func.func @transform_3(%arg0: i32) -> (i32, i32) {
    %c0_i32 = arith.constant 0 : i32
    %c0_i32_0 = arith.constant 0 : i32
    %c0_i32_1 = arith.constant 0 : i32
    return %c0_i32, %c0_i32_0 : i32, i32
  }
  func.func @transform_4(%arg0: i32) -> (i32, i32) {
    %c0_i32 = arith.constant 0 : i32
    %c0_i32_0 = arith.constant 0 : i32
    %c0_i32_1 = arith.constant 0 : i32
    return %c0_i32, %c0_i32_0 : i32, i32
  }
  func.func @transform_5(%arg0: i32) -> (i32, i32, i32) {
    %c0_i32 = arith.constant 0 : i32
    %c0_i32_0 = arith.constant 0 : i32
    %c0_i32_1 = arith.constant 0 : i32
    return %arg0, %c0_i32, %c0_i32_0 : i32, i32, i32
  }
  func.func @transform_6(%arg0: i32) -> (i32, i32) {
    %c0_i32 = arith.constant 0 : i32
    %c0_i32_0 = arith.constant 0 : i32
    %c0_i32_1 = arith.constant 0 : i32
    return %c0_i32, %c0_i32_0 : i32, i32
  }
  func.func @transform_7(%arg0: i32) -> (i32, i32) {
    %c0_i32 = arith.constant 0 : i32
    %c0_i32_0 = arith.constant 0 : i32
    %c0_i32_1 = arith.constant 0 : i32
    return %c0_i32, %c0_i32_0 : i32, i32
  }
}

module attributes {stable_mosaic.version = 11 : i64} {
  func.func @_lstm_rec_kernel(%arg0: i32, %arg1: memref<1x2x128xf32, #tpu.memory_space<vmem>>, %arg2: memref<32x128xbf16, #tpu.memory_space<vmem>>, %arg3: memref<1x2x1xf32, #tpu.memory_space<vmem>>, %arg4: memref<2x32xf32, #tpu.memory_space<vmem>>, %arg5: memref<2x32xf32, #tpu.memory_space<vmem>>, %arg6: memref<1x2x32xf32, #tpu.memory_space<vmem>>, %arg7: memref<2x32xf32, #tpu.memory_space<vmem>>, %arg8: memref<2x32xf32, #tpu.memory_space<vmem>>) attributes {dimension_semantics = [#tpu.dimension_semantics<arbitrary>], iteration_bounds = array<i64: 16>, scalar_prefetch = 0 : i64, scratch_operands = 0 : i64, tpu.core_type = #tpu.core_type<tc>, window_params = [{transform_indices = @transform_0, window_bounds = array<i64: 1, 2, 128>}, {pipeline_mode = #tpu.pipeline_mode<synchronous>, transform_indices = @transform_1, window_bounds = array<i64: 32, 128>}, {transform_indices = @transform_2, window_bounds = array<i64: 1, 2, 1>}, {pipeline_mode = #tpu.pipeline_mode<synchronous>, transform_indices = @transform_3, window_bounds = array<i64: 2, 32>}, {pipeline_mode = #tpu.pipeline_mode<synchronous>, transform_indices = @transform_4, window_bounds = array<i64: 2, 32>}, {transform_indices = @transform_5, window_bounds = array<i64: 1, 2, 32>}, {pipeline_mode = #tpu.pipeline_mode<synchronous>, transform_indices = @transform_6, window_bounds = array<i64: 2, 32>}, {pipeline_mode = #tpu.pipeline_mode<synchronous>, transform_indices = @transform_7, window_bounds = array<i64: 2, 32>}]} {
    %c0_i32 = arith.constant 0 : i32
    %0 = arith.cmpi eq, %arg0, %c0_i32 : i32
    %1 = arith.extui %0 : i1 to i32
    %c0_i32_0 = arith.constant 0 : i32
    %2 = arith.cmpi ne, %1, %c0_i32_0 : i32
    scf.if %2 {
      %c0_24 = arith.constant 0 : index
      %c0_25 = arith.constant 0 : index
      %59 = vector.load %arg4[%c0_24, %c0_25] : memref<2x32xf32, #tpu.memory_space<vmem>>, vector<2x32xf32>
      %c0_26 = arith.constant 0 : index
      %c0_27 = arith.constant 0 : index
      %60 = vector.load %arg7[%c0_26, %c0_27] : memref<2x32xf32, #tpu.memory_space<vmem>>, vector<2x32xf32>
      tpu.vector_store %arg7[%c0_26, %c0_27], %59 {strides = array<i32>} : memref<2x32xf32, #tpu.memory_space<vmem>>, vector<2x32xf32>,
      %c0_28 = arith.constant 0 : index
      %c0_29 = arith.constant 0 : index
      %61 = vector.load %arg5[%c0_28, %c0_29] : memref<2x32xf32, #tpu.memory_space<vmem>>, vector<2x32xf32>
      %c0_30 = arith.constant 0 : index
      %c0_31 = arith.constant 0 : index
      %62 = vector.load %arg8[%c0_30, %c0_31] : memref<2x32xf32, #tpu.memory_space<vmem>>, vector<2x32xf32>
      tpu.vector_store %arg8[%c0_30, %c0_31], %61 {strides = array<i32>} : memref<2x32xf32, #tpu.memory_space<vmem>>, vector<2x32xf32>,
    } else {
    }
    %c0 = arith.constant 0 : index
    %c0_1 = arith.constant 0 : index
    %3 = vector.load %arg7[%c0, %c0_1] : memref<2x32xf32, #tpu.memory_space<vmem>>, vector<2x32xf32>
    %c0_2 = arith.constant 0 : index
    %c0_3 = arith.constant 0 : index
    %4 = vector.load %arg8[%c0_2, %c0_3] : memref<2x32xf32, #tpu.memory_space<vmem>>, vector<2x32xf32>
    %c0_4 = arith.constant 0 : index
    %c0_5 = arith.constant 0 : index
    %c0_6 = arith.constant 0 : index
    %5 = vector.load %arg1[%c0_4, %c0_5, %c0_6] : memref<1x2x128xf32, #tpu.memory_space<vmem>>, vector<1x2x128xf32>
    %6 = vector.shape_cast %5 : vector<1x2x128xf32> to vector<2x128xf32>
    %7 = arith.truncf %3 : vector<2x32xf32> to vector<2x32xbf16>
    %c0_7 = arith.constant 0 : index
    %c0_8 = arith.constant 0 : index
    %8 = vector.load %arg2[%c0_7, %c0_8] : memref<32x128xbf16, #tpu.memory_space<vmem>>, vector<32x128xbf16>
    %cst = arith.constant dense<0.000000e+00> : vector<2x128xf32>
    %9 = tpu.matmul %7, %8, %cst {dimension_numbers = #tpu.dot_dimension_numbers<[1], [0], [0], [1], [0, 0, 1, 1], [], []>} : vector<2x32xbf16>, vector<32x128xbf16>, vector<2x128xf32> -> vector<2x128xf32>
    %10 = arith.addf %6, %9 : vector<2x128xf32>
    %11 = vector.extract_strided_slice %10 {offsets = [0, 0], sizes = [2, 32], strides = [1, 1]} : vector<2x128xf32> to vector<2x32xf32>
    %12 = arith.negf %11 : vector<2x32xf32>
    %13 = math.exp %12 : vector<2x32xf32>
    %cst_9 = arith.constant 1.000000e+00 : f32
    %14 = vector.broadcast %cst_9 : f32 to vector<2x32xf32>
    %15 = arith.addf %14, %13 : vector<2x32xf32>
    %16 = arith.divf %14, %15 : vector<2x32xf32>
    %17 = vector.extract_strided_slice %10 {offsets = [0, 32], sizes = [2, 32], strides = [1, 1]} : vector<2x128xf32> to vector<2x32xf32>
    %18 = arith.negf %17 : vector<2x32xf32>
    %19 = math.exp %18 : vector<2x32xf32>
    %cst_10 = arith.constant 1.000000e+00 : f32
    %20 = vector.broadcast %cst_10 : f32 to vector<2x32xf32>
    %21 = arith.addf %20, %19 : vector<2x32xf32>
    %22 = arith.divf %20, %21 : vector<2x32xf32>
    %23 = vector.extract_strided_slice %10 {offsets = [0, 64], sizes = [2, 32], strides = [1, 1]} : vector<2x128xf32> to vector<2x32xf32>
    %24 = math.tanh %23 : vector<2x32xf32>
    %25 = vector.extract_strided_slice %10 {offsets = [0, 96], sizes = [2, 32], strides = [1, 1]} : vector<2x128xf32> to vector<2x32xf32>
    %26 = arith.negf %25 : vector<2x32xf32>
    %27 = math.exp %26 : vector<2x32xf32>
    %cst_11 = arith.constant 1.000000e+00 : f32
    %28 = vector.broadcast %cst_11 : f32 to vector<2x32xf32>
    %29 = arith.addf %28, %27 : vector<2x32xf32>
    %30 = arith.divf %28, %29 : vector<2x32xf32>
    %31 = arith.mulf %22, %4 : vector<2x32xf32>
    %32 = arith.mulf %16, %24 : vector<2x32xf32>
    %33 = arith.addf %31, %32 : vector<2x32xf32>
    %34 = math.tanh %33 : vector<2x32xf32>
    %35 = arith.mulf %30, %34 : vector<2x32xf32>
    %c0_12 = arith.constant 0 : index
    %c0_13 = arith.constant 0 : index
    %c0_14 = arith.constant 0 : index
    %36 = vector.load %arg3[%c0_12, %c0_13, %c0_14] : memref<1x2x1xf32, #tpu.memory_space<vmem>>, vector<1x2x1xf32>
    %37 = vector.shape_cast %36 : vector<1x2x1xf32> to vector<2x1xf32>
    %38 = vector.broadcast %37 : vector<2x1xf32> to vector<2x32xf32>
    %39 = arith.mulf %38, %35 : vector<2x32xf32>
    %cst_15 = arith.constant 1.000000e+00 : f32
    %40 = vector.broadcast %cst_15 : f32 to vector<2x1xf32>
    %41 = arith.subf %40, %37 : vector<2x1xf32>
    %42 = vector.broadcast %41 : vector<2x1xf32> to vector<2x32xf32>
    %43 = arith.mulf %42, %3 : vector<2x32xf32>
    %44 = arith.addf %39, %43 : vector<2x32xf32>
    %c0_16 = arith.constant 0 : index
    %c0_17 = arith.constant 0 : index
    %45 = vector.load %arg7[%c0_16, %c0_17] : memref<2x32xf32, #tpu.memory_space<vmem>>, vector<2x32xf32>
    tpu.vector_store %arg7[%c0_16, %c0_17], %44 {strides = array<i32>} : memref<2x32xf32, #tpu.memory_space<vmem>>, vector<2x32xf32>,
    %46 = vector.broadcast %37 : vector<2x1xf32> to vector<2x32xf32>
    %47 = arith.mulf %46, %33 : vector<2x32xf32>
    %cst_18 = arith.constant 1.000000e+00 : f32
    %48 = vector.broadcast %cst_18 : f32 to vector<2x1xf32>
    %49 = arith.subf %48, %37 : vector<2x1xf32>
    %50 = vector.broadcast %49 : vector<2x1xf32> to vector<2x32xf32>
    %51 = arith.mulf %50, %4 : vector<2x32xf32>
    %52 = arith.addf %47, %51 : vector<2x32xf32>
    %c0_19 = arith.constant 0 : index
    %c0_20 = arith.constant 0 : index
    %53 = vector.load %arg8[%c0_19, %c0_20] : memref<2x32xf32, #tpu.memory_space<vmem>>, vector<2x32xf32>
    tpu.vector_store %arg8[%c0_19, %c0_20], %52 {strides = array<i32>} : memref<2x32xf32, #tpu.memory_space<vmem>>, vector<2x32xf32>,
    %54 = vector.broadcast %37 : vector<2x1xf32> to vector<2x32xf32>
    %55 = arith.mulf %54, %35 : vector<2x32xf32>
    %c0_21 = arith.constant 0 : index
    %c0_22 = arith.constant 0 : index
    %c0_23 = arith.constant 0 : index
    %56 = vector.load %arg6[%c0_21, %c0_22, %c0_23] : memref<1x2x32xf32, #tpu.memory_space<vmem>>, vector<1x2x32xf32>
    %57 = vector.shape_cast %56 : vector<1x2x32xf32> to vector<2x32xf32>
    %58 = vector.shape_cast %55 : vector<2x32xf32> to vector<1x2x32xf32>
    tpu.vector_store %arg6[%c0_21, %c0_22, %c0_23], %58 {strides = array<i32>} : memref<1x2x32xf32, #tpu.memory_space<vmem>>, vector<1x2x32xf32>,
    return
  }
  func.func @transform_0(%arg0: i32) -> (i32, i32, i32) {
    %c0_i32 = arith.constant 0 : i32
    %c0_i32_0 = arith.constant 0 : i32
    %c0_i32_1 = arith.constant 0 : i32
    return %arg0, %c0_i32, %c0_i32_0 : i32, i32, i32
  }
  func.func @transform_1(%arg0: i32) -> (i32, i32) {
    %c0_i32 = arith.constant 0 : i32
    %c0_i32_0 = arith.constant 0 : i32
    %c0_i32_1 = arith.constant 0 : i32
    return %c0_i32, %c0_i32_0 : i32, i32
  }
  func.func @transform_2(%arg0: i32) -> (i32, i32, i32) {
    %c0_i32 = arith.constant 0 : i32
    %c0_i32_0 = arith.constant 0 : i32
    %c0_i32_1 = arith.constant 0 : i32
    return %arg0, %c0_i32, %c0_i32_0 : i32, i32, i32
  }
  func.func @transform_3(%arg0: i32) -> (i32, i32) {
    %c0_i32 = arith.constant 0 : i32
    %c0_i32_0 = arith.constant 0 : i32
    %c0_i32_1 = arith.constant 0 : i32
    return %c0_i32, %c0_i32_0 : i32, i32
  }
  func.func @transform_4(%arg0: i32) -> (i32, i32) {
    %c0_i32 = arith.constant 0 : i32
    %c0_i32_0 = arith.constant 0 : i32
    %c0_i32_1 = arith.constant 0 : i32
    return %c0_i32, %c0_i32_0 : i32, i32
  }
  func.func @transform_5(%arg0: i32) -> (i32, i32, i32) {
    %c0_i32 = arith.constant 0 : i32
    %c0_i32_0 = arith.constant 0 : i32
    %c0_i32_1 = arith.constant 0 : i32
    return %arg0, %c0_i32, %c0_i32_0 : i32, i32, i32
  }
  func.func @transform_6(%arg0: i32) -> (i32, i32) {
    %c0_i32 = arith.constant 0 : i32
    %c0_i32_0 = arith.constant 0 : i32
    %c0_i32_1 = arith.constant 0 : i32
    return %c0_i32, %c0_i32_0 : i32, i32
  }
  func.func @transform_7(%arg0: i32) -> (i32, i32) {
    %c0_i32 = arith.constant 0 : i32
    %c0_i32_0 = arith.constant 0 : i32
    %c0_i32_1 = arith.constant 0 : i32
    return %c0_i32, %c0_i32_0 : i32, i32
  }
}

module attributes {stable_mosaic.version = 11 : i64} {
  func.func @_linear_kernel(%arg0: i32, %arg1: memref<16x32xf32, #tpu.memory_space<vmem>>, %arg2: memref<32x32xbf16, #tpu.memory_space<vmem>>, %arg3: memref<1x32xf32, #tpu.memory_space<vmem>>, %arg4: memref<16x32xf32, #tpu.memory_space<vmem>>) attributes {dimension_semantics = [#tpu.dimension_semantics<parallel>], iteration_bounds = array<i64: 1>, scalar_prefetch = 0 : i64, scratch_operands = 0 : i64, tpu.core_type = #tpu.core_type<tc>, window_params = [{transform_indices = @transform_0, window_bounds = array<i64: 16, 32>}, {pipeline_mode = #tpu.pipeline_mode<synchronous>, transform_indices = @transform_1, window_bounds = array<i64: 32, 32>}, {pipeline_mode = #tpu.pipeline_mode<synchronous>, transform_indices = @transform_2, window_bounds = array<i64: 1, 32>}, {transform_indices = @transform_3, window_bounds = array<i64: 16, 32>}]} {
    %c0 = arith.constant 0 : index
    %c0_0 = arith.constant 0 : index
    %0 = vector.load %arg1[%c0, %c0_0] : memref<16x32xf32, #tpu.memory_space<vmem>>, vector<16x32xf32>
    %1 = arith.truncf %0 : vector<16x32xf32> to vector<16x32xbf16>
    %c0_1 = arith.constant 0 : index
    %c0_2 = arith.constant 0 : index
    %2 = vector.load %arg2[%c0_1, %c0_2] : memref<32x32xbf16, #tpu.memory_space<vmem>>, vector<32x32xbf16>
    %cst = arith.constant dense<0.000000e+00> : vector<16x32xf32>
    %3 = tpu.matmul %1, %2, %cst {dimension_numbers = #tpu.dot_dimension_numbers<[1], [0], [0], [1], [0, 0, 1, 1], [], []>} : vector<16x32xbf16>, vector<32x32xbf16>, vector<16x32xf32> -> vector<16x32xf32>
    %c0_3 = arith.constant 0 : index
    %c0_4 = arith.constant 0 : index
    %4 = vector.load %arg3[%c0_3, %c0_4] : memref<1x32xf32, #tpu.memory_space<vmem>>, vector<1x32xf32>
    %5 = vector.broadcast %4 : vector<1x32xf32> to vector<16x32xf32>
    %6 = arith.addf %3, %5 : vector<16x32xf32>
    %7 = math.tanh %6 : vector<16x32xf32>
    %c0_5 = arith.constant 0 : index
    %c0_6 = arith.constant 0 : index
    %8 = vector.load %arg4[%c0_5, %c0_6] : memref<16x32xf32, #tpu.memory_space<vmem>>, vector<16x32xf32>
    tpu.vector_store %arg4[%c0_5, %c0_6], %7 {strides = array<i32>} : memref<16x32xf32, #tpu.memory_space<vmem>>, vector<16x32xf32>,
    return
  }
  func.func @transform_0(%arg0: i32) -> (i32, i32) {
    %c0_i32 = arith.constant 0 : i32
    %c0_i32_0 = arith.constant 0 : i32
    return %arg0, %c0_i32 : i32, i32
  }
  func.func @transform_1(%arg0: i32) -> (i32, i32) {
    %c0_i32 = arith.constant 0 : i32
    %c0_i32_0 = arith.constant 0 : i32
    %c0_i32_1 = arith.constant 0 : i32
    return %c0_i32, %c0_i32_0 : i32, i32
  }
  func.func @transform_2(%arg0: i32) -> (i32, i32) {
    %c0_i32 = arith.constant 0 : i32
    %c0_i32_0 = arith.constant 0 : i32
    %c0_i32_1 = arith.constant 0 : i32
    return %c0_i32, %c0_i32_0 : i32, i32
  }
  func.func @transform_3(%arg0: i32) -> (i32, i32) {
    %c0_i32 = arith.constant 0 : i32
    %c0_i32_0 = arith.constant 0 : i32
    return %arg0, %c0_i32 : i32, i32
  }
}

module attributes {stable_mosaic.version = 11 : i64} {
  func.func @_coatt_kernel(%arg0: i32, %arg1: memref<1x8x32xf32, #tpu.memory_space<vmem>>, %arg2: memref<1x16x32xf32, #tpu.memory_space<vmem>>, %arg3: memref<1x16x128xbf16, #tpu.memory_space<vmem>>) attributes {dimension_semantics = [#tpu.dimension_semantics<parallel>], iteration_bounds = array<i64: 2>, scalar_prefetch = 0 : i64, scratch_operands = 0 : i64, tpu.core_type = #tpu.core_type<tc>, window_params = [{transform_indices = @transform_0, window_bounds = array<i64: 1, 8, 32>}, {transform_indices = @transform_1, window_bounds = array<i64: 1, 16, 32>}, {transform_indices = @transform_2, window_bounds = array<i64: 1, 16, 128>}]} {
    %c0 = arith.constant 0 : index
    %c0_0 = arith.constant 0 : index
    %c0_1 = arith.constant 0 : index
    %0 = vector.load %arg1[%c0, %c0_0, %c0_1] : memref<1x8x32xf32, #tpu.memory_space<vmem>>, vector<1x8x32xf32>
    %1 = vector.shape_cast %0 : vector<1x8x32xf32> to vector<8x32xf32>
    %c0_2 = arith.constant 0 : index
    %c0_3 = arith.constant 0 : index
    %c0_4 = arith.constant 0 : index
    %2 = vector.load %arg2[%c0_2, %c0_3, %c0_4] : memref<1x16x32xf32, #tpu.memory_space<vmem>>, vector<1x16x32xf32>
    %3 = vector.shape_cast %2 : vector<1x16x32xf32> to vector<16x32xf32>
    %4 = arith.truncf %1 : vector<8x32xf32> to vector<8x32xbf16>
    %5 = arith.truncf %3 : vector<16x32xf32> to vector<16x32xbf16>
    %cst = arith.constant dense<0.000000e+00> : vector<8x16xf32>
    %6 = tpu.matmul %4, %5, %cst {dimension_numbers = #tpu.dot_dimension_numbers<[1], [1], [0], [0], [0, 0, 1, 0], [], []>} : vector<8x32xbf16>, vector<16x32xbf16>, vector<8x16xf32> -> vector<8x16xf32>
    %cst_5 = arith.constant dense<0xFF800000> : vector<16xf32>
    %7 = vector.multi_reduction <maximumf>, %6, %cst_5 [0] : vector<8x16xf32> to vector<16xf32>
    %8 = vector.shape_cast %7 : vector<16xf32> to vector<1x16xf32>
    %9 = vector.broadcast %8 : vector<1x16xf32> to vector<8x16xf32>
    %10 = arith.subf %6, %9 : vector<8x16xf32>
    %11 = math.exp %10 : vector<8x16xf32>
    %cst_6 = arith.constant dense<0.000000e+00> : vector<16xf32>
    %12 = vector.multi_reduction <add>, %11, %cst_6 [0] : vector<8x16xf32> to vector<16xf32>
    %13 = vector.shape_cast %12 : vector<16xf32> to vector<1x16xf32>
    %14 = tpu.reciprocal %13 {approx = true} : vector<1x16xf32> -> vector<1x16xf32>
    %15 = vector.broadcast %14 : vector<1x16xf32> to vector<8x16xf32>
    %16 = arith.mulf %11, %15 : vector<8x16xf32>
    %cst_7 = arith.constant dense<0xFF800000> : vector<8xf32>
    %17 = vector.multi_reduction <maximumf>, %6, %cst_7 [1] : vector<8x16xf32> to vector<8xf32>
    %18 = vector.shape_cast %17 : vector<8xf32> to vector<8x1xf32>
    %19 = vector.broadcast %18 : vector<8x1xf32> to vector<8x16xf32>
    %20 = arith.subf %6, %19 : vector<8x16xf32>
    %21 = math.exp %20 : vector<8x16xf32>
    %cst_8 = arith.constant dense<0.000000e+00> : vector<8xf32>
    %22 = vector.multi_reduction <add>, %21, %cst_8 [1] : vector<8x16xf32> to vector<8xf32>
    %23 = vector.shape_cast %22 : vector<8xf32> to vector<8x1xf32>
    %24 = tpu.reciprocal %23 {approx = true} : vector<8x1xf32> -> vector<8x1xf32>
    %25 = vector.broadcast %24 : vector<8x1xf32> to vector<8x16xf32>
    %26 = arith.mulf %21, %25 : vector<8x16xf32>
    %27 = arith.truncf %16 : vector<8x16xf32> to vector<8x16xbf16>
    %cst_9 = arith.constant dense<0.000000e+00> : vector<8x32xf32>
    %28 = tpu.matmul %27, %5, %cst_9 {dimension_numbers = #tpu.dot_dimension_numbers<[1], [0], [0], [1], [0, 0, 1, 1], [], []>} : vector<8x16xbf16>, vector<16x32xbf16>, vector<8x32xf32> -> vector<8x32xf32>
    %29 = arith.truncf %26 : vector<8x16xf32> to vector<8x16xbf16>
    %cst_10 = arith.constant dense<0.000000e+00> : vector<16x32xf32>
    %30 = tpu.matmul %29, %4, %cst_10 {dimension_numbers = #tpu.dot_dimension_numbers<[0], [0], [1], [1], [0, 1, 1, 1], [], []>} : vector<8x16xbf16>, vector<8x32xbf16>, vector<16x32xf32> -> vector<16x32xf32>
    %31 = arith.truncf %26 : vector<8x16xf32> to vector<8x16xbf16>
    %32 = arith.truncf %28 : vector<8x32xf32> to vector<8x32xbf16>
    %cst_11 = arith.constant dense<0.000000e+00> : vector<16x32xf32>
    %33 = tpu.matmul %31, %32, %cst_11 {dimension_numbers = #tpu.dot_dimension_numbers<[0], [0], [1], [1], [0, 1, 1, 1], [], []>} : vector<8x16xbf16>, vector<8x32xbf16>, vector<16x32xf32> -> vector<16x32xf32>
    %cst_12 = arith.constant 0.000000e+00 : f32
    %34 = vector.broadcast %cst_12 : f32 to vector<16x32xf32>
    %35 = tpu.concatenate %30, %33, %3, %34 in 1 : vector<16x32xf32>, vector<16x32xf32>, vector<16x32xf32>, vector<16x32xf32> -> vector<16x128xf32>
    %36 = arith.truncf %35 : vector<16x128xf32> to vector<16x128xbf16>
    %c0_13 = arith.constant 0 : index
    %c0_14 = arith.constant 0 : index
    %c0_15 = arith.constant 0 : index
    %37 = vector.load %arg3[%c0_13, %c0_14, %c0_15] : memref<1x16x128xbf16, #tpu.memory_space<vmem>>, vector<1x16x128xbf16>
    %38 = vector.shape_cast %37 : vector<1x16x128xbf16> to vector<16x128xbf16>
    %39 = vector.shape_cast %36 : vector<16x128xbf16> to vector<1x16x128xbf16>
    tpu.vector_store %arg3[%c0_13, %c0_14, %c0_15], %39 {strides = array<i32>} : memref<1x16x128xbf16, #tpu.memory_space<vmem>>, vector<1x16x128xbf16>,
    return
  }
  func.func @transform_0(%arg0: i32) -> (i32, i32, i32) {
    %c0_i32 = arith.constant 0 : i32
    %c0_i32_0 = arith.constant 0 : i32
    %c0_i32_1 = arith.constant 0 : i32
    return %arg0, %c0_i32, %c0_i32_0 : i32, i32, i32
  }
  func.func @transform_1(%arg0: i32) -> (i32, i32, i32) {
    %c0_i32 = arith.constant 0 : i32
    %c0_i32_0 = arith.constant 0 : i32
    %c0_i32_1 = arith.constant 0 : i32
    return %arg0, %c0_i32, %c0_i32_0 : i32, i32, i32
  }
  func.func @transform_2(%arg0: i32) -> (i32, i32, i32) {
    %c0_i32 = arith.constant 0 : i32
    %c0_i32_0 = arith.constant 0 : i32
    %c0_i32_1 = arith.constant 0 : i32
    return %arg0, %c0_i32, %c0_i32_0 : i32, i32, i32
  }
}

module attributes {stable_mosaic.version = 11 : i64} {
  func.func @_lstm_rec_kernel(%arg0: i32, %arg1: memref<1x2x128xf32, #tpu.memory_space<vmem>>, %arg2: memref<32x128xbf16, #tpu.memory_space<vmem>>, %arg3: memref<1x2x1xf32, #tpu.memory_space<vmem>>, %arg4: memref<2x32xf32, #tpu.memory_space<vmem>>, %arg5: memref<2x32xf32, #tpu.memory_space<vmem>>, %arg6: memref<1x2x32xf32, #tpu.memory_space<vmem>>, %arg7: memref<2x32xf32, #tpu.memory_space<vmem>>, %arg8: memref<2x32xf32, #tpu.memory_space<vmem>>) attributes {dimension_semantics = [#tpu.dimension_semantics<arbitrary>], iteration_bounds = array<i64: 16>, scalar_prefetch = 0 : i64, scratch_operands = 0 : i64, tpu.core_type = #tpu.core_type<tc>, window_params = [{transform_indices = @transform_0, window_bounds = array<i64: 1, 2, 128>}, {pipeline_mode = #tpu.pipeline_mode<synchronous>, transform_indices = @transform_1, window_bounds = array<i64: 32, 128>}, {transform_indices = @transform_2, window_bounds = array<i64: 1, 2, 1>}, {pipeline_mode = #tpu.pipeline_mode<synchronous>, transform_indices = @transform_3, window_bounds = array<i64: 2, 32>}, {pipeline_mode = #tpu.pipeline_mode<synchronous>, transform_indices = @transform_4, window_bounds = array<i64: 2, 32>}, {transform_indices = @transform_5, window_bounds = array<i64: 1, 2, 32>}, {pipeline_mode = #tpu.pipeline_mode<synchronous>, transform_indices = @transform_6, window_bounds = array<i64: 2, 32>}, {pipeline_mode = #tpu.pipeline_mode<synchronous>, transform_indices = @transform_7, window_bounds = array<i64: 2, 32>}]} {
    %c0_i32 = arith.constant 0 : i32
    %0 = arith.cmpi eq, %arg0, %c0_i32 : i32
    %1 = arith.extui %0 : i1 to i32
    %c0_i32_0 = arith.constant 0 : i32
    %2 = arith.cmpi ne, %1, %c0_i32_0 : i32
    scf.if %2 {
      %c0_24 = arith.constant 0 : index
      %c0_25 = arith.constant 0 : index
      %59 = vector.load %arg4[%c0_24, %c0_25] : memref<2x32xf32, #tpu.memory_space<vmem>>, vector<2x32xf32>
      %c0_26 = arith.constant 0 : index
      %c0_27 = arith.constant 0 : index
      %60 = vector.load %arg7[%c0_26, %c0_27] : memref<2x32xf32, #tpu.memory_space<vmem>>, vector<2x32xf32>
      tpu.vector_store %arg7[%c0_26, %c0_27], %59 {strides = array<i32>} : memref<2x32xf32, #tpu.memory_space<vmem>>, vector<2x32xf32>,
      %c0_28 = arith.constant 0 : index
      %c0_29 = arith.constant 0 : index
      %61 = vector.load %arg5[%c0_28, %c0_29] : memref<2x32xf32, #tpu.memory_space<vmem>>, vector<2x32xf32>
      %c0_30 = arith.constant 0 : index
      %c0_31 = arith.constant 0 : index
      %62 = vector.load %arg8[%c0_30, %c0_31] : memref<2x32xf32, #tpu.memory_space<vmem>>, vector<2x32xf32>
      tpu.vector_store %arg8[%c0_30, %c0_31], %61 {strides = array<i32>} : memref<2x32xf32, #tpu.memory_space<vmem>>, vector<2x32xf32>,
    } else {
    }
    %c0 = arith.constant 0 : index
    %c0_1 = arith.constant 0 : index
    %3 = vector.load %arg7[%c0, %c0_1] : memref<2x32xf32, #tpu.memory_space<vmem>>, vector<2x32xf32>
    %c0_2 = arith.constant 0 : index
    %c0_3 = arith.constant 0 : index
    %4 = vector.load %arg8[%c0_2, %c0_3] : memref<2x32xf32, #tpu.memory_space<vmem>>, vector<2x32xf32>
    %c0_4 = arith.constant 0 : index
    %c0_5 = arith.constant 0 : index
    %c0_6 = arith.constant 0 : index
    %5 = vector.load %arg1[%c0_4, %c0_5, %c0_6] : memref<1x2x128xf32, #tpu.memory_space<vmem>>, vector<1x2x128xf32>
    %6 = vector.shape_cast %5 : vector<1x2x128xf32> to vector<2x128xf32>
    %7 = arith.truncf %3 : vector<2x32xf32> to vector<2x32xbf16>
    %c0_7 = arith.constant 0 : index
    %c0_8 = arith.constant 0 : index
    %8 = vector.load %arg2[%c0_7, %c0_8] : memref<32x128xbf16, #tpu.memory_space<vmem>>, vector<32x128xbf16>
    %cst = arith.constant dense<0.000000e+00> : vector<2x128xf32>
    %9 = tpu.matmul %7, %8, %cst {dimension_numbers = #tpu.dot_dimension_numbers<[1], [0], [0], [1], [0, 0, 1, 1], [], []>} : vector<2x32xbf16>, vector<32x128xbf16>, vector<2x128xf32> -> vector<2x128xf32>
    %10 = arith.addf %6, %9 : vector<2x128xf32>
    %11 = vector.extract_strided_slice %10 {offsets = [0, 0], sizes = [2, 32], strides = [1, 1]} : vector<2x128xf32> to vector<2x32xf32>
    %12 = arith.negf %11 : vector<2x32xf32>
    %13 = math.exp %12 : vector<2x32xf32>
    %cst_9 = arith.constant 1.000000e+00 : f32
    %14 = vector.broadcast %cst_9 : f32 to vector<2x32xf32>
    %15 = arith.addf %14, %13 : vector<2x32xf32>
    %16 = arith.divf %14, %15 : vector<2x32xf32>
    %17 = vector.extract_strided_slice %10 {offsets = [0, 32], sizes = [2, 32], strides = [1, 1]} : vector<2x128xf32> to vector<2x32xf32>
    %18 = arith.negf %17 : vector<2x32xf32>
    %19 = math.exp %18 : vector<2x32xf32>
    %cst_10 = arith.constant 1.000000e+00 : f32
    %20 = vector.broadcast %cst_10 : f32 to vector<2x32xf32>
    %21 = arith.addf %20, %19 : vector<2x32xf32>
    %22 = arith.divf %20, %21 : vector<2x32xf32>
    %23 = vector.extract_strided_slice %10 {offsets = [0, 64], sizes = [2, 32], strides = [1, 1]} : vector<2x128xf32> to vector<2x32xf32>
    %24 = math.tanh %23 : vector<2x32xf32>
    %25 = vector.extract_strided_slice %10 {offsets = [0, 96], sizes = [2, 32], strides = [1, 1]} : vector<2x128xf32> to vector<2x32xf32>
    %26 = arith.negf %25 : vector<2x32xf32>
    %27 = math.exp %26 : vector<2x32xf32>
    %cst_11 = arith.constant 1.000000e+00 : f32
    %28 = vector.broadcast %cst_11 : f32 to vector<2x32xf32>
    %29 = arith.addf %28, %27 : vector<2x32xf32>
    %30 = arith.divf %28, %29 : vector<2x32xf32>
    %31 = arith.mulf %22, %4 : vector<2x32xf32>
    %32 = arith.mulf %16, %24 : vector<2x32xf32>
    %33 = arith.addf %31, %32 : vector<2x32xf32>
    %34 = math.tanh %33 : vector<2x32xf32>
    %35 = arith.mulf %30, %34 : vector<2x32xf32>
    %c0_12 = arith.constant 0 : index
    %c0_13 = arith.constant 0 : index
    %c0_14 = arith.constant 0 : index
    %36 = vector.load %arg3[%c0_12, %c0_13, %c0_14] : memref<1x2x1xf32, #tpu.memory_space<vmem>>, vector<1x2x1xf32>
    %37 = vector.shape_cast %36 : vector<1x2x1xf32> to vector<2x1xf32>
    %38 = vector.broadcast %37 : vector<2x1xf32> to vector<2x32xf32>
    %39 = arith.mulf %38, %35 : vector<2x32xf32>
    %cst_15 = arith.constant 1.000000e+00 : f32
    %40 = vector.broadcast %cst_15 : f32 to vector<2x1xf32>
    %41 = arith.subf %40, %37 : vector<2x1xf32>
    %42 = vector.broadcast %41 : vector<2x1xf32> to vector<2x32xf32>
    %43 = arith.mulf %42, %3 : vector<2x32xf32>
    %44 = arith.addf %39, %43 : vector<2x32xf32>
    %c0_16 = arith.constant 0 : index
    %c0_17 = arith.constant 0 : index
    %45 = vector.load %arg7[%c0_16, %c0_17] : memref<2x32xf32, #tpu.memory_space<vmem>>, vector<2x32xf32>
    tpu.vector_store %arg7[%c0_16, %c0_17], %44 {strides = array<i32>} : memref<2x32xf32, #tpu.memory_space<vmem>>, vector<2x32xf32>,
    %46 = vector.broadcast %37 : vector<2x1xf32> to vector<2x32xf32>
    %47 = arith.mulf %46, %33 : vector<2x32xf32>
    %cst_18 = arith.constant 1.000000e+00 : f32
    %48 = vector.broadcast %cst_18 : f32 to vector<2x1xf32>
    %49 = arith.subf %48, %37 : vector<2x1xf32>
    %50 = vector.broadcast %49 : vector<2x1xf32> to vector<2x32xf32>
    %51 = arith.mulf %50, %4 : vector<2x32xf32>
    %52 = arith.addf %47, %51 : vector<2x32xf32>
    %c0_19 = arith.constant 0 : index
    %c0_20 = arith.constant 0 : index
    %53 = vector.load %arg8[%c0_19, %c0_20] : memref<2x32xf32, #tpu.memory_space<vmem>>, vector<2x32xf32>
    tpu.vector_store %arg8[%c0_19, %c0_20], %52 {strides = array<i32>} : memref<2x32xf32, #tpu.memory_space<vmem>>, vector<2x32xf32>,
    %54 = vector.broadcast %37 : vector<2x1xf32> to vector<2x32xf32>
    %55 = arith.mulf %54, %35 : vector<2x32xf32>
    %c0_21 = arith.constant 0 : index
    %c0_22 = arith.constant 0 : index
    %c0_23 = arith.constant 0 : index
    %56 = vector.load %arg6[%c0_21, %c0_22, %c0_23] : memref<1x2x32xf32, #tpu.memory_space<vmem>>, vector<1x2x32xf32>
    %57 = vector.shape_cast %56 : vector<1x2x32xf32> to vector<2x32xf32>
    %58 = vector.shape_cast %55 : vector<2x32xf32> to vector<1x2x32xf32>
    tpu.vector_store %arg6[%c0_21, %c0_22, %c0_23], %58 {strides = array<i32>} : memref<1x2x32xf32, #tpu.memory_space<vmem>>, vector<1x2x32xf32>,
    return
  }
  func.func @transform_0(%arg0: i32) -> (i32, i32, i32) {
    %c0_i32 = arith.constant 0 : i32
    %c0_i32_0 = arith.constant 0 : i32
    %c0_i32_1 = arith.constant 0 : i32
    return %arg0, %c0_i32, %c0_i32_0 : i32, i32, i32
  }
  func.func @transform_1(%arg0: i32) -> (i32, i32) {
    %c0_i32 = arith.constant 0 : i32
    %c0_i32_0 = arith.constant 0 : i32
    %c0_i32_1 = arith.constant 0 : i32
    return %c0_i32, %c0_i32_0 : i32, i32
  }
  func.func @transform_2(%arg0: i32) -> (i32, i32, i32) {
    %c0_i32 = arith.constant 0 : i32
    %c0_i32_0 = arith.constant 0 : i32
    %c0_i32_1 = arith.constant 0 : i32
    return %arg0, %c0_i32, %c0_i32_0 : i32, i32, i32
  }
  func.func @transform_3(%arg0: i32) -> (i32, i32) {
    %c0_i32 = arith.constant 0 : i32
    %c0_i32_0 = arith.constant 0 : i32
    %c0_i32_1 = arith.constant 0 : i32
    return %c0_i32, %c0_i32_0 : i32, i32
  }
  func.func @transform_4(%arg0: i32) -> (i32, i32) {
    %c0_i32 = arith.constant 0 : i32
    %c0_i32_0 = arith.constant 0 : i32
    %c0_i32_1 = arith.constant 0 : i32
    return %c0_i32, %c0_i32_0 : i32, i32
  }
  func.func @transform_5(%arg0: i32) -> (i32, i32, i32) {
    %c0_i32 = arith.constant 0 : i32
    %c0_i32_0 = arith.constant 0 : i32
    %c0_i32_1 = arith.constant 0 : i32
    return %arg0, %c0_i32, %c0_i32_0 : i32, i32, i32
  }
  func.func @transform_6(%arg0: i32) -> (i32, i32) {
    %c0_i32 = arith.constant 0 : i32
    %c0_i32_0 = arith.constant 0 : i32
    %c0_i32_1 = arith.constant 0 : i32
    return %c0_i32, %c0_i32_0 : i32, i32
  }
  func.func @transform_7(%arg0: i32) -> (i32, i32) {
    %c0_i32 = arith.constant 0 : i32
    %c0_i32_0 = arith.constant 0 : i32
    %c0_i32_1 = arith.constant 0 : i32
    return %c0_i32, %c0_i32_0 : i32, i32
  }
}

module attributes {stable_mosaic.version = 11 : i64} {
  func.func @_linear_kernel(%arg0: i32, %arg1: memref<32x128xbf16, #tpu.memory_space<vmem>>, %arg2: memref<128x128xbf16, #tpu.memory_space<vmem>>, %arg3: memref<1x128xf32, #tpu.memory_space<vmem>>, %arg4: memref<32x128xf32, #tpu.memory_space<vmem>>) attributes {dimension_semantics = [#tpu.dimension_semantics<parallel>], iteration_bounds = array<i64: 1>, scalar_prefetch = 0 : i64, scratch_operands = 0 : i64, tpu.core_type = #tpu.core_type<tc>, window_params = [{transform_indices = @transform_0, window_bounds = array<i64: 32, 128>}, {pipeline_mode = #tpu.pipeline_mode<synchronous>, transform_indices = @transform_1, window_bounds = array<i64: 128, 128>}, {pipeline_mode = #tpu.pipeline_mode<synchronous>, transform_indices = @transform_2, window_bounds = array<i64: 1, 128>}, {transform_indices = @transform_3, window_bounds = array<i64: 32, 128>}]} {
    %c0 = arith.constant 0 : index
    %c0_0 = arith.constant 0 : index
    %0 = vector.load %arg1[%c0, %c0_0] : memref<32x128xbf16, #tpu.memory_space<vmem>>, vector<32x128xbf16>
    %c0_1 = arith.constant 0 : index
    %c0_2 = arith.constant 0 : index
    %1 = vector.load %arg2[%c0_1, %c0_2] : memref<128x128xbf16, #tpu.memory_space<vmem>>, vector<128x128xbf16>
    %cst = arith.constant dense<0.000000e+00> : vector<32x128xf32>
    %2 = tpu.matmul %0, %1, %cst {dimension_numbers = #tpu.dot_dimension_numbers<[1], [0], [0], [1], [0, 0, 1, 1], [], []>} : vector<32x128xbf16>, vector<128x128xbf16>, vector<32x128xf32> -> vector<32x128xf32>
    %c0_3 = arith.constant 0 : index
    %c0_4 = arith.constant 0 : index
    %3 = vector.load %arg3[%c0_3, %c0_4] : memref<1x128xf32, #tpu.memory_space<vmem>>, vector<1x128xf32>
    %4 = vector.broadcast %3 : vector<1x128xf32> to vector<32x128xf32>
    %5 = arith.addf %2, %4 : vector<32x128xf32>
    %c0_5 = arith.constant 0 : index
    %c0_6 = arith.constant 0 : index
    %6 = vector.load %arg4[%c0_5, %c0_6] : memref<32x128xf32, #tpu.memory_space<vmem>>, vector<32x128xf32>
    tpu.vector_store %arg4[%c0_5, %c0_6], %5 {strides = array<i32>} : memref<32x128xf32, #tpu.memory_space<vmem>>, vector<32x128xf32>,
    return
  }
  func.func @transform_0(%arg0: i32) -> (i32, i32) {
    %c0_i32 = arith.constant 0 : i32
    %c0_i32_0 = arith.constant 0 : i32
    return %arg0, %c0_i32 : i32, i32
  }
  func.func @transform_1(%arg0: i32) -> (i32, i32) {
    %c0_i32 = arith.constant 0 : i32
    %c0_i32_0 = arith.constant 0 : i32
    %c0_i32_1 = arith.constant 0 : i32
    return %c0_i32, %c0_i32_0 : i32, i32
  }
  func.func @transform_2(%arg0: i32) -> (i32, i32) {
    %c0_i32 = arith.constant 0 : i32
    %c0_i32_0 = arith.constant 0 : i32
    %c0_i32_1 = arith.constant 0 : i32
    return %c0_i32, %c0_i32_0 : i32, i32
  }
  func.func @transform_3(%arg0: i32) -> (i32, i32) {
    %c0_i32 = arith.constant 0 : i32
    %c0_i32_0 = arith.constant 0 : i32
    return %arg0, %c0_i32 : i32, i32
  }
}

module attributes {stable_mosaic.version = 11 : i64} {
  func.func @_decoder_kernel(%arg0: i32, %arg1: i32, %arg2: memref<2xi32, #tpu.memory_space<smem>>, %arg3: memref<1x16x64xf32, #tpu.memory_space<vmem>>, %arg4: memref<128x96xbf16, #tpu.memory_space<vmem>>, %arg5: memref<32x96xbf16, #tpu.memory_space<vmem>>, %arg6: memref<1x96xf32, #tpu.memory_space<vmem>>, %arg7: memref<1x96xf32, #tpu.memory_space<vmem>>, %arg8: memref<2x160x32xbf16, #tpu.memory_space<vmem>>, %arg9: memref<2x64x128xbf16, #tpu.memory_space<vmem>>, %arg10: memref<2x32x128xbf16, #tpu.memory_space<vmem>>, %arg11: memref<2x1x128xf32, #tpu.memory_space<vmem>>, %arg12: memref<2x32x128xbf16, #tpu.memory_space<vmem>>, %arg13: memref<2x1x128xf32, #tpu.memory_space<vmem>>, %arg14: memref<2x64x4xbf16, #tpu.memory_space<vmem>>, %arg15: memref<2x1x4xf32, #tpu.memory_space<vmem>>, %arg16: memref<1x2x128xi32, #tpu.memory_space<vmem>>, %arg17: memref<1x32xf32, #tpu.memory_space<vmem>>, %arg18: memref<2x64xf32, #tpu.memory_space<vmem>>) attributes {dimension_semantics = [#tpu.dimension_semantics<parallel>, #tpu.dimension_semantics<arbitrary>], iteration_bounds = array<i64: 2, 2>, scalar_prefetch = 0 : i64, scratch_operands = 2 : i64, tpu.core_type = #tpu.core_type<tc>, window_params = [{transform_indices = @transform_0, window_bounds = array<i64: 2>}, {transform_indices = @transform_1, window_bounds = array<i64: 1, 16, 64>}, {pipeline_mode = #tpu.pipeline_mode<synchronous>, transform_indices = @transform_2, window_bounds = array<i64: 128, 96>}, {pipeline_mode = #tpu.pipeline_mode<synchronous>, transform_indices = @transform_3, window_bounds = array<i64: 32, 96>}, {pipeline_mode = #tpu.pipeline_mode<synchronous>, transform_indices = @transform_4, window_bounds = array<i64: 1, 96>}, {pipeline_mode = #tpu.pipeline_mode<synchronous>, transform_indices = @transform_5, window_bounds = array<i64: 1, 96>}, {pipeline_mode = #tpu.pipeline_mode<synchronous>, transform_indices = @transform_6, window_bounds = array<i64: 2, 160, 32>}, {pipeline_mode = #tpu.pipeline_mode<synchronous>, transform_indices = @transform_7, window_bounds = array<i64: 2, 64, 128>}, {pipeline_mode = #tpu.pipeline_mode<synchronous>, transform_indices = @transform_8, window_bounds = array<i64: 2, 32, 128>}, {pipeline_mode = #tpu.pipeline_mode<synchronous>, transform_indices = @transform_9, window_bounds = array<i64: 2, 1, 128>}, {pipeline_mode = #tpu.pipeline_mode<synchronous>, transform_indices = @transform_10, window_bounds = array<i64: 2, 32, 128>}, {pipeline_mode = #tpu.pipeline_mode<synchronous>, transform_indices = @transform_11, window_bounds = array<i64: 2, 1, 128>}, {pipeline_mode = #tpu.pipeline_mode<synchronous>, transform_indices = @transform_12, window_bounds = array<i64: 2, 64, 4>}, {pipeline_mode = #tpu.pipeline_mode<synchronous>, transform_indices = @transform_13, window_bounds = array<i64: 2, 1, 4>}, {transform_indices = @transform_14, window_bounds = array<i64: 1, 2, 128>}]} {
    %0 = tpu.iota {dimensions = array<i32: 0>} : vector<16x1xi32>
    %c0 = arith.constant 0 : index
    %c0_0 = arith.constant 0 : index
    %c0_1 = arith.constant 0 : index
    %1 = vector.load %arg3[%c0, %c0_0, %c0_1] : memref<1x16x64xf32, #tpu.memory_space<vmem>>, vector<1x16x64xf32>
    %2 = vector.shape_cast %1 : vector<1x16x64xf32> to vector<16x64xf32>
    %3 = arith.truncf %2 : vector<16x64xf32> to vector<16x64xbf16>
    %c0_i32 = arith.constant 0 : i32
    %4 = arith.cmpi eq, %arg1, %c0_i32 : i32
    %5 = arith.extui %4 : i1 to i32
    %c0_i32_2 = arith.constant 0 : i32
    %6 = arith.cmpi ne, %5, %c0_i32_2 : i32
    scf.if %6 {
      %cst_102 = arith.constant 0.000000e+00 : f32
      %211 = vector.broadcast %cst_102 : f32 to vector<1x32xf32>
      %c0_103 = arith.constant 0 : index
      %c0_104 = arith.constant 0 : index
      %212 = vector.load %arg17[%c0_103, %c0_104] : memref<1x32xf32, #tpu.memory_space<vmem>>, vector<1x32xf32>
      tpu.vector_store %arg17[%c0_103, %c0_104], %211 {strides = array<i32>} : memref<1x32xf32, #tpu.memory_space<vmem>>, vector<1x32xf32>,
      %c0_i32_105 = arith.constant 0 : i32
      %213 = vector.broadcast %c0_i32_105 : i32 to vector<16x1xi32>
      %214 = arith.cmpi eq, %0, %213 : vector<16x1xi32>
      %cst_106 = arith.constant 0.000000e+00 : f32
      %215 = vector.shape_cast %214 : vector<16x1xi1> to vector<16x1xi1>
      %216 = vector.broadcast %215 : vector<16x1xi1> to vector<16x64xi1>
      %217 = vector.broadcast %cst_106 : f32 to vector<16x64xf32>
      %218 = arith.select %216, %2, %217 : vector<16x64xi1>, vector<16x64xf32>
      %cst_107 = arith.constant dense<0.000000e+00> : vector<64xf32>
      %219 = vector.multi_reduction <add>, %218, %cst_107 [0] : vector<16x64xf32> to vector<64xf32>
      %220 = vector.shape_cast %219 : vector<64xf32> to vector<1x64xf32>
      %c0_108 = arith.constant 0 : index
      %c0_109 = arith.constant 0 : index
      %221 = vector.load %arg18[%c0_108, %c0_109] : memref<2x64xf32, #tpu.memory_space<vmem>>, vector<1x64xf32>
      tpu.vector_store %arg18[%c0_108, %c0_109], %220 {strides = array<i32>} : memref<2x64xf32, #tpu.memory_space<vmem>>, vector<1x64xf32>,
      %222 = arith.index_cast %arg0 : i32 to index
      %223 = memref.load %arg2[%222] : memref<2xi32, #tpu.memory_space<smem>>
      %224 = vector.broadcast %223 : i32 to vector<16x1xi32>
      %225 = arith.cmpi eq, %0, %224 : vector<16x1xi32>
      %cst_110 = arith.constant 0.000000e+00 : f32
      %226 = vector.shape_cast %225 : vector<16x1xi1> to vector<16x1xi1>
      %227 = vector.broadcast %226 : vector<16x1xi1> to vector<16x64xi1>
      %228 = vector.broadcast %cst_110 : f32 to vector<16x64xf32>
      %229 = arith.select %227, %2, %228 : vector<16x64xi1>, vector<16x64xf32>
      %cst_111 = arith.constant dense<0.000000e+00> : vector<64xf32>
      %230 = vector.multi_reduction <add>, %229, %cst_111 [0] : vector<16x64xf32> to vector<64xf32>
      %231 = vector.shape_cast %230 : vector<64xf32> to vector<1x64xf32>
      %c1_112 = arith.constant 1 : index
      %c0_113 = arith.constant 0 : index
      %232 = vector.load %arg18[%c1_112, %c0_113] : memref<2x64xf32, #tpu.memory_space<vmem>>, vector<1x64xf32>
      tpu.vector_store %arg18[%c1_112, %c0_113], %231 {strides = array<i32>} : memref<2x64xf32, #tpu.memory_space<vmem>>, vector<1x64xf32>,
    } else {
    }
    %c0_3 = arith.constant 0 : index
    %c0_4 = arith.constant 0 : index
    %7 = vector.load %arg18[%c0_3, %c0_4] : memref<2x64xf32, #tpu.memory_space<vmem>>, vector<1x64xf32>
    %c1 = arith.constant 1 : index
    %c0_5 = arith.constant 0 : index
    %8 = vector.load %arg18[%c1, %c0_5] : memref<2x64xf32, #tpu.memory_space<vmem>>, vector<1x64xf32>
    %9 = tpu.concatenate %7, %8 in 1 : vector<1x64xf32>, vector<1x64xf32> -> vector<1x128xf32>
    %c0_6 = arith.constant 0 : index
    %c0_7 = arith.constant 0 : index
    %10 = vector.load %arg17[%c0_6, %c0_7] : memref<1x32xf32, #tpu.memory_space<vmem>>, vector<1x32xf32>
    %11 = arith.truncf %9 : vector<1x128xf32> to vector<1x128xbf16>
    %c0_8 = arith.constant 0 : index
    %c0_9 = arith.constant 0 : index
    %12 = vector.load %arg4[%c0_8, %c0_9] : memref<128x96xbf16, #tpu.memory_space<vmem>>, vector<128x96xbf16>
    %cst = arith.constant dense<0.000000e+00> : vector<1x96xf32>
    %13 = tpu.matmul %11, %12, %cst {dimension_numbers = #tpu.dot_dimension_numbers<[1], [0], [0], [1], [0, 0, 1, 1], [], []>} : vector<1x128xbf16>, vector<128x96xbf16>, vector<1x96xf32> -> vector<1x96xf32>
    %c0_10 = arith.constant 0 : index
    %c0_11 = arith.constant 0 : index
    %14 = vector.load %arg6[%c0_10, %c0_11] : memref<1x96xf32, #tpu.memory_space<vmem>>, vector<1x96xf32>
    %15 = arith.addf %13, %14 : vector<1x96xf32>
    %16 = arith.truncf %10 : vector<1x32xf32> to vector<1x32xbf16>
    %c0_12 = arith.constant 0 : index
    %c0_13 = arith.constant 0 : index
    %17 = vector.load %arg5[%c0_12, %c0_13] : memref<32x96xbf16, #tpu.memory_space<vmem>>, vector<32x96xbf16>
    %cst_14 = arith.constant dense<0.000000e+00> : vector<1x96xf32>
    %18 = tpu.matmul %16, %17, %cst_14 {dimension_numbers = #tpu.dot_dimension_numbers<[1], [0], [0], [1], [0, 0, 1, 1], [], []>} : vector<1x32xbf16>, vector<32x96xbf16>, vector<1x96xf32> -> vector<1x96xf32>
    %c0_15 = arith.constant 0 : index
    %c0_16 = arith.constant 0 : index
    %19 = vector.load %arg7[%c0_15, %c0_16] : memref<1x96xf32, #tpu.memory_space<vmem>>, vector<1x96xf32>
    %20 = arith.addf %18, %19 : vector<1x96xf32>
    %21 = vector.extract_strided_slice %15 {offsets = [0, 0], sizes = [1, 32], strides = [1, 1]} : vector<1x96xf32> to vector<1x32xf32>
    %22 = vector.extract_strided_slice %20 {offsets = [0, 0], sizes = [1, 32], strides = [1, 1]} : vector<1x96xf32> to vector<1x32xf32>
    %23 = arith.addf %21, %22 : vector<1x32xf32>
    %24 = arith.negf %23 : vector<1x32xf32>
    %25 = math.exp %24 : vector<1x32xf32>
    %cst_17 = arith.constant 1.000000e+00 : f32
    %26 = vector.broadcast %cst_17 : f32 to vector<1x32xf32>
    %27 = arith.addf %26, %25 : vector<1x32xf32>
    %28 = arith.divf %26, %27 : vector<1x32xf32>
    %29 = vector.extract_strided_slice %15 {offsets = [0, 32], sizes = [1, 32], strides = [1, 1]} : vector<1x96xf32> to vector<1x32xf32>
    %30 = vector.extract_strided_slice %20 {offsets = [0, 32], sizes = [1, 32], strides = [1, 1]} : vector<1x96xf32> to vector<1x32xf32>
    %31 = arith.addf %29, %30 : vector<1x32xf32>
    %32 = arith.negf %31 : vector<1x32xf32>
    %33 = math.exp %32 : vector<1x32xf32>
    %cst_18 = arith.constant 1.000000e+00 : f32
    %34 = vector.broadcast %cst_18 : f32 to vector<1x32xf32>
    %35 = arith.addf %34, %33 : vector<1x32xf32>
    %36 = arith.divf %34, %35 : vector<1x32xf32>
    %37 = vector.extract_strided_slice %15 {offsets = [0, 64], sizes = [1, 32], strides = [1, 1]} : vector<1x96xf32> to vector<1x32xf32>
    %38 = vector.extract_strided_slice %20 {offsets = [0, 64], sizes = [1, 32], strides = [1, 1]} : vector<1x96xf32> to vector<1x32xf32>
    %39 = arith.mulf %28, %38 : vector<1x32xf32>
    %40 = arith.addf %37, %39 : vector<1x32xf32>
    %41 = math.tanh %40 : vector<1x32xf32>
    %cst_19 = arith.constant 1.000000e+00 : f32
    %42 = vector.broadcast %cst_19 : f32 to vector<1x32xf32>
    %43 = arith.subf %42, %36 : vector<1x32xf32>
    %44 = arith.mulf %43, %41 : vector<1x32xf32>
    %45 = arith.mulf %36, %10 : vector<1x32xf32>
    %46 = arith.addf %44, %45 : vector<1x32xf32>
    %c0_20 = arith.constant 0 : index
    %c0_21 = arith.constant 0 : index
    %47 = vector.load %arg17[%c0_20, %c0_21] : memref<1x32xf32, #tpu.memory_space<vmem>>, vector<1x32xf32>
    tpu.vector_store %arg17[%c0_20, %c0_21], %46 {strides = array<i32>} : memref<1x32xf32, #tpu.memory_space<vmem>>, vector<1x32xf32>,
    %48 = tpu.concatenate %46, %9 in 1 : vector<1x32xf32>, vector<1x128xf32> -> vector<1x160xf32>
    %49 = arith.truncf %48 : vector<1x160xf32> to vector<1x160xbf16>
    %c0_22 = arith.constant 0 : index
    %c0_23 = arith.constant 0 : index
    %c0_24 = arith.constant 0 : index
    %50 = vector.load %arg8[%c0_22, %c0_23, %c0_24] : memref<2x160x32xbf16, #tpu.memory_space<vmem>>, vector<1x160x32xbf16>
    %51 = vector.shape_cast %50 : vector<1x160x32xbf16> to vector<160x32xbf16>
    %cst_25 = arith.constant dense<0.000000e+00> : vector<1x32xf32>
    %52 = tpu.matmul %49, %51, %cst_25 {dimension_numbers = #tpu.dot_dimension_numbers<[1], [0], [0], [1], [0, 0, 1, 1], [], []>} : vector<1x160xbf16>, vector<160x32xbf16>, vector<1x32xf32> -> vector<1x32xf32>
    %53 = math.tanh %52 : vector<1x32xf32>
    %54 = arith.truncf %53 : vector<1x32xf32> to vector<1x32xbf16>
    %c0_26 = arith.constant 0 : index
    %c0_27 = arith.constant 0 : index
    %c0_28 = arith.constant 0 : index
    %55 = vector.load %arg10[%c0_26, %c0_27, %c0_28] : memref<2x32x128xbf16, #tpu.memory_space<vmem>>, vector<1x32x128xbf16>
    %56 = vector.shape_cast %55 : vector<1x32x128xbf16> to vector<32x128xbf16>
    %cst_29 = arith.constant dense<0.000000e+00> : vector<1x128xf32>
    %57 = tpu.matmul %54, %56, %cst_29 {dimension_numbers = #tpu.dot_dimension_numbers<[1], [0], [0], [1], [0, 0, 1, 1], [], []>} : vector<1x32xbf16>, vector<32x128xbf16>, vector<1x128xf32> -> vector<1x128xf32>
    %c0_30 = arith.constant 0 : index
    %c0_31 = arith.constant 0 : index
    %c0_32 = arith.constant 0 : index
    %58 = vector.load %arg11[%c0_30, %c0_31, %c0_32] : memref<2x1x128xf32, #tpu.memory_space<vmem>>, vector<1x1x128xf32>
    %59 = vector.shape_cast %58 : vector<1x1x128xf32> to vector<1x128xf32>
    %60 = arith.addf %57, %59 : vector<1x128xf32>
    %c0_33 = arith.constant 0 : index
    %c0_34 = arith.constant 0 : index
    %c0_35 = arith.constant 0 : index
    %61 = vector.load %arg9[%c0_33, %c0_34, %c0_35] : memref<2x64x128xbf16, #tpu.memory_space<vmem>>, vector<1x64x128xbf16>
    %62 = vector.shape_cast %61 : vector<1x64x128xbf16> to vector<64x128xbf16>
    %cst_36 = arith.constant dense<0.000000e+00> : vector<16x128xf32>
    %63 = tpu.matmul %3, %62, %cst_36 {dimension_numbers = #tpu.dot_dimension_numbers<[1], [0], [0], [1], [0, 0, 1, 1], [], []>} : vector<16x64xbf16>, vector<64x128xbf16>, vector<16x128xf32> -> vector<16x128xf32>
    %64 = vector.broadcast %60 : vector<1x128xf32> to vector<16x128xf32>
    %65 = arith.addf %63, %64 : vector<16x128xf32>
    %66 = vector.extract_strided_slice %65 {offsets = [0, 0], sizes = [16, 32], strides = [1, 1]} : vector<16x128xf32> to vector<16x32xf32>
    %67 = vector.extract_strided_slice %65 {offsets = [0, 32], sizes = [16, 32], strides = [1, 1]} : vector<16x128xf32> to vector<16x32xf32>
    %68 = arith.maximumf %66, %67 : vector<16x32xf32>
    %69 = vector.extract_strided_slice %65 {offsets = [0, 64], sizes = [16, 32], strides = [1, 1]} : vector<16x128xf32> to vector<16x32xf32>
    %70 = arith.maximumf %68, %69 : vector<16x32xf32>
    %71 = vector.extract_strided_slice %65 {offsets = [0, 96], sizes = [16, 32], strides = [1, 1]} : vector<16x128xf32> to vector<16x32xf32>
    %72 = arith.maximumf %70, %71 : vector<16x32xf32>
    %73 = arith.truncf %72 : vector<16x32xf32> to vector<16x32xbf16>
    %c0_37 = arith.constant 0 : index
    %c0_38 = arith.constant 0 : index
    %c0_39 = arith.constant 0 : index
    %74 = vector.load %arg12[%c0_37, %c0_38, %c0_39] : memref<2x32x128xbf16, #tpu.memory_space<vmem>>, vector<1x32x128xbf16>
    %75 = vector.shape_cast %74 : vector<1x32x128xbf16> to vector<32x128xbf16>
    %cst_40 = arith.constant dense<0.000000e+00> : vector<16x128xf32>
    %76 = tpu.matmul %73, %75, %cst_40 {dimension_numbers = #tpu.dot_dimension_numbers<[1], [0], [0], [1], [0, 0, 1, 1], [], []>} : vector<16x32xbf16>, vector<32x128xbf16>, vector<16x128xf32> -> vector<16x128xf32>
    %c0_41 = arith.constant 0 : index
    %c0_42 = arith.constant 0 : index
    %c0_43 = arith.constant 0 : index
    %77 = vector.load %arg13[%c0_41, %c0_42, %c0_43] : memref<2x1x128xf32, #tpu.memory_space<vmem>>, vector<1x1x128xf32>
    %78 = vector.shape_cast %77 : vector<1x1x128xf32> to vector<1x128xf32>
    %79 = vector.broadcast %78 : vector<1x128xf32> to vector<16x128xf32>
    %80 = arith.addf %76, %79 : vector<16x128xf32>
    %81 = vector.extract_strided_slice %80 {offsets = [0, 0], sizes = [16, 32], strides = [1, 1]} : vector<16x128xf32> to vector<16x32xf32>
    %82 = vector.extract_strided_slice %80 {offsets = [0, 32], sizes = [16, 32], strides = [1, 1]} : vector<16x128xf32> to vector<16x32xf32>
    %83 = arith.maximumf %81, %82 : vector<16x32xf32>
    %84 = vector.extract_strided_slice %80 {offsets = [0, 64], sizes = [16, 32], strides = [1, 1]} : vector<16x128xf32> to vector<16x32xf32>
    %85 = arith.maximumf %83, %84 : vector<16x32xf32>
    %86 = vector.extract_strided_slice %80 {offsets = [0, 96], sizes = [16, 32], strides = [1, 1]} : vector<16x128xf32> to vector<16x32xf32>
    %87 = arith.maximumf %85, %86 : vector<16x32xf32>
    %c0_44 = arith.constant 0 : index
    %c0_45 = arith.constant 0 : index
    %c0_46 = arith.constant 0 : index
    %88 = vector.load %arg14[%c0_44, %c0_45, %c0_46] : memref<2x64x4xbf16, #tpu.memory_space<vmem>>, vector<1x64x4xbf16>
    %89 = vector.shape_cast %88 : vector<1x64x4xbf16> to vector<64x4xbf16>
    %90 = arith.truncf %72 : vector<16x32xf32> to vector<16x32xbf16>
    %91 = vector.extract_strided_slice %89 {offsets = [0, 0], sizes = [32, 4], strides = [1, 1]} : vector<64x4xbf16> to vector<32x4xbf16>
    %cst_47 = arith.constant dense<0.000000e+00> : vector<16x4xf32>
    %92 = tpu.matmul %90, %91, %cst_47 {dimension_numbers = #tpu.dot_dimension_numbers<[1], [0], [0], [1], [0, 0, 1, 1], [], []>} : vector<16x32xbf16>, vector<32x4xbf16>, vector<16x4xf32> -> vector<16x4xf32>
    %93 = arith.truncf %87 : vector<16x32xf32> to vector<16x32xbf16>
    %94 = vector.extract_strided_slice %89 {offsets = [32, 0], sizes = [32, 4], strides = [1, 1]} : vector<64x4xbf16> to vector<32x4xbf16>
    %cst_48 = arith.constant dense<0.000000e+00> : vector<16x4xf32>
    %95 = tpu.matmul %93, %94, %cst_48 {dimension_numbers = #tpu.dot_dimension_numbers<[1], [0], [0], [1], [0, 0, 1, 1], [], []>} : vector<16x32xbf16>, vector<32x4xbf16>, vector<16x4xf32> -> vector<16x4xf32>
    %96 = arith.addf %92, %95 : vector<16x4xf32>
    %c0_49 = arith.constant 0 : index
    %c0_50 = arith.constant 0 : index
    %c0_51 = arith.constant 0 : index
    %97 = vector.load %arg15[%c0_49, %c0_50, %c0_51] : memref<2x1x4xf32, #tpu.memory_space<vmem>>, vector<1x1x4xf32>
    %98 = vector.shape_cast %97 : vector<1x1x4xf32> to vector<1x4xf32>
    %99 = vector.broadcast %98 : vector<1x4xf32> to vector<16x4xf32>
    %100 = arith.addf %96, %99 : vector<16x4xf32>
    %cst_52 = arith.constant dense<0xFF800000> : vector<16xf32>
    %101 = vector.multi_reduction <maximumf>, %100, %cst_52 [1] : vector<16x4xf32> to vector<16xf32>
    %102 = vector.shape_cast %101 : vector<16xf32> to vector<16x1xf32>
    %103 = vector.shape_cast %102 : vector<16x1xf32> to vector<1x16x1xf32>
    %cst_53 = arith.constant dense<0xFF800000> : vector<1xf32>
    %104 = vector.multi_reduction <maximumf>, %103, %cst_53 [1, 2] : vector<1x16x1xf32> to vector<1xf32>
    %105 = vector.shape_cast %104 : vector<1xf32> to vector<1x1x1xf32>
    %106 = vector.extract %105[0, 0, 0] : f32 from vector<1x1x1xf32>
    %107 = vector.broadcast %106 : f32 to vector<16x1xf32>
    %108 = arith.cmpf oge, %102, %107 : vector<16x1xf32>
    %c16_i32 = arith.constant 16 : i32
    %109 = vector.broadcast %c16_i32 : i32 to vector<16x1xi32>
    %110 = arith.select %108, %0, %109 : vector<16x1xi1>, vector<16x1xi32>
    %111 = vector.shape_cast %110 : vector<16x1xi32> to vector<1x16x1xi32>
    %cst_54 = arith.constant dense<2147483647> : vector<1xi32>
    %112 = vector.multi_reduction <minsi>, %111, %cst_54 [1, 2] : vector<1x16x1xi32> to vector<1xi32>
    %113 = vector.shape_cast %112 : vector<1xi32> to vector<1x1x1xi32>
    %114 = vector.extract %113[0, 0, 0] : i32 from vector<1x1x1xi32>
    %115 = vector.broadcast %114 : i32 to vector<16x1xi32>
    %116 = arith.cmpi eq, %0, %115 : vector<16x1xi32>
    %cst_55 = arith.constant 0.000000e+00 : f32
    %117 = vector.shape_cast %116 : vector<16x1xi1> to vector<16x1xi1>
    %118 = vector.broadcast %117 : vector<16x1xi1> to vector<16x64xi1>
    %119 = vector.broadcast %cst_55 : f32 to vector<16x64xf32>
    %120 = arith.select %118, %2, %119 : vector<16x64xi1>, vector<16x64xf32>
    %cst_56 = arith.constant dense<0.000000e+00> : vector<64xf32>
    %121 = vector.multi_reduction <add>, %120, %cst_56 [0] : vector<16x64xf32> to vector<64xf32>
    %122 = vector.shape_cast %121 : vector<64xf32> to vector<1x64xf32>
    %c0_57 = arith.constant 0 : index
    %c0_58 = arith.constant 0 : index
    %123 = vector.load %arg18[%c0_57, %c0_58] : memref<2x64xf32, #tpu.memory_space<vmem>>, vector<1x64xf32>
    tpu.vector_store %arg18[%c0_57, %c0_58], %122 {strides = array<i32>} : memref<2x64xf32, #tpu.memory_space<vmem>>, vector<1x64xf32>,
    %124 = tpu.concatenate %122, %8 in 1 : vector<1x64xf32>, vector<1x64xf32> -> vector<1x128xf32>
    %125 = tpu.concatenate %46, %124 in 1 : vector<1x32xf32>, vector<1x128xf32> -> vector<1x160xf32>
    %126 = arith.truncf %125 : vector<1x160xf32> to vector<1x160xbf16>
    %c1_59 = arith.constant 1 : index
    %c0_60 = arith.constant 0 : index
    %c0_61 = arith.constant 0 : index
    %127 = vector.load %arg8[%c1_59, %c0_60, %c0_61] : memref<2x160x32xbf16, #tpu.memory_space<vmem>>, vector<1x160x32xbf16>
    %128 = vector.shape_cast %127 : vector<1x160x32xbf16> to vector<160x32xbf16>
    %cst_62 = arith.constant dense<0.000000e+00> : vector<1x32xf32>
    %129 = tpu.matmul %126, %128, %cst_62 {dimension_numbers = #tpu.dot_dimension_numbers<[1], [0], [0], [1], [0, 0, 1, 1], [], []>} : vector<1x160xbf16>, vector<160x32xbf16>, vector<1x32xf32> -> vector<1x32xf32>
    %130 = math.tanh %129 : vector<1x32xf32>
    %131 = arith.truncf %130 : vector<1x32xf32> to vector<1x32xbf16>
    %c1_63 = arith.constant 1 : index
    %c0_64 = arith.constant 0 : index
    %c0_65 = arith.constant 0 : index
    %132 = vector.load %arg10[%c1_63, %c0_64, %c0_65] : memref<2x32x128xbf16, #tpu.memory_space<vmem>>, vector<1x32x128xbf16>
    %133 = vector.shape_cast %132 : vector<1x32x128xbf16> to vector<32x128xbf16>
    %cst_66 = arith.constant dense<0.000000e+00> : vector<1x128xf32>
    %134 = tpu.matmul %131, %133, %cst_66 {dimension_numbers = #tpu.dot_dimension_numbers<[1], [0], [0], [1], [0, 0, 1, 1], [], []>} : vector<1x32xbf16>, vector<32x128xbf16>, vector<1x128xf32> -> vector<1x128xf32>
    %c1_67 = arith.constant 1 : index
    %c0_68 = arith.constant 0 : index
    %c0_69 = arith.constant 0 : index
    %135 = vector.load %arg11[%c1_67, %c0_68, %c0_69] : memref<2x1x128xf32, #tpu.memory_space<vmem>>, vector<1x1x128xf32>
    %136 = vector.shape_cast %135 : vector<1x1x128xf32> to vector<1x128xf32>
    %137 = arith.addf %134, %136 : vector<1x128xf32>
    %c1_70 = arith.constant 1 : index
    %c0_71 = arith.constant 0 : index
    %c0_72 = arith.constant 0 : index
    %138 = vector.load %arg9[%c1_70, %c0_71, %c0_72] : memref<2x64x128xbf16, #tpu.memory_space<vmem>>, vector<1x64x128xbf16>
    %139 = vector.shape_cast %138 : vector<1x64x128xbf16> to vector<64x128xbf16>
    %cst_73 = arith.constant dense<0.000000e+00> : vector<16x128xf32>
    %140 = tpu.matmul %3, %139, %cst_73 {dimension_numbers = #tpu.dot_dimension_numbers<[1], [0], [0], [1], [0, 0, 1, 1], [], []>} : vector<16x64xbf16>, vector<64x128xbf16>, vector<16x128xf32> -> vector<16x128xf32>
    %141 = vector.broadcast %137 : vector<1x128xf32> to vector<16x128xf32>
    %142 = arith.addf %140, %141 : vector<16x128xf32>
    %143 = vector.extract_strided_slice %142 {offsets = [0, 0], sizes = [16, 32], strides = [1, 1]} : vector<16x128xf32> to vector<16x32xf32>
    %144 = vector.extract_strided_slice %142 {offsets = [0, 32], sizes = [16, 32], strides = [1, 1]} : vector<16x128xf32> to vector<16x32xf32>
    %145 = arith.maximumf %143, %144 : vector<16x32xf32>
    %146 = vector.extract_strided_slice %142 {offsets = [0, 64], sizes = [16, 32], strides = [1, 1]} : vector<16x128xf32> to vector<16x32xf32>
    %147 = arith.maximumf %145, %146 : vector<16x32xf32>
    %148 = vector.extract_strided_slice %142 {offsets = [0, 96], sizes = [16, 32], strides = [1, 1]} : vector<16x128xf32> to vector<16x32xf32>
    %149 = arith.maximumf %147, %148 : vector<16x32xf32>
    %150 = arith.truncf %149 : vector<16x32xf32> to vector<16x32xbf16>
    %c1_74 = arith.constant 1 : index
    %c0_75 = arith.constant 0 : index
    %c0_76 = arith.constant 0 : index
    %151 = vector.load %arg12[%c1_74, %c0_75, %c0_76] : memref<2x32x128xbf16, #tpu.memory_space<vmem>>, vector<1x32x128xbf16>
    %152 = vector.shape_cast %151 : vector<1x32x128xbf16> to vector<32x128xbf16>
    %cst_77 = arith.constant dense<0.000000e+00> : vector<16x128xf32>
    %153 = tpu.matmul %150, %152, %cst_77 {dimension_numbers = #tpu.dot_dimension_numbers<[1], [0], [0], [1], [0, 0, 1, 1], [], []>} : vector<16x32xbf16>, vector<32x128xbf16>, vector<16x128xf32> -> vector<16x128xf32>
    %c1_78 = arith.constant 1 : index
    %c0_79 = arith.constant 0 : index
    %c0_80 = arith.constant 0 : index
    %154 = vector.load %arg13[%c1_78, %c0_79, %c0_80] : memref<2x1x128xf32, #tpu.memory_space<vmem>>, vector<1x1x128xf32>
    %155 = vector.shape_cast %154 : vector<1x1x128xf32> to vector<1x128xf32>
    %156 = vector.broadcast %155 : vector<1x128xf32> to vector<16x128xf32>
    %157 = arith.addf %153, %156 : vector<16x128xf32>
    %158 = vector.extract_strided_slice %157 {offsets = [0, 0], sizes = [16, 32], strides = [1, 1]} : vector<16x128xf32> to vector<16x32xf32>
    %159 = vector.extract_strided_slice %157 {offsets = [0, 32], sizes = [16, 32], strides = [1, 1]} : vector<16x128xf32> to vector<16x32xf32>
    %160 = arith.maximumf %158, %159 : vector<16x32xf32>
    %161 = vector.extract_strided_slice %157 {offsets = [0, 64], sizes = [16, 32], strides = [1, 1]} : vector<16x128xf32> to vector<16x32xf32>
    %162 = arith.maximumf %160, %161 : vector<16x32xf32>
    %163 = vector.extract_strided_slice %157 {offsets = [0, 96], sizes = [16, 32], strides = [1, 1]} : vector<16x128xf32> to vector<16x32xf32>
    %164 = arith.maximumf %162, %163 : vector<16x32xf32>
    %c1_81 = arith.constant 1 : index
    %c0_82 = arith.constant 0 : index
    %c0_83 = arith.constant 0 : index
    %165 = vector.load %arg14[%c1_81, %c0_82, %c0_83] : memref<2x64x4xbf16, #tpu.memory_space<vmem>>, vector<1x64x4xbf16>
    %166 = vector.shape_cast %165 : vector<1x64x4xbf16> to vector<64x4xbf16>
    %167 = arith.truncf %149 : vector<16x32xf32> to vector<16x32xbf16>
    %168 = vector.extract_strided_slice %166 {offsets = [0, 0], sizes = [32, 4], strides = [1, 1]} : vector<64x4xbf16> to vector<32x4xbf16>
    %cst_84 = arith.constant dense<0.000000e+00> : vector<16x4xf32>
    %169 = tpu.matmul %167, %168, %cst_84 {dimension_numbers = #tpu.dot_dimension_numbers<[1], [0], [0], [1], [0, 0, 1, 1], [], []>} : vector<16x32xbf16>, vector<32x4xbf16>, vector<16x4xf32> -> vector<16x4xf32>
    %170 = arith.truncf %164 : vector<16x32xf32> to vector<16x32xbf16>
    %171 = vector.extract_strided_slice %166 {offsets = [32, 0], sizes = [32, 4], strides = [1, 1]} : vector<64x4xbf16> to vector<32x4xbf16>
    %cst_85 = arith.constant dense<0.000000e+00> : vector<16x4xf32>
    %172 = tpu.matmul %170, %171, %cst_85 {dimension_numbers = #tpu.dot_dimension_numbers<[1], [0], [0], [1], [0, 0, 1, 1], [], []>} : vector<16x32xbf16>, vector<32x4xbf16>, vector<16x4xf32> -> vector<16x4xf32>
    %173 = arith.addf %169, %172 : vector<16x4xf32>
    %c1_86 = arith.constant 1 : index
    %c0_87 = arith.constant 0 : index
    %c0_88 = arith.constant 0 : index
    %174 = vector.load %arg15[%c1_86, %c0_87, %c0_88] : memref<2x1x4xf32, #tpu.memory_space<vmem>>, vector<1x1x4xf32>
    %175 = vector.shape_cast %174 : vector<1x1x4xf32> to vector<1x4xf32>
    %176 = vector.broadcast %175 : vector<1x4xf32> to vector<16x4xf32>
    %177 = arith.addf %173, %176 : vector<16x4xf32>
    %cst_89 = arith.constant dense<0xFF800000> : vector<16xf32>
    %178 = vector.multi_reduction <maximumf>, %177, %cst_89 [1] : vector<16x4xf32> to vector<16xf32>
    %179 = vector.shape_cast %178 : vector<16xf32> to vector<16x1xf32>
    %180 = vector.shape_cast %179 : vector<16x1xf32> to vector<1x16x1xf32>
    %cst_90 = arith.constant dense<0xFF800000> : vector<1xf32>
    %181 = vector.multi_reduction <maximumf>, %180, %cst_90 [1, 2] : vector<1x16x1xf32> to vector<1xf32>
    %182 = vector.shape_cast %181 : vector<1xf32> to vector<1x1x1xf32>
    %183 = vector.extract %182[0, 0, 0] : f32 from vector<1x1x1xf32>
    %184 = vector.broadcast %183 : f32 to vector<16x1xf32>
    %185 = arith.cmpf oge, %179, %184 : vector<16x1xf32>
    %c16_i32_91 = arith.constant 16 : i32
    %186 = vector.broadcast %c16_i32_91 : i32 to vector<16x1xi32>
    %187 = arith.select %185, %0, %186 : vector<16x1xi1>, vector<16x1xi32>
    %188 = vector.shape_cast %187 : vector<16x1xi32> to vector<1x16x1xi32>
    %cst_92 = arith.constant dense<2147483647> : vector<1xi32>
    %189 = vector.multi_reduction <minsi>, %188, %cst_92 [1, 2] : vector<1x16x1xi32> to vector<1xi32>
    %190 = vector.shape_cast %189 : vector<1xi32> to vector<1x1x1xi32>
    %191 = vector.extract %190[0, 0, 0] : i32 from vector<1x1x1xi32>
    %192 = vector.broadcast %191 : i32 to vector<16x1xi32>
    %193 = arith.cmpi eq, %0, %192 : vector<16x1xi32>
    %cst_93 = arith.constant 0.000000e+00 : f32
    %194 = vector.shape_cast %193 : vector<16x1xi1> to vector<16x1xi1>
    %195 = vector.broadcast %194 : vector<16x1xi1> to vector<16x64xi1>
    %196 = vector.broadcast %cst_93 : f32 to vector<16x64xf32>
    %197 = arith.select %195, %2, %196 : vector<16x64xi1>, vector<16x64xf32>
    %cst_94 = arith.constant dense<0.000000e+00> : vector<64xf32>
    %198 = vector.multi_reduction <add>, %197, %cst_94 [0] : vector<16x64xf32> to vector<64xf32>
    %199 = vector.shape_cast %198 : vector<64xf32> to vector<1x64xf32>
    %c1_95 = arith.constant 1 : index
    %c0_96 = arith.constant 0 : index
    %200 = vector.load %arg18[%c1_95, %c0_96] : memref<2x64xf32, #tpu.memory_space<vmem>>, vector<1x64xf32>
    tpu.vector_store %arg18[%c1_95, %c0_96], %199 {strides = array<i32>} : memref<2x64xf32, #tpu.memory_space<vmem>>, vector<1x64xf32>,
    %c0_i32_97 = arith.constant 0 : i32
    %201 = vector.broadcast %c0_i32_97 : i32 to vector<1x128xi32>
    %202 = vector.broadcast %114 : i32 to vector<1x128xi32>
    %203 = arith.addi %201, %202 : vector<1x128xi32>
    %c0_i32_98 = arith.constant 0 : i32
    %204 = vector.broadcast %c0_i32_98 : i32 to vector<1x128xi32>
    %205 = vector.broadcast %191 : i32 to vector<1x128xi32>
    %206 = arith.addi %204, %205 : vector<1x128xi32>
    %207 = tpu.concatenate %203, %206 in 0 : vector<1x128xi32>, vector<1x128xi32> -> vector<2x128xi32>
    %c0_99 = arith.constant 0 : index
    %c0_100 = arith.constant 0 : index
    %c0_101 = arith.constant 0 : index
    %208 = vector.load %arg16[%c0_99, %c0_100, %c0_101] : memref<1x2x128xi32, #tpu.memory_space<vmem>>, vector<1x2x128xi32>
    %209 = vector.shape_cast %208 : vector<1x2x128xi32> to vector<2x128xi32>
    %210 = vector.shape_cast %207 : vector<2x128xi32> to vector<1x2x128xi32>
    tpu.vector_store %arg16[%c0_99, %c0_100, %c0_101], %210 {strides = array<i32>} : memref<1x2x128xi32, #tpu.memory_space<vmem>>, vector<1x2x128xi32>,
    return
  }
  func.func @transform_0(%arg0: i32, %arg1: i32) -> i32 {
    %c0_i32 = arith.constant 0 : i32
    %c0_i32_0 = arith.constant 0 : i32
    return %c0_i32 : i32
  }
  func.func @transform_1(%arg0: i32, %arg1: i32) -> (i32, i32, i32) {
    %c0_i32 = arith.constant 0 : i32
    %c0_i32_0 = arith.constant 0 : i32
    %c0_i32_1 = arith.constant 0 : i32
    return %arg0, %c0_i32, %c0_i32_0 : i32, i32, i32
  }
  func.func @transform_2(%arg0: i32, %arg1: i32) -> (i32, i32) {
    %c0_i32 = arith.constant 0 : i32
    %c0_i32_0 = arith.constant 0 : i32
    %c0_i32_1 = arith.constant 0 : i32
    return %c0_i32, %c0_i32_0 : i32, i32
  }
  func.func @transform_3(%arg0: i32, %arg1: i32) -> (i32, i32) {
    %c0_i32 = arith.constant 0 : i32
    %c0_i32_0 = arith.constant 0 : i32
    %c0_i32_1 = arith.constant 0 : i32
    return %c0_i32, %c0_i32_0 : i32, i32
  }
  func.func @transform_4(%arg0: i32, %arg1: i32) -> (i32, i32) {
    %c0_i32 = arith.constant 0 : i32
    %c0_i32_0 = arith.constant 0 : i32
    %c0_i32_1 = arith.constant 0 : i32
    return %c0_i32, %c0_i32_0 : i32, i32
  }
  func.func @transform_5(%arg0: i32, %arg1: i32) -> (i32, i32) {
    %c0_i32 = arith.constant 0 : i32
    %c0_i32_0 = arith.constant 0 : i32
    %c0_i32_1 = arith.constant 0 : i32
    return %c0_i32, %c0_i32_0 : i32, i32
  }
  func.func @transform_6(%arg0: i32, %arg1: i32) -> (i32, i32, i32) {
    %c0_i32 = arith.constant 0 : i32
    %c0_i32_0 = arith.constant 0 : i32
    %c0_i32_1 = arith.constant 0 : i32
    %c0_i32_2 = arith.constant 0 : i32
    return %c0_i32, %c0_i32_0, %c0_i32_1 : i32, i32, i32
  }
  func.func @transform_7(%arg0: i32, %arg1: i32) -> (i32, i32, i32) {
    %c0_i32 = arith.constant 0 : i32
    %c0_i32_0 = arith.constant 0 : i32
    %c0_i32_1 = arith.constant 0 : i32
    %c0_i32_2 = arith.constant 0 : i32
    return %c0_i32, %c0_i32_0, %c0_i32_1 : i32, i32, i32
  }
  func.func @transform_8(%arg0: i32, %arg1: i32) -> (i32, i32, i32) {
    %c0_i32 = arith.constant 0 : i32
    %c0_i32_0 = arith.constant 0 : i32
    %c0_i32_1 = arith.constant 0 : i32
    %c0_i32_2 = arith.constant 0 : i32
    return %c0_i32, %c0_i32_0, %c0_i32_1 : i32, i32, i32
  }
  func.func @transform_9(%arg0: i32, %arg1: i32) -> (i32, i32, i32) {
    %c0_i32 = arith.constant 0 : i32
    %c0_i32_0 = arith.constant 0 : i32
    %c0_i32_1 = arith.constant 0 : i32
    %c0_i32_2 = arith.constant 0 : i32
    return %c0_i32, %c0_i32_0, %c0_i32_1 : i32, i32, i32
  }
  func.func @transform_10(%arg0: i32, %arg1: i32) -> (i32, i32, i32) {
    %c0_i32 = arith.constant 0 : i32
    %c0_i32_0 = arith.constant 0 : i32
    %c0_i32_1 = arith.constant 0 : i32
    %c0_i32_2 = arith.constant 0 : i32
    return %c0_i32, %c0_i32_0, %c0_i32_1 : i32, i32, i32
  }
  func.func @transform_11(%arg0: i32, %arg1: i32) -> (i32, i32, i32) {
    %c0_i32 = arith.constant 0 : i32
    %c0_i32_0 = arith.constant 0 : i32
    %c0_i32_1 = arith.constant 0 : i32
    %c0_i32_2 = arith.constant 0 : i32
    return %c0_i32, %c0_i32_0, %c0_i32_1 : i32, i32, i32
  }
  func.func @transform_12(%arg0: i32, %arg1: i32) -> (i32, i32, i32) {
    %c0_i32 = arith.constant 0 : i32
    %c0_i32_0 = arith.constant 0 : i32
    %c0_i32_1 = arith.constant 0 : i32
    %c0_i32_2 = arith.constant 0 : i32
    return %c0_i32, %c0_i32_0, %c0_i32_1 : i32, i32, i32
  }
  func.func @transform_13(%arg0: i32, %arg1: i32) -> (i32, i32, i32) {
    %c0_i32 = arith.constant 0 : i32
    %c0_i32_0 = arith.constant 0 : i32
    %c0_i32_1 = arith.constant 0 : i32
    %c0_i32_2 = arith.constant 0 : i32
    return %c0_i32, %c0_i32_0, %c0_i32_1 : i32, i32, i32
  }
  func.func @transform_14(%arg0: i32, %arg1: i32) -> (i32, i32, i32) {
    %c0_i32 = arith.constant 0 : i32
    %c0_i32_0 = arith.constant 0 : i32
    %c0_i32_1 = arith.constant 0 : i32
    return %arg0, %c0_i32, %c0_i32_0 : i32, i32, i32
  }
}

</mosaic_0001>

<bundles_post_ra>
// kernel: coattention_forward.11
= control target key start
LH: loop header
LB: loop body
LE: loop exit
PB: predicated region body
PF: predicated region fallthrough
CT: control target
= control target key end

     0   :  { %vm44_vm0 = vcmask 261120   ;;  %s180_s1 = inlined_call_operand.vmem [shape: bf16[32,128], index: 1, kind: input, shape index: {}]   ;;  %s181_s0 = inlined_call_operand.vmem [shape: f32[32,32], index: 0, kind: input, shape index: {}]   ;;  %s182_s2 = inlined_call_operand.vmem [shape: f32[1,128], index: 2, kind: input, shape index: {}]   ;;  %s183_s3 = inlined_call_operand.vmem [shape: f32[32,128], index: 3, kind: output, shape index: {}]  }
   0x1   :  { %v125_v0 = vld [vmem:[%s180_s1] sm:$0xff]   ;;  %v126_v1 = vld [vmem:[%s180_s1 + $0x8] sm:$0xff]   ;;  %v17_v5 = vld [vmem:[%s181_s0 + $0x10] sm:$0xff] }
   0x2   :  { %117 = vmatprep.subr.bf16.mxu0 %v125_v0  ;;  %v15_v2 = vld [vmem:[%s181_s0] sm:$0xff]  ;;  %v16_v3 = vld [vmem:[%s181_s0 + $0x8] sm:$0xff]  ;;  %v18_v6 = vld [vmem:[%s181_s0 + $0x18] sm:$0xff] }
   0x3   :  { %118 = vmatpush3.bf16.msra.mxu0 %v125_v0  ;;  %v19_v4 = vpack.c.bf16 %v16_v3, %v15_v2  ;;  %v20_v7 = vpack.c.bf16 %v18_v6, %v17_v5  ;;  %v108_v8 = vld [vmem:[%s182_s2] ss:$0 sm:$0xff] }
   0x4   :  { %119 = vmatprep.subr.bf16.mxu0 %v126_v1 }
   0x5   :  { %121 = vmatprep.mubr.msk.bf16.mxu0 %vm44_vm0, %v19_v4 }
   0x7   :  { %120 = vmatpush3.bf16.msra.mxu0 %v126_v1 }
   0xa   :  { %122 = vmatmul.mubr.msk.bf16.vlgmr.msra.gmra.mrb[0].mxu0 %vm44_vm0, %v20_v7 }
  0xdd   :  { %v123_v9 = vpop.f32.mrb[0].mxu0 }
  0xde   :  { %v94_v10 = vadd.f32 %v123_v9, %v108_v8  ;;  %v85_v11 = vpop.f32.mrb[1].mxu0 }
  0xdf   :  { %v86_v12 = vadd.f32 %v108_v8, %v85_v11  ;;  %v124_v13 = vpop.f32.mrb[2].mxu0 }
  0xe0   :  { %102 = vst [vmem:[%s183_s3 + $0x10] sm:$0xff] %v94_v10  ;;  %v97_v14 = vadd.f32 %v124_v13, %v108_v8  ;;  %v88_v15 = vpop.f32.mrb[3].mxu0 }
  0xe1   :  { %100 = vst [vmem:[%s183_s3] sm:$0xff] %v86_v12  ;;  %v89_v16 = vadd.f32 %v108_v8, %v88_v15 }
  0xe2   :  { %103 = vst [vmem:[%s183_s3 + $0x18] sm:$0xff] %v97_v14 }
  0xe3   :  { %101 = vst [vmem:[%s183_s3 + $0x8] sm:$0xff] %v89_v16 }

// kernel: coattention_forward.13
= control target key start
LH: loop header
LB: loop body
LE: loop exit
PB: predicated region body
PF: predicated region fallthrough
CT: control target
= control target key end

     0   :  { %v111_v0 = vmov 0.0   ;;  %vm112_vm0 = vmmov 0   ;;  %vm41_vm1 = vcmask 261120   ;;  %s154_s1 = inlined_call_operand.vmem [shape: bf16[32,128], index: 1, kind: input, shape index: {}]   ;;  %s155_s0 = inlined_call_operand.vmem [shape: f32[16,32], index: 0, kind: input, shape index: {}]   ;;  %s156_s2 = inlined_call_operand.vmem [shape: f32[1,128], index: 2, kind: input, shape index: {}]   ;;  %s157_s3 = inlined_call_operand.vmem [shape: f32[16,128], index: 3, kind: output, shape index: {}]  }
   0x1   :  { %99 = vmatprep.subr.bf16.mxu0 %v111_v0  ;;  %v109_v1 = vld [vmem:[%s154_s1] sm:$0xff]   ;;  %103 = vmatprep.mubr.msk.bf16.mxu0 %vm112_vm0, %v111_v0  ;;  %v110_v2 = vld [vmem:[%s154_s1 + $0x8] sm:$0xff]  }
   0x2   :  { %100 = vmatpush3.bf16.msra.mxu0 %v109_v1  ;;  %v15_v3 = vld [vmem:[%s155_s0] sm:$0xff]  ;;  %v16_v4 = vld [vmem:[%s155_s0 + $0x8] sm:$0xff] }
   0x3   :  { %101 = vmatprep.subr.bf16.mxu0 %v111_v0  ;;  %v17_v5 = vpack.c.bf16 %v16_v4, %v15_v3  ;;  %v92_v6 = vld [vmem:[%s156_s2] ss:$0 sm:$0xff] }
   0x6   :  { %102 = vmatpush3.bf16.msra.mxu0 %v110_v2 }
   0x9   :  { %104 = vmatmul.mubr.msk.bf16.vlgmr.msra.gmra.mrb[0].mxu0 %vm41_vm1, %v17_v5 }
  0xdc   :  { %v79_v7 = vpop.f32.mrb[0].mxu0 }
  0xdd   :  { %v80_v8 = vadd.f32 %v92_v6, %v79_v7  ;;  %v105_v9 = vpop.f32.mrb[1].mxu0 }
  0xde   :  { %v82_v10 = vpop.f32.mrb[2].mxu0 }
  0xdf   :  { %86 = vst [vmem:[%s157_s3] sm:$0xff] %v80_v8  ;;  %v83_v11 = vadd.f32 %v92_v6, %v82_v10  ;;  %v106_v12 = vpop.f32.mrb[3].mxu0 }
  0xe1   :  { %87 = vst [vmem:[%s157_s3 + $0x8] sm:$0xff] %v83_v11 }

// kernel: coattention_forward.12
= control target key start
LH: loop header
LB: loop body
LE: loop exit
PB: predicated region body
PF: predicated region fallthrough
CT: control target
= control target key end

     0   :  { %s614_s24 = smov 0   ;;  %s684_s0 = inlined_call_operand.vmem [shape: f32[16,2,128], index: 0, kind: input, shape index: {}]   ;;  %s685_s1 = inlined_call_operand.vmem [shape: bf16[32,128], index: 1, kind: input, shape index: {}]   ;;  %s686_s2 = inlined_call_operand.vmem [shape: f32[16,2,1], index: 2, kind: input, shape index: {}]   ;;  %s687_s3 = inlined_call_operand.vmem [shape: f32[2,32], index: 3, kind: input, shape index: {}, may-alias: {3,4}]   ;;  %s688_s4 = inlined_call_operand.vmem [shape: f32[2,32], index: 4, kind: input, shape index: {}, may-alias: {3,4}]   ;;  %s689_s5 = inlined_call_operand.vmem [shape: f32[16,2,32], index: 5, kind: output, shape index: {0}]   ;;  %s690_s6 = inlined_call_operand.vmem [shape: f32[2,32], index: 6, kind: output, shape index: {1}]   ;;  %s691_s7 = inlined_call_operand.vmem [shape: f32[2,32], index: 7, kind: output, shape index: {2}]  }
   0x1 LB: > { %s508_s25 = sadd.s32 4294967295, %s566_s24   ;;  %p512_p0 = scmp.ge.s32.totalorder %s566_s24, 1  ;;  %s566_s24 = sphi %s614_s24, %s18_s24  }
   0x2   : > { %p240_p1 = scmp.lt.s32.totalorder %s566_s24, 17 }
   0x4   : > { %p241_p2 = pnand %p512_p0, %p240_p1 }
   0x5   : > { %p274_p3 = scmp.lt.s32.totalorder (!%p241_p2), %s508_s25, 15  ;;  %p516_p4 = scmp.ne.s32.totalorder (!%p241_p2), %s508_s25, 0 }
   0x6   : > { %244 = sbr.rel (%p241_p2) target bundleno = 743 (0x2e7), region = 40 }
   0xd   : > { %s275_s26 = scalar_select %p274_p3, %s508_s25, 15 }
   0xe   : > { %290 = sbr.rel (%p516_p4) target bundleno = 21 (0x15), region = 44  ;;  %v291_v0 = vld [vmem:[%s687_s3] sm:$0x3] (!%p516_p4)  ;;  %vm292_vm0 = vcmask (!%p516_p4), 254976  }
   0xf   : > { %s622_s27 = sshll.u32 %s275_s26, 1  ;;  %v294_v1 = vld [vmem:[%s688_s4] sm:$0x3] (!%p516_p4)  ;;  %293 = vst.msk [vmem:[%s690_s6] sm:$0x3] (!%p516_p4), %vm292_vm0, %v291_v0 }
  0x10   : > { %s277_s30 = scalar_lea.vmem %s684_s0, %s622_s27  ;;  %s281_s10 = scalar_lea.vmem %s686_s2, %s622_s27  ;;  %295 = vst.msk [vmem:[%s691_s7] sm:$0x3] (!%p516_p4), %vm292_vm0, %v294_v1 }
  0x11   : > { %s285_s13 = scalar_lea.vmem %s689_s5, %s622_s27 }
  0x15 PF: > { %v550_v2 = vld [vmem:[%s685_s1] sm:$0xff]   ;;  %v568_v3 = vmov 0.0   ;;  %v551_v4 = vld [vmem:[%s685_s1 + $0x8] sm:$0xff]   ;;  %vm569_vm1 = vmmov 0   ;;  %vm316_vm2 = vcmask 261120   ;;  %v570_v7 = vmov 0  }
  0x16   : > { %526 = vmatprep.subr.bf16.mxu0 %v568_v3  ;;  %530 = vmatprep.mubr.msk.bf16.mxu0 %vm569_vm1, %v568_v3  ;;  %v296_v5 = vld [vmem:[%s690_s6] sm:$0x3]  ;;  %s571_s8 = smov 64   ;;  %s572_s12 = smov 32   ;;  %vm412_vm3 = vcmask 254976  }
  0x17   : > { %527 = vmatpush3.bf16.msra.mxu0 %v550_v2  ;;  %v299_v6 = vpack.c.bf16 %v296_v5, %v296_v5  ;;  %549 = vset.pattern.permute.xlu0 %v570_v7  ;;  %v298_v8 = vld [vmem:[%s277_s30] sm:$0x3]  ;;  %s573_s30 = smov 96  }
  0x18   : > { %528 = vmatprep.subr.bf16.mxu0 %v568_v3  ;;  %548 = vset.pattern.permute.xlu1 %v570_v7  ;;  %v297_v15 = vld [vmem:[%s691_s7] sm:$0x3] }
  0x19   : > { %v389_v16 = vld [vmem:[%s281_s10] sm:$0x3] }
  0x1a   : > { %v396_v23 = vsub.f32 1.0, %v389_v16 }
  0x1b   : > { %529 = vmatpush3.bf16.msra.mxu0 %v551_v4 }
  0x1e   : > { %531 = vmatmul.mubr.msk.bf16.vlgmr.msra.gmra.mrb[0].mxu0 %vm316_vm2, %v299_v6 }
  0xf1   : > { %v354_v9 = vpop.f32.mrb[0].mxu0 }
  0xf2   : > { %v360_v10 = vadd.f32 %v354_v9, %v298_v8  ;;  %v532_v11 = vpop.f32.mrb[1].mxu0 }
  0xf3   : > { %v357_v12 = vpop.f32.mrb[2].mxu0 }
  0xf4   : > { %552 = vtanh.f32 %v360_v10  ;;  %v533_v13 = vpop.f32.mrb[3].mxu0  ;;  %v520_v17 = vmul.f32 -1.442695, %v360_v10 }
  0xf6   : > { %554 = vpow2.f32 %v520_v17 }
  0xfe   : > { %v553_v14 = vpop.eup %552 }
  0xff   : > { %374 = vrot.lane.b32.xlu0 %v553_v14, %s571_s8 }
 0x100   : > { %v555_v18 = vpop.eup %554 }
 0x101   : > { %v364_v19 = vadd.f32 1.0, %v555_v18 }
 0x103   : > { %369 = vrot.lane.b32.xlu0 %v297_v15, %s572_s12  ;;  %556 = vrcp.f32 %v364_v19 }
 0x107   : > { %392 = vperm.xlu0 %549, %v389_v16  }
 0x10d   : > { %v557_v20 = vpop.eup %556 }
 0x171   : > { %v375_v21 = vpop.permute.xlu0 %374 }
 0x172   : > { %v377_v22 = vmul.f32 %v557_v20, %v375_v21 }
 0x174   : > { %379 = vrot.lane.b32.xlu1 %v377_v22, %s572_s12 }
 0x175   : > { %v370_v24 = vpop.permute.xlu0 %369 }
 0x176   : > { %v372_v25 = vmul.f32 %v557_v20, %v370_v24 }
 0x178   : > { %399 = vperm.xlu1 %548, %v396_v23  }
 0x186   : > { %v393_v34 = vpop.permute.xlu0 %392 }
 0x1e6   : > { %v380_v26 = vpop.permute.xlu1 %379 }
 0x1e7   : > { %v382_v27 = vadd.f32 %v380_v26, %v372_v25 }
 0x1e9   : > { %558 = vtanh.f32 %v382_v27  ;;  %v414_v35 = vmul.f32 %v393_v34, %v382_v27 }
 0x1f3   : > { %v559_v28 = vpop.eup %558 }
 0x1f4   : > { %385 = vrot.lane.b32.xlu1 %v559_v28, %s571_s8 }
 0x1f7   : > { %v400_v29 = vpop.permute.xlu1 %399 }
 0x1f8   : > { %v402_v30 = vmul.f32 %v400_v29, %v296_v5  ;;  %v415_v31 = vmul.f32 %v400_v29, %v297_v15 }
 0x1fa   : > { %417 = vrot.lane.b32.xlu0 %v415_v31, %s572_s12  ;;  %404 = vrot.lane.b32.xlu1 %v402_v30, %s573_s30 }
 0x266   : > { %v386_v32 = vpop.permute.xlu1 %385 }
 0x267   : > { %v388_v33 = vmul.f32 %v557_v20, %v386_v32 }
 0x269   : > { %v395_v36 = vmul.f32 %v393_v34, %v388_v33 }
 0x26c   : > { %v418_v37 = vpop.permute.xlu0 %417  ;;  %v405_v38 = vpop.permute.xlu1 %404 }
 0x26d   : > { %v420_v39 = vadd.f32 %v418_v37, %v414_v35  ;;  %v407_v40 = vadd.f32 %v405_v38, %v395_v36 }
 0x26f   : > { %422 = vrot.lane.b32.xlu0 %v420_v39, %s573_s30  ;;  %409 = vrot.lane.b32.xlu1 %v407_v40, %s572_s12 }
 0x273   : > { %427 = vrot.lane.b32.xlu1 %v395_v36, %s572_s12 }
 0x2e1   : > { %v423_v41 = vpop.permute.xlu0 %422  ;;  %v410_v42 = vpop.permute.xlu1 %409 }
 0x2e2   : > { %425 = vst.msk [vmem:[%s691_s7] sm:$0x3] %vm412_vm3, %v423_v41  ;;  %413 = vst.msk [vmem:[%s690_s6] sm:$0x3] %vm412_vm3, %v410_v42 }
 0x2e5   : > { %v428_v43 = vpop.permute.xlu1 %427 }
 0x2e6   : > { %430 = vst.msk [vmem:[%s285_s13] sm:$0x3] %vm412_vm3, %v428_v43 }
 0x2e7 PF: > { %s18_s24 = sadd.s32 1, %s566_s24  }
 0x2e8   : > { %p15_p5 = scmp.ge.s32.totalorder %s18_s24, 18  }
 0x2ea   :  { %17 = sbr.rel (!%p15_p5) target bundleno = 1 (0x1), region = 93 }

// kernel: coattention_forward.14
= control target key start
LH: loop header
LB: loop body
LE: loop exit
PB: predicated region body
PF: predicated region fallthrough
CT: control target
= control target key end

     0   :  { %13 = vsyncpa [#allocation3], 0  ;;  %s842_s0 = inlined_call_operand.vmem [shape: f32[8,2,128], index: 0, kind: input, shape index: {}]   ;;  %s843_s1 = inlined_call_operand.vmem [shape: bf16[32,128], index: 1, kind: input, shape index: {}]   ;;  %s844_s2 = inlined_call_operand.vmem [shape: f32[8,2,1], index: 2, kind: input, shape index: {}]   ;;  %s845_s3 = inlined_call_operand.vmem [shape: f32[2,32], index: 3, kind: input, shape index: {}]   ;;  %s846_s4 = inlined_call_operand.vmem [shape: f32[2,32], index: 4, kind: input, shape index: {}]   ;;  %s847_s5 = inlined_call_operand.vmem [shape: f32[8,2,32], index: 5, kind: output, shape index: {0}]   ;;  %s848_s6 = inlined_call_operand.hbm [shape: f32[2,32], index: 6, kind: output, shape index: {1}]   ;;  %s849_s7 = inlined_call_operand.hbm [shape: f32[2,32], index: 7, kind: output, shape index: {2}]  }
   0x1   :  { %14 = vsyncpa [#allocation5], 0  ;;  %s730_s24 = smov 0  }
   0x2 LB: > { %s736_s25 = sadd.s32 4294967295, %s680_s24   ;;  %p548_p0 = scmp.ge.s32.totalorder %s680_s24, 1  ;;  %s680_s24 = sphi %s730_s24, %s20_s24  }
   0x3   : > { %p242_p1 = scmp.lt.s32.totalorder %s680_s24, 9 }
   0x5   : > { %p243_p2 = pnand %p548_p0, %p242_p1 }
   0x6   : > { %p276_p3 = scmp.lt.s32.totalorder (!%p243_p2), %s736_s25, 7  ;;  %p552_p4 = scmp.ne.s32.totalorder (!%p243_p2), %s736_s25, 0 }
   0x7   : > { %246 = sbr.rel (%p243_p2) target bundleno = 778 (0x30a), region = 40 }
   0xe   : > { %s277_s26 = scalar_select %p276_p3, %s736_s25, 7 }
   0xf   : > { %292 = sbr.rel (%p552_p4) target bundleno = 22 (0x16), region = 44  ;;  %v293_v0 = vld [vmem:[%s845_s3] sm:$0x3] (!%p552_p4)  ;;  %vm294_vm0 = vcmask (!%p552_p4), 254976  }
  0x10   : > { %s742_s27 = sshll.u32 %s277_s26, 1  ;;  %v296_v1 = vld [vmem:[%s846_s4] sm:$0x3] (!%p552_p4)  ;;  %295 = vst.msk [vmem:[#allocation2] sm:$0x3] (!%p552_p4), %vm294_vm0, %v293_v0 }
  0x11   : > { %s279_s30 = scalar_lea.vmem %s842_s0, %s742_s27  ;;  %s283_s10 = scalar_lea.vmem %s844_s2, %s742_s27  ;;  %297 = vst.msk [vmem:[#allocation4] sm:$0x3] (!%p552_p4), %vm294_vm0, %v296_v1 }
  0x12   : > { %s287_s13 = scalar_lea.vmem %s847_s5, %s742_s27 }
  0x16 PF: > { %v604_v2 = vld [vmem:[%s843_s1] sm:$0xff]   ;;  %v682_v3 = vmov 0.0   ;;  %v605_v4 = vld [vmem:[%s843_s1 + $0x8] sm:$0xff]   ;;  %vm683_vm1 = vmmov 0   ;;  %vm318_vm2 = vcmask 261120   ;;  %v684_v7 = vmov 0  }
  0x17   : > { %566 = vmatprep.subr.bf16.mxu0 %v682_v3  ;;  %570 = vmatprep.mubr.msk.bf16.mxu0 %vm683_vm1, %v682_v3  ;;  %v298_v5 = vld [vmem:[#allocation2] sm:$0x3]  ;;  %s685_s22 = smov 64   ;;  %s686_s23 = smov 32   ;;  %vm414_vm3 = vcmask 254976  }
  0x18   : > { %567 = vmatpush3.bf16.msra.mxu0 %v604_v2  ;;  %v301_v6 = vpack.c.bf16 %v298_v5, %v298_v5  ;;  %603 = vset.pattern.permute.xlu0 %v684_v7  ;;  %v300_v8 = vld [vmem:[%s279_s30] sm:$0x3]  ;;  %v299_v15 = vld [vmem:[#allocation4] sm:$0x3]  ;;  %s687_s29 = smov 96   ;;  %s688_s30 = smov [#allocation2]  }
  0x19   : > { %568 = vmatprep.subr.bf16.mxu0 %v682_v3  ;;  %602 = vset.pattern.permute.xlu1 %v684_v7  ;;  %v391_v16 = vld [vmem:[%s283_s10] sm:$0x3]  ;;  %s447_s8 = sshll.u32 %s688_s30, 4  ;;  %s689_s9 = smov [#allocation4]   ;;  %s448_s8 = int_to_ptr.vmem [resolvable:$true] %s447_s8 }
  0x1a   : > { %v398_v23 = vsub.f32 1.0, %v391_v16  ;;  %s458_s10 = sshll.u32 %s689_s9, 4  ;;  %p582_p5 = scmp.eq.s32.totalorder %s736_s25, 7  ;;  %s780_s10 = int_to_ptr.vmem [resolvable:$true] %s458_s10 }
  0x1b   : > { %s614_s11 = scalar_lea.vmem %s448_s8, 32  ;;  %p621_p9 = scmp.lt.s32.totalorder %s448_s8, %s448_s8 }
  0x1c   : > { %569 = vmatpush3.bf16.msra.mxu0 %v605_v4  ;;  %p615_p6 = scmp.ne.s32.totalorder %s448_s8, %s614_s11  ;;  %p622_p10 = scmp.lt.s32.totalorder %s614_s11, %s614_s11 }
  0x1e   : > { %p616_p7 = pnand %p615_p6, %p582_p5  ;;  %p623_p11 = por %p622_p10, %p621_p9 }
  0x1f   : > { %571 = vmatmul.mubr.msk.bf16.vlgmr.msra.gmra.mrb[0].mxu0 %vm318_vm2, %v301_v6 }
  0x20   : > { %p617_p8 = pneg %p616_p7 }
  0x22   : > { %p624_p12 = pnand %p623_p11, %p617_p8 }
  0xf2   : > { %v356_v9 = vpop.f32.mrb[0].mxu0 }
  0xf3   : > { %v362_v10 = vadd.f32 %v356_v9, %v300_v8  ;;  %v572_v11 = vpop.f32.mrb[1].mxu0 }
  0xf4   : > { %v359_v12 = vpop.f32.mrb[2].mxu0 }
  0xf5   : > { %606 = vtanh.f32 %v362_v10  ;;  %v573_v13 = vpop.f32.mrb[3].mxu0  ;;  %v556_v17 = vmul.f32 -1.442695, %v362_v10 }
  0xf7   : > { %608 = vpow2.f32 %v556_v17 }
  0xff   : > { %v607_v14 = vpop.eup %606 }
 0x100   : > { %376 = vrot.lane.b32.xlu0 %v607_v14, %s685_s22 }
 0x101   : > { %v609_v18 = vpop.eup %608 }
 0x102   : > { %v366_v19 = vadd.f32 1.0, %v609_v18 }
 0x104   : > { %371 = vrot.lane.b32.xlu0 %v299_v15, %s686_s23  ;;  %610 = vrcp.f32 %v366_v19 }
 0x108   : > { %394 = vperm.xlu0 %603, %v391_v16  }
 0x10e   : > { %v611_v20 = vpop.eup %610 }
 0x172   : > { %v377_v21 = vpop.permute.xlu0 %376 }
 0x173   : > { %v379_v22 = vmul.f32 %v611_v20, %v377_v21 }
 0x175   : > { %381 = vrot.lane.b32.xlu1 %v379_v22, %s686_s23 }
 0x176   : > { %v372_v24 = vpop.permute.xlu0 %371 }
 0x177   : > { %v374_v25 = vmul.f32 %v611_v20, %v372_v24 }
 0x179   : > { %401 = vperm.xlu1 %602, %v398_v23  }
 0x187   : > { %v395_v34 = vpop.permute.xlu0 %394 }
 0x1e7   : > { %v382_v26 = vpop.permute.xlu1 %381 }
 0x1e8   : > { %v384_v27 = vadd.f32 %v382_v26, %v374_v25 }
 0x1ea   : > { %612 = vtanh.f32 %v384_v27  ;;  %v416_v35 = vmul.f32 %v395_v34, %v384_v27 }
 0x1f4   : > { %v613_v28 = vpop.eup %612 }
 0x1f5   : > { %387 = vrot.lane.b32.xlu1 %v613_v28, %s685_s22 }
 0x1f8   : > { %v402_v29 = vpop.permute.xlu1 %401 }
 0x1f9   : > { %v404_v30 = vmul.f32 %v402_v29, %v298_v5  ;;  %v417_v31 = vmul.f32 %v402_v29, %v299_v15 }
 0x1fb   : > { %419 = vrot.lane.b32.xlu0 %v417_v31, %s686_s23  ;;  %406 = vrot.lane.b32.xlu1 %v404_v30, %s687_s29 }
 0x267   : > { %v388_v32 = vpop.permute.xlu1 %387 }
 0x268   : > { %v390_v33 = vmul.f32 %v611_v20, %v388_v32 }
 0x26a   : > { %v397_v36 = vmul.f32 %v395_v34, %v390_v33 }
 0x26d   : > { %v420_v37 = vpop.permute.xlu0 %419  ;;  %v407_v38 = vpop.permute.xlu1 %406 }
 0x26e   : > { %v422_v39 = vadd.f32 %v420_v37, %v416_v35  ;;  %v409_v40 = vadd.f32 %v407_v38, %v397_v36 }
 0x270   : > { %424 = vrot.lane.b32.xlu0 %v422_v39, %s687_s29  ;;  %411 = vrot.lane.b32.xlu1 %v409_v40, %s686_s23 }
 0x274   : > { %429 = vrot.lane.b32.xlu1 %v397_v36, %s686_s23 }
 0x2e2   : > { %v425_v41 = vpop.permute.xlu0 %424  ;;  %v412_v42 = vpop.permute.xlu1 %411 }
 0x2e3   : > { %415 = vst.msk [vmem:[#allocation2] sm:$0x3] %vm414_vm3, %v412_v42  ;;  %427 = vst.msk [vmem:[#allocation4] sm:$0x3] %vm414_vm3, %v425_v41 }
 0x2e4   : > { %627 = shalt.err (!%p624_p12)
}
 0x2e5   : > { %s628_s15 = scalar_lea.hbm %s848_s6, 32 }
 0x2e6   : > { %p629_p13 = scmp.ne.s32.totalorder %s848_s6, %s628_s15  ;;  %p634_p2 = scmp.lt.u32.totalorder %s628_s15, %s848_s6 }
 0x2e8   : > { %p630_p0 = pnand %p629_p13, %p582_p5 }
 0x2ea   : > { %p631_p1 = pneg %p630_p0 }
 0x2ec   : > { %p636_p3 = pnand %p634_p2, %p631_p1 }
 0x2ee   : > { %639 = shalt.err (!%p636_p3)
}
 0x2ef   : > { %575 = dma.vmem_to_hbm [thread:$0]  (%p582_p5), %s448_s8, 32, %s848_s6, [#allocation3]  }
 0x2f0   : > { %s640_s22 = scalar_lea.vmem %s780_s10, 32  ;;  %p647_p8 = scmp.lt.s32.totalorder %s780_s10, %s780_s10 }
 0x2f1   : > { %p641_p4 = scmp.ne.s32.totalorder %s780_s10, %s640_s22  ;;  %p648_p9 = scmp.lt.s32.totalorder %s640_s22, %s640_s22 }
 0x2f3   : > { %p642_p6 = pnand %p641_p4, %p582_p5  ;;  %p649_p10 = por %p648_p9, %p647_p8 }
 0x2f5   : > { %p643_p7 = pneg %p642_p6 }
 0x2f7   : > { %p650_p11 = pnand %p649_p10, %p643_p7 }
 0x2f9   : > { %653 = shalt.err (!%p650_p11)
}
 0x2fa   : > { %s654_s28 = scalar_lea.hbm %s849_s7, 32 }
 0x2fb   : > { %p655_p12 = scmp.ne.s32.totalorder %s849_s7, %s654_s28  ;;  %p660_p1 = scmp.lt.u32.totalorder %s654_s28, %s849_s7 }
 0x2fd   : > { %p656_p13 = pnand %p655_p12, %p582_p5 }
 0x2ff   : > { %p657_p0 = pneg %p656_p13 }
 0x301   : > { %p662_p2 = pnand %p660_p1, %p657_p0 }
 0x303   : > { %665 = shalt.err (!%p662_p2)
}
 0x304   : > { %577 = dma.vmem_to_hbm [thread:$0]  (%p582_p5), %s780_s10, 32, %s849_s7, [#allocation5]   ;;  %v430_v43 = vpop.permute.xlu1 %429 }
 0x305   : > { %432 = vst.msk [vmem:[%s287_s13] sm:$0x3] %vm414_vm3, %v430_v43 }
 0x306   : > { %671 = dma.done.wait (%p582_p5), [#allocation3], 32  }
 0x307   : > { %673 = vsyncadd (%p582_p5), [#allocation3], 4294967264 }
 0x308   : > { %675 = dma.done.wait (%p582_p5), [#allocation5], 32  }
 0x309   : > { %677 = vsyncadd (%p582_p5), [#allocation5], 4294967264 }
 0x30a PF: > { %s20_s24 = sadd.s32 1, %s680_s24  }
 0x30b   : > { %p17_p3 = scmp.ge.s32.totalorder %s20_s24, 10  }
 0x30d   :  { %19 = sbr.rel (!%p17_p3) target bundleno = 2 (0x2), region = 94 }
 0x314   :  { %482 = vsyncpa [#allocation3], 1 }
 0x315   :  { %484 = vsyncpa [#allocation3 + $0x1], 1 }
 0x316   :  { %485 = vsyncpa [#allocation5], 1 }

// kernel: coattention_forward.15
= control target key start
LH: loop header
LB: loop body
LE: loop exit
PB: predicated region body
PF: predicated region fallthrough
CT: control target
= control target key end

     0   :  { %v117_v0 = vmov 0.0   ;;  %vm118_vm0 = vmmov 0   ;;  %vm41_vm1 = vcmask 261120   ;;  %s163_s1 = inlined_call_operand.vmem [shape: bf16[32,32], index: 1, kind: input, shape index: {}]   ;;  %s164_s0 = inlined_call_operand.vmem [shape: f32[16,32], index: 0, kind: input, shape index: {}]   ;;  %s165_s2 = inlined_call_operand.vmem [shape: f32[1,32], index: 2, kind: input, shape index: {}]   ;;  %s166_s3 = inlined_call_operand.vmem [shape: f32[16,32], index: 3, kind: output, shape index: {}]  }
   0x1   :  { %101 = vmatprep.subr.bf16.mxu0 %v117_v0  ;;  %v111_v1 = vld [vmem:[%s163_s1] sm:$0xff]   ;;  %105 = vmatprep.mubr.msk.bf16.mxu0 %vm118_vm0, %v117_v0  ;;  %v112_v2 = vld [vmem:[%s163_s1 + $0x8] sm:$0xff]  }
   0x2   :  { %102 = vmatpush3.bf16.msra.mxu0 %v111_v1  ;;  %v15_v3 = vld [vmem:[%s164_s0] sm:$0xff]  ;;  %v16_v4 = vld [vmem:[%s164_s0 + $0x8] sm:$0xff] }
   0x3   :  { %103 = vmatprep.subr.bf16.mxu0 %v117_v0  ;;  %v17_v5 = vpack.c.bf16 %v16_v4, %v15_v3  ;;  %v94_v6 = vld [vmem:[%s165_s2] ss:$0 sm:$0xff] }
   0x6   :  { %104 = vmatpush3.bf16.msra.mxu0 %v112_v2 }
   0x9   :  { %106 = vmatmul.mubr.msk.bf16.vlgmr.msra.gmra.mrb[0].mxu0 %vm41_vm1, %v17_v5 }
  0xdc   :  { %v79_v7 = vpop.f32.mrb[0].mxu0 }
  0xdd   :  { %v80_v8 = vadd.f32 %v94_v6, %v79_v7  ;;  %v107_v9 = vpop.f32.mrb[1].mxu0 }
  0xde   :  { %v82_v10 = vpop.f32.mrb[2].mxu0 }
  0xdf   :  { %113 = vtanh.f32 %v80_v8  ;;  %v83_v11 = vadd.f32 %v94_v6, %v82_v10  ;;  %v108_v12 = vpop.f32.mrb[3].mxu0 }
  0xe1   :  { %115 = vtanh.f32 %v83_v11 }
  0xe9   :  { %v114_v13 = vpop.eup %113 }
  0xea   :  { %88 = vst.msk [vmem:[%s166_s3] sm:$0xff] %vm41_vm1, %v114_v13 }
  0xeb   :  { %v116_v14 = vpop.eup %115 }
  0xec   :  { %89 = vst.msk [vmem:[%s166_s3 + $0x8] sm:$0xff] %vm41_vm1, %v116_v14 }

// kernel: coattention_forward.16
= control target key start
LH: loop header
LB: loop body
LE: loop exit
PB: predicated region body
PF: predicated region fallthrough
CT: control target
= control target key end

     0   :  { %s616_s9 = smov 0   ;;  %s664_s0 = inlined_call_operand.vmem [shape: f32[2,8,32], index: 0, kind: input, shape index: {}]   ;;  %s665_s1 = inlined_call_operand.vmem [shape: f32[2,16,32], index: 1, kind: input, shape index: {}]   ;;  %s666_s2 = inlined_call_operand.vmem [shape: bf16[2,16,128], index: 2, kind: output, shape index: {}]  }
   0x1 LB: > { %s499_s10 = sadd.s32 4294967295, %s595_s9   ;;  %p503_p0 = scmp.ge.s32.totalorder %s595_s9, 1  ;;  %s595_s9 = sphi %s616_s9, %s12_s9  }
   0x2   : > { %p121_p1 = scmp.lt.s32.totalorder %s595_s9, 3 }
   0x4   : > { %p122_p2 = pnand %p503_p0, %p121_p1 }
   0x5   : > { %p147_p3 = scmp.lt.s32.totalorder (!%p122_p2), %s499_s10, 1  ;;  %v597_v0 = vmov (!%p122_p2), 0.0   ;;  %vm598_vm0 = vmmov (!%p122_p2), 0   ;;  %vm167_vm1 = vcmask (!%p122_p2), 261120   ;;  %vm214_vm2 = vcmask (!%p122_p2), 130048   ;;  %s599_s19 = smov (!%p122_p2), 64  }
   0x6   : > { %125 = sbr.rel (%p122_p2) target bundleno = 997 (0x3e5), region = 28  ;;  %534 = vmatprep.subr.bf16.mxu0 (!%p122_p2), %v597_v0  ;;  %536 = vmatprep.mubr.msk.bf16.mxu0 (!%p122_p2), %vm598_vm0, %v597_v0  ;;  %vm309_vm3 = vcmask (!%p122_p2), 1043456   ;;  %vm305_vm4 = vcmask (!%p122_p2), 64512   ;;  %s600_s20 = smov (!%p122_p2), 32   ;;  %vm416_vm5 = vcmask (!%p122_p2), 523264   ;;  %vm419_vm6 = vcmask (!%p122_p2), 785408  }
   0x7   : > { %540 = vmatprep.subr.bf16.mxu1 (!%p122_p2), %v597_v0  ;;  %542 = vmatprep.mubr.msk.bf16.mxu1 (!%p122_p2), %vm598_vm0, %v597_v0 }
   0xd   : > { %s668_s10 = smov (!%p147_p3, %s499_s10), 1 }
   0xe   : > { %s504_s11 = sshll.u32 %s668_s10, 3  ;;  %s517_s12 = sshll.u32 %s668_s10, 4 }
   0xf   : > { %s155_s15 = scalar_lea.vmem %s665_s1, %s517_s12  ;;  %s150_s18 = scalar_lea.vmem %s664_s0, %s504_s11 }
  0x10   : > { %v633_v1 = vld [vmem:[%s155_s15] sm:$0xff]  ;;  %v635_v2 = vld [vmem:[%s155_s15 + $0x8] sm:$0xff]  ;;  %s160_s23 = scalar_lea.vmem %s666_s2, %s504_s11 }
  0x11   : > { %v166_v3 = vpack.c.bf16 %v635_v2, %v633_v1  ;;  %v162_v5 = vld [vmem:[%s150_s18] sm:$0xff]  ;;  %v576_v48 = vpack.i.bf16 %v635_v2, %v633_v1 }
  0x12   : > { %v165_v6 = vpack.c.bf16 %v162_v5, %v162_v5 }
  0x13   : > { %v172_v4 = vsel %vm167_vm1, %v166_v3, 0  ;;  %541 = vmatpush3.bf16.msra.mxu1 %v166_v3 }
  0x14   : > { %535 = vmatpush3.bf16.xpose.msra.mxu0 %v172_v4  ;;  %546 = vmatprep.subr.bf16.mxu1 %v597_v0  ;;  %v310_v36 = vsel %vm309_vm3, %v165_v6, 0 }
  0x15   : > { %552 = vmatprep.subr.bf16.mxu0 %v597_v0 }
  0x1b   : > { %537 = vmatmul.mubr.msk.bf16.vlgmr.msra.gmra.mrb[0].mxu0 %vm167_vm1, %v165_v6 }
  0x1c   : > { %554 = vmatprep.mubr.msk.bf16.mxu0 %vm598_vm0, %v597_v0 }
  0xee   : > { %v208_v7 = vpop.f32.mrb[0].mxu0 }
  0xef   : > { %v538_v8 = vpop.f32.mrb[1].mxu0  ;;  %v215_v9 = vsel %vm214_vm2, %v208_v7, -inf }
  0xf0   : > { %234 = vmax.xlane.f32.xlu0 %v215_v9  ;;  %v216_v10 = vrot.slane %v215_v9, 4  ;;  %v211_v11 = vpop.f32.mrb[2].mxu0 }
  0xf1   : > { %v539_v12 = vpop.f32.mrb[3].mxu0 }
  0xf2   : > { %v217_v13 = vmax.f32 %v215_v9, %v216_v10 }
  0xf4   : > { %v218_v14 = vrot.slane %v217_v13, 2 }
  0xf6   : > { %v219_v15 = vmax.f32 %v217_v13, %v218_v14 }
  0xf8   : > { %v220_v16 = vrot.slane %v219_v15, 1 }
  0xfa   : > { %v221_v17 = vmax.f32 %v219_v15, %v220_v16 }
  0xfc   : > { %v222_v18 = vsub.f32 %v208_v7, %v221_v17 }
  0xfe   : > { %v223_v19 = vmul.f32 1.442695, %v222_v18 }
 0x100   : > { %581 = vpow2.f32 %v223_v19 }
 0x10a   : > { %v582_v20 = vpop.eup %581 }
 0x10b   : > { %v225_v21 = vsel %vm214_vm2, %v582_v20, 0.0 }
 0x10c   : > { %v226_v22 = vrot.slane %v225_v21, 4 }
 0x10e   : > { %v227_v23 = vadd.f32 %v226_v22, %v225_v21 }
 0x110   : > { %v228_v24 = vrot.slane %v227_v23, 2 }
 0x112   : > { %v229_v25 = vadd.f32 %v228_v24, %v227_v23 }
 0x114   : > { %v230_v26 = vrot.slane %v229_v25, 1 }
 0x116   : > { %v231_v27 = vadd.f32 %v230_v26, %v229_v25 }
 0x118   : > { %583 = vrcp.f32 %v231_v27 }
 0x122   : > { %v584_v28 = vpop.eup %583 }
 0x123   : > { %v233_v29 = vmul.f32 %v584_v28, %v582_v20 }
 0x125   : > { %v244_v30 = vpack.c.bf16 %v233_v29, %v233_v29 }
 0x127   : > { %543 = vmatmul.mubr.msk.bf16.vlgmr.msra.gmra.mrb[0].mxu1 %vm214_vm2, %v244_v30 }
 0x128   : > { %548 = vmatprep.mubr.msk.bf16.mxu1 %vm598_vm0, %v597_v0  ;;  %547 = vmatpush3.bf16.msra.mxu1 %v310_v36 }
 0x17d   : > { %v235_v31 = vpop.xlane.xlu0 %234 }
 0x17e   : > { %v236_v32 = vsub.f32 %v208_v7, %v235_v31 }
 0x180   : > { %v237_v33 = vmul.f32 1.442695, %v236_v32 }
 0x182   : > { %585 = vpow2.f32 %v237_v33 }
 0x18c   : > { %v586_v34 = vpop.eup %585 }
 0x18d   : > { %v239_v35 = vsel %vm214_vm2, %v586_v34, 0.0 }
 0x18e   : > { %240 = vadd.xlane.f32.xlu0 %v239_v35 }
 0x1a4   : > { %577 = vrot.lane.b32.xlu0 %v576_v48, %s599_s19 }
 0x1fa   : > { %v282_v37 = vpop.f32.mrb[0].mxu1 }
 0x1fb   : > { %v353_v38 = vpack.c.bf16 %v282_v37, %v282_v37  ;;  %v544_v39 = vpop.f32.mrb[1].mxu1 }
 0x1fc   : > { %v285_v40 = vpop.f32.mrb[2].mxu1 }
 0x1fd   : > { %v355_v41 = vsel %vm309_vm3, %v353_v38, 0  ;;  %v545_v42 = vpop.f32.mrb[3].mxu1 }
 0x1fe   : > { %553 = vmatpush3.bf16.msra.mxu0 %v355_v41 }
 0x21b   : > { %v241_v43 = vpop.xlane.xlu0 %240 }
 0x21c   : > { %587 = vrcp.f32 %v241_v43 }
 0x21f   : > { %v578_v58 = vpop.permute.xlu0 %577 }
 0x220   : > { %v580_v60 = vunpack.i.h.bf16 %v578_v58  ;;  %v579_v61 = vunpack.i.l.bf16 %v578_v58 }
 0x226   : > { %v588_v44 = vpop.eup %587 }
 0x227   : > { %v243_v45 = vmul.f32 %v588_v44, %v586_v34 }
 0x229   : > { %v288_v46 = vpack.c.bf16 %v243_v45, %v243_v45 }
 0x22b   : > { %289 = vxpose.xlu1.c.b16.start.end [1/1] (short) (narrow) %v288_v46, 16 }
 0x291   : > { %v297_v47 = vpop.trf.xlu1 }
 0x292   : > { %549 = vmatmul.mubr.msk.bf16.vlgmr.msra.gmra.mrb[4].mxu1 %vm305_vm4, %v297_v47  ;;  %555 = vmatmul.mubr.msk.bf16.vlgmr.msra.gmra.mrb[4].mxu0 %vm305_vm4, %v297_v47 }
 0x365   : > { %v346_v49 = vpop.f32.mrb[4].mxu1  ;;  %v391_v50 = vpop.f32.mrb[4].mxu0 }
 0x366   : > { %v550_v51 = vpop.f32.mrb[5].mxu1  ;;  %v556_v52 = vpop.f32.mrb[5].mxu0 }
 0x367   : > { %v349_v53 = vpop.f32.mrb[6].mxu1  ;;  %v394_v54 = vpop.f32.mrb[6].mxu0 }
 0x368   : > { %v571_v55 = vpack.i.bf16 %v394_v54, %v391_v50  ;;  %v551_v56 = vpop.f32.mrb[7].mxu1  ;;  %v557_v57 = vpop.f32.mrb[7].mxu0 }
 0x36a   : > { %572 = vrot.lane.b32.xlu1 %v571_v55, %s600_s20 }
 0x3dc   : > { %v573_v59 = vpop.permute.xlu1 %572 }
 0x3dd   : > { %v575_v62 = vunpack.i.h.bf16 %v573_v59  ;;  %v574_v63 = vunpack.i.l.bf16 %v573_v59 }
 0x3df   : > { %v415_v0 = vsel %vm167_vm1, %v349_v53, %v575_v62  ;;  %v414_v1 = vsel %vm167_vm1, %v346_v49, %v574_v63 }
 0x3e0   : > { %v417_v2 = vsel %vm416_vm5, %v414_v1, %v579_v61  ;;  %v418_v3 = vsel %vm416_vm5, %v415_v0, %v580_v60 }
 0x3e1   : > { %v420_v4 = vsel %vm419_vm6, %v417_v2, 0.0  ;;  %v421_v5 = vsel %vm419_vm6, %v418_v3, 0.0 }
 0x3e2   : > { %v524_v6 = vpack.c.bf16 %v421_v5, %v420_v4 }
 0x3e4   : > { %525 = vst [vmem:[%s160_s23] sm:$0xff] %v524_v6  }
 0x3e5 PF: > { %s12_s9 = sadd.s32 1, %s595_s9  }
 0x3e6   : > { %p9_p4 = scmp.ge.s32.totalorder %s12_s9, 4  }
 0x3e8   :  { %11 = sbr.rel (!%p9_p4) target bundleno = 1 (0x1), region = 61 }

// kernel: coattention_forward.20
= control target key start
LH: loop header
LB: loop body
LE: loop exit
PB: predicated region body
PF: predicated region fallthrough
CT: control target
= control target key end

     0   :  { %13 = vsyncpa [#allocation3], 0  ;;  %s842_s0 = inlined_call_operand.vmem [shape: f32[16,2,128], index: 0, kind: input, shape index: {}]   ;;  %s843_s1 = inlined_call_operand.vmem [shape: bf16[32,128], index: 1, kind: input, shape index: {}]   ;;  %s844_s2 = inlined_call_operand.vmem [shape: f32[16,2,1], index: 2, kind: input, shape index: {}]   ;;  %s845_s3 = inlined_call_operand.vmem [shape: f32[2,32], index: 3, kind: input, shape index: {}, may-alias: {3,4}]   ;;  %s846_s4 = inlined_call_operand.vmem [shape: f32[2,32], index: 4, kind: input, shape index: {}, may-alias: {3,4}]   ;;  %s847_s5 = inlined_call_operand.vmem [shape: f32[16,2,32], index: 5, kind: output, shape index: {0}]   ;;  %s848_s6 = inlined_call_operand.hbm [shape: f32[2,32], index: 6, kind: output, shape index: {1}]   ;;  %s849_s7 = inlined_call_operand.hbm [shape: f32[2,32], index: 7, kind: output, shape index: {2}]  }
   0x1   :  { %14 = vsyncpa [#allocation5], 0  ;;  %s730_s24 = smov 0  }
   0x2 LB: > { %s736_s25 = sadd.s32 4294967295, %s680_s24   ;;  %p548_p0 = scmp.ge.s32.totalorder %s680_s24, 1  ;;  %s680_s24 = sphi %s730_s24, %s20_s24  }
   0x3   : > { %p242_p1 = scmp.lt.s32.totalorder %s680_s24, 17 }
   0x5   : > { %p243_p2 = pnand %p548_p0, %p242_p1 }
   0x6   : > { %p276_p3 = scmp.lt.s32.totalorder (!%p243_p2), %s736_s25, 15  ;;  %p552_p4 = scmp.ne.s32.totalorder (!%p243_p2), %s736_s25, 0 }
   0x7   : > { %246 = sbr.rel (%p243_p2) target bundleno = 778 (0x30a), region = 40 }
   0xe   : > { %s277_s26 = scalar_select %p276_p3, %s736_s25, 15 }
   0xf   : > { %292 = sbr.rel (%p552_p4) target bundleno = 22 (0x16), region = 44  ;;  %v293_v0 = vld [vmem:[%s845_s3] sm:$0x3] (!%p552_p4)  ;;  %vm294_vm0 = vcmask (!%p552_p4), 254976  }
  0x10   : > { %s742_s27 = sshll.u32 %s277_s26, 1  ;;  %v296_v1 = vld [vmem:[%s846_s4] sm:$0x3] (!%p552_p4)  ;;  %295 = vst.msk [vmem:[#allocation2] sm:$0x3] (!%p552_p4), %vm294_vm0, %v293_v0 }
  0x11   : > { %s279_s30 = scalar_lea.vmem %s842_s0, %s742_s27  ;;  %s283_s10 = scalar_lea.vmem %s844_s2, %s742_s27  ;;  %297 = vst.msk [vmem:[#allocation4] sm:$0x3] (!%p552_p4), %vm294_vm0, %v296_v1 }
  0x12   : > { %s287_s13 = scalar_lea.vmem %s847_s5, %s742_s27 }
  0x16 PF: > { %v604_v2 = vld [vmem:[%s843_s1] sm:$0xff]   ;;  %v682_v3 = vmov 0.0   ;;  %v605_v4 = vld [vmem:[%s843_s1 + $0x8] sm:$0xff]   ;;  %vm683_vm1 = vmmov 0   ;;  %vm318_vm2 = vcmask 261120   ;;  %v684_v7 = vmov 0  }
  0x17   : > { %566 = vmatprep.subr.bf16.mxu0 %v682_v3  ;;  %570 = vmatprep.mubr.msk.bf16.mxu0 %vm683_vm1, %v682_v3  ;;  %v298_v5 = vld [vmem:[#allocation2] sm:$0x3]  ;;  %s685_s22 = smov 64   ;;  %s686_s23 = smov 32   ;;  %vm414_vm3 = vcmask 254976  }
  0x18   : > { %567 = vmatpush3.bf16.msra.mxu0 %v604_v2  ;;  %v301_v6 = vpack.c.bf16 %v298_v5, %v298_v5  ;;  %603 = vset.pattern.permute.xlu0 %v684_v7  ;;  %v300_v8 = vld [vmem:[%s279_s30] sm:$0x3]  ;;  %v299_v15 = vld [vmem:[#allocation4] sm:$0x3]  ;;  %s687_s29 = smov 96   ;;  %s688_s30 = smov [#allocation2]  }
  0x19   : > { %568 = vmatprep.subr.bf16.mxu0 %v682_v3  ;;  %602 = vset.pattern.permute.xlu1 %v684_v7  ;;  %v391_v16 = vld [vmem:[%s283_s10] sm:$0x3]  ;;  %s447_s8 = sshll.u32 %s688_s30, 4  ;;  %s689_s9 = smov [#allocation4]   ;;  %s448_s8 = int_to_ptr.vmem [resolvable:$true] %s447_s8 }
  0x1a   : > { %v398_v23 = vsub.f32 1.0, %v391_v16  ;;  %s458_s10 = sshll.u32 %s689_s9, 4  ;;  %p582_p5 = scmp.eq.s32.totalorder %s736_s25, 15  ;;  %s780_s10 = int_to_ptr.vmem [resolvable:$true] %s458_s10 }
  0x1b   : > { %s614_s11 = scalar_lea.vmem %s448_s8, 32  ;;  %p621_p9 = scmp.lt.s32.totalorder %s448_s8, %s448_s8 }
  0x1c   : > { %569 = vmatpush3.bf16.msra.mxu0 %v605_v4  ;;  %p615_p6 = scmp.ne.s32.totalorder %s448_s8, %s614_s11  ;;  %p622_p10 = scmp.lt.s32.totalorder %s614_s11, %s614_s11 }
  0x1e   : > { %p616_p7 = pnand %p615_p6, %p582_p5  ;;  %p623_p11 = por %p622_p10, %p621_p9 }
  0x1f   : > { %571 = vmatmul.mubr.msk.bf16.vlgmr.msra.gmra.mrb[0].mxu0 %vm318_vm2, %v301_v6 }
  0x20   : > { %p617_p8 = pneg %p616_p7 }
  0x22   : > { %p624_p12 = pnand %p623_p11, %p617_p8 }
  0xf2   : > { %v356_v9 = vpop.f32.mrb[0].mxu0 }
  0xf3   : > { %v362_v10 = vadd.f32 %v356_v9, %v300_v8  ;;  %v572_v11 = vpop.f32.mrb[1].mxu0 }
  0xf4   : > { %v359_v12 = vpop.f32.mrb[2].mxu0 }
  0xf5   : > { %606 = vtanh.f32 %v362_v10  ;;  %v573_v13 = vpop.f32.mrb[3].mxu0  ;;  %v556_v17 = vmul.f32 -1.442695, %v362_v10 }
  0xf7   : > { %608 = vpow2.f32 %v556_v17 }
  0xff   : > { %v607_v14 = vpop.eup %606 }
 0x100   : > { %376 = vrot.lane.b32.xlu0 %v607_v14, %s685_s22 }
 0x101   : > { %v609_v18 = vpop.eup %608 }
 0x102   : > { %v366_v19 = vadd.f32 1.0, %v609_v18 }
 0x104   : > { %371 = vrot.lane.b32.xlu0 %v299_v15, %s686_s23  ;;  %610 = vrcp.f32 %v366_v19 }
 0x108   : > { %394 = vperm.xlu0 %603, %v391_v16  }
 0x10e   : > { %v611_v20 = vpop.eup %610 }
 0x172   : > { %v377_v21 = vpop.permute.xlu0 %376 }
 0x173   : > { %v379_v22 = vmul.f32 %v611_v20, %v377_v21 }
 0x175   : > { %381 = vrot.lane.b32.xlu1 %v379_v22, %s686_s23 }
 0x176   : > { %v372_v24 = vpop.permute.xlu0 %371 }
 0x177   : > { %v374_v25 = vmul.f32 %v611_v20, %v372_v24 }
 0x179   : > { %401 = vperm.xlu1 %602, %v398_v23  }
 0x187   : > { %v395_v34 = vpop.permute.xlu0 %394 }
 0x1e7   : > { %v382_v26 = vpop.permute.xlu1 %381 }
 0x1e8   : > { %v384_v27 = vadd.f32 %v382_v26, %v374_v25 }
 0x1ea   : > { %612 = vtanh.f32 %v384_v27  ;;  %v416_v35 = vmul.f32 %v395_v34, %v384_v27 }
 0x1f4   : > { %v613_v28 = vpop.eup %612 }
 0x1f5   : > { %387 = vrot.lane.b32.xlu1 %v613_v28, %s685_s22 }
 0x1f8   : > { %v402_v29 = vpop.permute.xlu1 %401 }
 0x1f9   : > { %v404_v30 = vmul.f32 %v402_v29, %v298_v5  ;;  %v417_v31 = vmul.f32 %v402_v29, %v299_v15 }
 0x1fb   : > { %419 = vrot.lane.b32.xlu0 %v417_v31, %s686_s23  ;;  %406 = vrot.lane.b32.xlu1 %v404_v30, %s687_s29 }
 0x267   : > { %v388_v32 = vpop.permute.xlu1 %387 }
 0x268   : > { %v390_v33 = vmul.f32 %v611_v20, %v388_v32 }
 0x26a   : > { %v397_v36 = vmul.f32 %v395_v34, %v390_v33 }
 0x26d   : > { %v420_v37 = vpop.permute.xlu0 %419  ;;  %v407_v38 = vpop.permute.xlu1 %406 }
 0x26e   : > { %v422_v39 = vadd.f32 %v420_v37, %v416_v35  ;;  %v409_v40 = vadd.f32 %v407_v38, %v397_v36 }
 0x270   : > { %424 = vrot.lane.b32.xlu0 %v422_v39, %s687_s29  ;;  %411 = vrot.lane.b32.xlu1 %v409_v40, %s686_s23 }
 0x274   : > { %429 = vrot.lane.b32.xlu1 %v397_v36, %s686_s23 }
 0x2e2   : > { %v425_v41 = vpop.permute.xlu0 %424  ;;  %v412_v42 = vpop.permute.xlu1 %411 }
 0x2e3   : > { %415 = vst.msk [vmem:[#allocation2] sm:$0x3] %vm414_vm3, %v412_v42  ;;  %427 = vst.msk [vmem:[#allocation4] sm:$0x3] %vm414_vm3, %v425_v41 }
 0x2e4   : > { %627 = shalt.err (!%p624_p12)
}
 0x2e5   : > { %s628_s15 = scalar_lea.hbm %s848_s6, 32 }
 0x2e6   : > { %p629_p13 = scmp.ne.s32.totalorder %s848_s6, %s628_s15  ;;  %p634_p2 = scmp.lt.u32.totalorder %s628_s15, %s848_s6 }
 0x2e8   : > { %p630_p0 = pnand %p629_p13, %p582_p5 }
 0x2ea   : > { %p631_p1 = pneg %p630_p0 }
 0x2ec   : > { %p636_p3 = pnand %p634_p2, %p631_p1 }
 0x2ee   : > { %639 = shalt.err (!%p636_p3)
}
 0x2ef   : > { %575 = dma.vmem_to_hbm [thread:$0]  (%p582_p5), %s448_s8, 32, %s848_s6, [#allocation3]  }
 0x2f0   : > { %s640_s22 = scalar_lea.vmem %s780_s10, 32  ;;  %p647_p8 = scmp.lt.s32.totalorder %s780_s10, %s780_s10 }
 0x2f1   : > { %p641_p4 = scmp.ne.s32.totalorder %s780_s10, %s640_s22  ;;  %p648_p9 = scmp.lt.s32.totalorder %s640_s22, %s640_s22 }
 0x2f3   : > { %p642_p6 = pnand %p641_p4, %p582_p5  ;;  %p649_p10 = por %p648_p9, %p647_p8 }
 0x2f5   : > { %p643_p7 = pneg %p642_p6 }
 0x2f7   : > { %p650_p11 = pnand %p649_p10, %p643_p7 }
 0x2f9   : > { %653 = shalt.err (!%p650_p11)
}
 0x2fa   : > { %s654_s28 = scalar_lea.hbm %s849_s7, 32 }
 0x2fb   : > { %p655_p12 = scmp.ne.s32.totalorder %s849_s7, %s654_s28  ;;  %p660_p1 = scmp.lt.u32.totalorder %s654_s28, %s849_s7 }
 0x2fd   : > { %p656_p13 = pnand %p655_p12, %p582_p5 }
 0x2ff   : > { %p657_p0 = pneg %p656_p13 }
 0x301   : > { %p662_p2 = pnand %p660_p1, %p657_p0 }
 0x303   : > { %665 = shalt.err (!%p662_p2)
}
 0x304   : > { %577 = dma.vmem_to_hbm [thread:$0]  (%p582_p5), %s780_s10, 32, %s849_s7, [#allocation5]   ;;  %v430_v43 = vpop.permute.xlu1 %429 }
 0x305   : > { %432 = vst.msk [vmem:[%s287_s13] sm:$0x3] %vm414_vm3, %v430_v43 }
 0x306   : > { %671 = dma.done.wait (%p582_p5), [#allocation3], 32  }
 0x307   : > { %673 = vsyncadd (%p582_p5), [#allocation3], 4294967264 }
 0x308   : > { %675 = dma.done.wait (%p582_p5), [#allocation5], 32  }
 0x309   : > { %677 = vsyncadd (%p582_p5), [#allocation5], 4294967264 }
 0x30a PF: > { %s20_s24 = sadd.s32 1, %s680_s24  }
 0x30b   : > { %p17_p3 = scmp.ge.s32.totalorder %s20_s24, 18  }
 0x30d   :  { %19 = sbr.rel (!%p17_p3) target bundleno = 2 (0x2), region = 94 }
 0x314   :  { %482 = vsyncpa [#allocation3], 1 }
 0x315   :  { %484 = vsyncpa [#allocation3 + $0x1], 1 }
 0x316   :  { %485 = vsyncpa [#allocation5], 1 }

// kernel: coattention_forward.19
= control target key start
LH: loop header
LB: loop body
LE: loop exit
PB: predicated region body
PF: predicated region fallthrough
CT: control target
= control target key end

     0   :  { %s275_s1 = inlined_call_operand.vmem [shape: bf16[128,128], index: 1, kind: input, shape index: {}]   ;;  %s276_s0 = inlined_call_operand.vmem [shape: bf16[32,128], index: 0, kind: input, shape index: {}]   ;;  %s277_s2 = inlined_call_operand.vmem [shape: f32[1,128], index: 2, kind: input, shape index: {}]   ;;  %s278_s3 = inlined_call_operand.vmem [shape: f32[32,128], index: 3, kind: output, shape index: {}]  }
   0x1   :  { %v200_v0 = vld [vmem:[%s275_s1] sm:$0xff]   ;;  %v201_v1 = vld [vmem:[%s275_s1 + $0x8] sm:$0xff]   ;;  %v202_v2 = vld [vmem:[%s275_s1 + $0x10] sm:$0xff]  }
   0x2   :  { %180 = vmatprep.subr.bf16.mxu0 %v200_v0  ;;  %v203_v3 = vld [vmem:[%s275_s1 + $0x18] sm:$0xff]   ;;  %v208_v4 = vld [vmem:[%s276_s0] sm:$0xff]   ;;  %v205_v6 = vld [vmem:[%s275_s1 + $0x28] sm:$0xff]  }
   0x3   :  { %181 = vmatpush3.bf16.msra.mxu0 %v200_v0  ;;  %196 = vmatprep.mubr.bf16.mxu0 %v208_v4  ;;  %v204_v5 = vld [vmem:[%s275_s1 + $0x20] sm:$0xff]   ;;  %v206_v7 = vld [vmem:[%s275_s1 + $0x30] sm:$0xff]   ;;  %v207_v8 = vld [vmem:[%s275_s1 + $0x38] sm:$0xff]  }
   0x4   :  { %182 = vmatprep.subr.bf16.mxu0 %v201_v1  ;;  %v209_v9 = vld [vmem:[%s276_s0 + $0x8] sm:$0xff]   ;;  %v159_v10 = vld [vmem:[%s277_s2] ss:$0 sm:$0xff] }
   0x7   :  { %183 = vmatpush3.bf16.msra.mxu0 %v201_v1 }
   0x8   :  { %184 = vmatprep.subr.bf16.mxu0 %v202_v2 }
   0xb   :  { %185 = vmatpush3.bf16.msra.mxu0 %v202_v2 }
   0xc   :  { %186 = vmatprep.subr.bf16.mxu0 %v203_v3 }
   0xf   :  { %187 = vmatpush3.bf16.msra.mxu0 %v203_v3 }
  0x10   :  { %188 = vmatprep.subr.bf16.mxu0 %v204_v5 }
  0x13   :  { %189 = vmatpush3.bf16.msra.mxu0 %v204_v5 }
  0x14   :  { %190 = vmatprep.subr.bf16.mxu0 %v205_v6 }
  0x17   :  { %191 = vmatpush3.bf16.msra.mxu0 %v205_v6 }
  0x18   :  { %192 = vmatprep.subr.bf16.mxu0 %v206_v7 }
  0x1b   :  { %193 = vmatpush3.bf16.msra.mxu0 %v206_v7 }
  0x1c   :  { %194 = vmatprep.subr.bf16.mxu0 %v207_v8 }
  0x1f   :  { %195 = vmatpush3.bf16.msra.mxu0 %v207_v8 }
  0x22   :  { %197 = vmatmul.mubr.bf16.vlgmr.msra.gmra.mrb[0].mxu0 %v209_v9 }
  0xf5   :  { %v198_v11 = vpop.f32.mrb[0].mxu0 }
  0xf6   :  { %v145_v12 = vadd.f32 %v198_v11, %v159_v10  ;;  %v136_v13 = vpop.f32.mrb[1].mxu0 }
  0xf7   :  { %v137_v14 = vadd.f32 %v159_v10, %v136_v13  ;;  %v199_v15 = vpop.f32.mrb[2].mxu0 }
  0xf8   :  { %153 = vst [vmem:[%s278_s3 + $0x10] sm:$0xff] %v145_v12  ;;  %v148_v16 = vadd.f32 %v199_v15, %v159_v10  ;;  %v139_v17 = vpop.f32.mrb[3].mxu0 }
  0xf9   :  { %151 = vst [vmem:[%s278_s3] sm:$0xff] %v137_v14  ;;  %v140_v18 = vadd.f32 %v159_v10, %v139_v17 }
  0xfa   :  { %154 = vst [vmem:[%s278_s3 + $0x18] sm:$0xff] %v148_v16 }
  0xfb   :  { %152 = vst [vmem:[%s278_s3 + $0x8] sm:$0xff] %v140_v18 }

// kernel: coattention_forward.21
= control target key start
LH: loop header
LB: loop body
LE: loop exit
PB: predicated region body
PF: predicated region fallthrough
CT: control target
= control target key end

     0   :  { %19 = vsyncpa [#allocation5], 0  ;;  %s2615_s29 = smov 0   ;;  %s2617_s30 = smov 0   ;;  %s3063_s0 = inlined_call_operand.vmem [shape: s32[2], index: 0, kind: input, shape index: {}]   ;;  %s3064_s1 = inlined_call_operand.vmem [shape: f32[2,16,64], index: 1, kind: input, shape index: {}]   ;;  %s3065_s2 = inlined_call_operand.vmem [shape: bf16[128,96], index: 2, kind: input, shape index: {}]   ;;  %s3066_s3 = inlined_call_operand.vmem [shape: bf16[32,96], index: 3, kind: input, shape index: {}]   ;;  %s3067_s4 = inlined_call_operand.vmem [shape: f32[1,96], index: 4, kind: input, shape index: {}]   ;;  %s3068_s5 = inlined_call_operand.vmem [shape: f32[1,96], index: 5, kind: input, shape index: {}]   ;;  %s3069_s6 = inlined_call_operand.vmem [shape: bf16[2,160,32], index: 6, kind: input, shape index: {}]   ;;  %s3070_s7 = inlined_call_operand.vmem [shape: bf16[2,64,128], index: 7, kind: input, shape index: {}]   ;;  %s3071_s8 = inlined_call_operand.vmem [shape: bf16[2,32,128], index: 8, kind: input, shape index: {}]   ;;  %s3072_s9 = inlined_call_operand.vmem [shape: f32[2,1,128], index: 9, kind: input, shape index: {}]   ;;  %s3073_s10 = inlined_call_operand.vmem [shape: bf16[2,32,128], index: 10, kind: input, shape index: {}]   ;;  %s3074_s11 = inlined_call_operand.vmem [shape: f32[2,1,128], index: 11, kind: input, shape index: {}]   ;;  %s3075_s12 = inlined_call_operand.vmem [shape: bf16[2,64,4], index: 12, kind: input, shape index: {}]   ;;  %s3076_s13 = inlined_call_operand.vmem [shape: f32[2,1,4], index: 13, kind: input, shape index: {}]   ;;  %s3077_s14 = inlined_call_operand.vmem [shape: s32[2,2,128], index: 14, kind: output, shape index: {}]  }
   0x1   :  { %s2619_s15 = smov 0   ;;  %s2621_s16 = smov 0  }
   0x2   :  { %s2623_s17 = smov 0  }
   0x3 LB: > { %s1988_s18 = sadd.s32 4294967295, %s2530_s17   ;;  %s34_s19 = sadd.s32 1, %s2522_s15  ;;  %s2530_s17 = sphi %s2623_s17, %s25_s17   ;;  %s2526_s16 = sphi %s2621_s16, %s3086_s16   ;;  %s2522_s15 = sphi %s2619_s15, %s3085_s15   ;;  %s2518_s30 = sphi %s2617_s30, %s3084_s30   ;;  %s2514_s29 = sphi %s2615_s29, %s3083_s29  }
   0x4   : > { %p35_p0 = scmp.ge.s32.totalorder %s34_s19, 2  ;;  %s37_s20 = sadd.s32 1, %s2526_s16 }
   0x5   : > { %p1990_p1 = scmp.ge.s32.totalorder %s2530_s17, 1  ;;  %p367_p2 = scmp.lt.s32.totalorder %s2530_s17, 5 }
   0x6   : > { %s3088_s19 = smov (%p35_p0, %s34_s19), 0  ;;  %s3090_s20 = smov (!%p35_p0, %s37_s20), %s2526_s16 }
   0x7   : > { %p2648_p3 = pnand %p1990_p1, %p367_p2  ;;  %p39_p4 = scmp.ge.s32.totalorder %s3090_s20, 2 }
   0x8   : > { %p2652_p5 = scmp.eq.s32.totalorder %s1988_s18, 0  ;;  %s380_s25 = sshll.u32 %s3063_s0, 4  ;;  %s381_s25 = int_to_ptr.vmem [resolvable:$true] %s380_s25 }
   0x9   : > { %p2295_p6 = pneg %p2648_p3  ;;  %s3092_s20 = smov (%p39_p4, %s3090_s20), 0 }
   0xa   : > { %s2473_s26 = scalar_lea.vmem %s381_s25, 16  ;;  %p2481_p12 = scmp.lt.s32.totalorder %s381_s25, %s381_s25 }
   0xb   : > { %p2296_p7 = pnand %p2652_p5, %p2295_p6  ;;  %p2474_p8 = scmp.ne.s32.totalorder %s381_s25, %s2473_s26 }
   0xc   : > { %p2482_p13 = scmp.lt.s32.totalorder %s2473_s26, %s2473_s26 }
   0xd   : > { %p2475_p9 = pneg %p2296_p7 }
   0xe   : > { %p2483_p0 = por %p2482_p13, %p2481_p12 }
   0xf   : > { %p2476_p10 = pnand %p2475_p9, %p2474_p8 }
  0x11   : > { %p2477_p11 = pneg %p2476_p10 }
  0x13   : > { %p2484_p1 = pnand %p2483_p0, %p2477_p11 }
  0x15   : > { %2487 = shalt.err (!%p2484_p1)
}
  0x16   : > { %s2532_s27 = smov [#allocation4]   ;;  %437 = sbr.rel (%p2648_p3) target bundleno = 3793 (0xed1), region = 76 }
  0x17   : > { %2298 = dma.vmem_to_smem (!%p2296_p7), %s381_s25, 16, %s2532_s27, [#allocation5]  }
  0x1d   : > { %2509 = dma.done.wait (%p2652_p5), [#allocation5], 16  }
  0x1e   : > { %2511 = vsyncadd (%p2652_p5), [#allocation5], 4294967280 }
  0x1f   : > { %443 = sfence }
  0x20   : > { %p483_p2 = scmp.lt.s32.totalorder %s2518_s30, 1  ;;  %v493_v0 = vlaneseq  ;;  %p1998_p3 = scmp.ne.s32.totalorder %s2514_s29, 0 }
  0x21   : > { %vm503_vm0 = vcmask (!%p1998_p3), 253952   ;;  %v2533_v6 = vmov (!%p1998_p3), 0.0   ;;  %vm513_vm2 = vcmask (!%p1998_p3), 523264   ;;  %vm523_vm5 = vcmask (!%p1998_p3), 516096  }
  0x22   : > { %s484_s28 = scalar_select %p483_p2, %s2518_s30, 1  ;;  %v2673_v1 = vshrl.u32 %v493_v0, 7 }
  0x23   : > { %502 = sbr.rel (%p1998_p3) target bundleno = 63 (0x3f), region = 84  ;;  %504 = vst.msk [vmem:[#allocation2] sm:$0x1] (!%p1998_p3), %vm503_vm0, %v2533_v6 }
  0x24   : > { %s2120_s18 = sshll.u32 %s484_s28, 4  ;;  %s1997_s23 = sshll.u32 %s484_s28, 1  ;;  %v2676_v2 = vadd.s32 8, %v2673_v1  ;;  %vm505_vm1 = vcmp.eq.s32.totalorder (!%p1998_p3), %v2673_v1, 0 }
  0x25   : > { %s487_s25 = scalar_lea.vmem %s3064_s1, %s2120_s18  ;;  %s2684_s27 = scalar_lea.vmem %s3077_s14, %s1997_s23 }
  0x26   : > { %v2686_v3 = vld [vmem:[%s487_s25] sm:$0xff]  ;;  %v2688_v4 = vld [vmem:[%s487_s25 + $0x8] sm:$0xff]  ;;  %s525_s28 = sld [smem:[#allocation4 + %s2518_s30]] (!%p1998_p3) }
  0x27   : > { %v2692_v5 = vpack.c.bf16 %v2688_v4, %v2686_v3  ;;  %v511_v7 = vsel (!%p1998_p3), %vm505_vm1, %v2686_v3, 0.0 }
  0x28   : > { %v514_v8 = vsel (!%p1998_p3), %vm513_vm2, %v511_v7, 0.0 }
  0x29   : > { %v517_v9 = vrot.slane (!%p1998_p3), %v514_v8, 4 }
  0x2b   : > { %v518_v10 = vadd.f32 %v517_v9, %v514_v8 }
  0x2c   : > { %v526_v11 = vstv %s525_s28 }
  0x2d   : > { %v519_v12 = vrot.slane %v518_v10, 2  ;;  %vm527_vm3 = vcmp.eq.s32.totalorder %v2673_v1, %v526_v11  ;;  %vm528_vm4 = vcmp.eq.s32.totalorder %v2676_v2, %v526_v11 }
  0x2e   : > { %v533_v13 = vsel %vm527_vm3, %v2686_v3, 0.0  ;;  %v534_v14 = vsel %vm528_vm4, %v2688_v4, 0.0 }
  0x2f   : > { %v520_v15 = vadd.f32 %v519_v12, %v518_v10  ;;  %v535_v16 = vsel %vm513_vm2, %v533_v13, 0.0  ;;  %v536_v17 = vsel %vm513_vm2, %v534_v14, 0.0 }
  0x30   : > { %v537_v18 = vadd.f32 %v536_v17, %v535_v16 }
  0x31   : > { %v521_v19 = vrot.slane %v520_v15, 1 }
  0x32   : > { %v538_v20 = vrot.slane %v537_v18, 4 }
  0x33   : > { %v522_v21 = vadd.f32 %v521_v19, %v520_v15 }
  0x34   : > { %v539_v22 = vadd.f32 %v538_v20, %v537_v18 }
  0x35   : > { %524 = vst.msk [vmem:[#allocation3] sm:$0x1] %vm523_vm5, %v522_v21 }
  0x36   : > { %v540_v23 = vrot.slane %v539_v22, 2 }
  0x38   : > { %v541_v24 = vadd.f32 %v540_v23, %v539_v22 }
  0x3a   : > { %v542_v25 = vrot.slane %v541_v24, 1 }
  0x3c   : > { %v543_v26 = vadd.f32 %v542_v25, %v541_v24 }
  0x3e   : > { %544 = vst.msk [vmem:[#allocation3 + $0x1] sm:$0x1] %vm523_vm5, %v543_v26 }
  0x3f PF: > { %s3078_s29 = smov 64   ;;  %v2535_v28 = vmov 0.0   ;;  %v2409_v29 = vld [vmem:[%s3066_s3] sm:$0xff]   ;;  %v2410_v30 = vld [vmem:[%s3066_s3 + $0x8] sm:$0xff]   ;;  %vm2536_vm6 = vmmov 0   ;;  %vm678_vm7 = vcmask 261120  }
  0x40   : > { %2187 = vmatprep.subr.bf16.mxu1 %v2535_v28  ;;  %2191 = vmatprep.mubr.msk.bf16.mxu1 %vm2536_vm6, %v2535_v28  ;;  %v553_v31 = vld [vmem:[#allocation2] sm:$0x1]  ;;  %v2412_v33 = vld [vmem:[%s3065_s2 + $0x8] sm:$0xff]   ;;  %v2413_v35 = vld [vmem:[%s3065_s2 + $0x10] sm:$0xff]   ;;  %vm551_vm8 = vcmask 523264   ;;  %v2759_v46 = vsub.s32 0, %v2673_v1 }
  0x41   : > { %2167 = vmatprep.subr.bf16.mxu0 %v2535_v28  ;;  %2188 = vmatpush3.bf16.msra.mxu1 %v2409_v29  ;;  %v2411_v32 = vld [vmem:[%s3065_s2] sm:$0xff]   ;;  %v660_v34 = vpack.c.bf16 %v553_v31, %v553_v31  ;;  %v2414_v36 = vld [vmem:[%s3065_s2 + $0x18] sm:$0xff]   ;;  %v2416_v38 = vld [vmem:[%s3065_s2 + $0x28] sm:$0xff]   ;;  %s2537_s24 = smov 32   ;;  %v2538_v14 = vmov 0   ;;  %s2539_s25 = smov 96  }
  0x42   : > { %2183 = vmatprep.mubr.msk.bf16.mxu0 %vm2536_vm6, %v2535_v28  ;;  %2189 = vmatprep.subr.bf16.mxu1 %v2535_v28  ;;  %v2415_v37 = vld [vmem:[%s3065_s2 + $0x20] sm:$0xff]   ;;  %v2417_v39 = vld [vmem:[%s3065_s2 + $0x30] sm:$0xff]   ;;  %v2418_v40 = vld [vmem:[%s3065_s2 + $0x38] sm:$0xff]   ;;  %v750_v51 = vrot.slane %v553_v31, %v2759_v46  ;;  %vm760_vm9 = vcmask 253952   ;;  %vm1281_vm10 = vcmask 31744   ;;  %vm1331_vm3 = vcmask 516096  }
  0x43   : > { %2168 = vmatpush3.bf16.msra.mxu0 %v2411_v32  ;;  %v545_v41 = vld [vmem:[#allocation3] sm:$0x1]  ;;  %v665_v45 = vld [vmem:[%s3068_s5] sm:$0x1]  ;;  %v2420_v15 = vld [vmem:[%s3069_s6 + $0x8] sm:$0xff]   ;;  %s3082_s21 = smov 64  }
  0x44   : > { %2169 = vmatprep.subr.bf16.mxu0 %v2535_v28  ;;  %v571_v53 = vld [vmem:[%s3067_s4] sm:$0x1]  ;;  %v2421_v16 = vld [vmem:[%s3069_s6 + $0x10] sm:$0xff]   ;;  %v2422_v18 = vld [vmem:[%s3069_s6 + $0x18] sm:$0xff]  }
  0x45   : > { %v546_v27 = vld [vmem:[#allocation3 + $0x1] sm:$0x1]  ;;  %2190 = vmatpush3.bf16.msra.mxu1 %v2410_v30  ;;  %v2424_v20 = vld [vmem:[%s3069_s6 + $0x28] sm:$0xff]   ;;  %v2425_v21 = vld [vmem:[%s3069_s6 + $0x30] sm:$0xff]  }
  0x46   : > { %548 = vrot.lane.b32.xlu0 %v546_v27, %s3078_s29  ;;  %v2419_v13 = vld [vmem:[%s3069_s6] sm:$0xff]   ;;  %852 = vmatprep.subr.bf16.mxu1 %v2538_v14  ;;  %v2426_v22 = vld [vmem:[%s3069_s6 + $0x38] sm:$0xff]   ;;  %v2428_v24 = vld [vmem:[%s3069_s6 + $0x48] sm:$0xff]  }
  0x47   : > { %2170 = vmatpush3.bf16.msra.mxu0 %v2412_v33  ;;  %v2423_v19 = vld [vmem:[%s3069_s6 + $0x20] sm:$0xff]  }
  0x48   : > { %2192 = vmatmul.mubr.msk.bf16.vlgmr.msra.gmra.mrb[0].mxu1 %vm678_vm7, %v660_v34  ;;  %2171 = vmatprep.subr.bf16.mxu0 %v2535_v28  ;;  %v2427_v23 = vld [vmem:[%s3069_s6 + $0x40] sm:$0xff]   ;;  %v2430_v34 = vld [vmem:[%s3071_s8 + $0x8] sm:$0xff]  }
  0x49   : > { %853 = vmatpush1.bf16.msra.mxu1 %v2419_v13  ;;  %v2429_v33 = vld [vmem:[%s3071_s8] sm:$0xff]  }
  0x4a   : > { %854 = vmatprep.subr.bf16.mxu1 %v2538_v14 }
  0x4b   : > { %2172 = vmatpush3.bf16.msra.mxu0 %v2413_v35 }
  0x4c   : > { %2173 = vmatprep.subr.bf16.mxu0 %v2535_v28 }
  0x4d   : > { %855 = vmatpush1.bf16.msra.mxu1 %v2420_v15 }
  0x4e   : > { %856 = vmatprep.subr.bf16.mxu1 %v2538_v14 }
  0x4f   : > { %2174 = vmatpush3.bf16.msra.mxu0 %v2414_v36 }
  0x50   : > { %2175 = vmatprep.subr.bf16.mxu0 %v2535_v28 }
  0x51   : > { %857 = vmatpush1.bf16.msra.mxu1 %v2421_v16 }
  0x52   : > { %858 = vmatprep.subr.bf16.mxu1 %v2538_v14 }
  0x53   : > { %2176 = vmatpush3.bf16.msra.mxu0 %v2415_v37 }
  0x54   : > { %2177 = vmatprep.subr.bf16.mxu0 %v2535_v28 }
  0x55   : > { %859 = vmatpush1.bf16.msra.mxu1 %v2422_v18 }
  0x56   : > { %860 = vmatprep.subr.bf16.mxu1 %v2538_v14 }
  0x57   : > { %2178 = vmatpush3.bf16.msra.mxu0 %v2416_v38 }
  0x58   : > { %2179 = vmatprep.subr.bf16.mxu0 %v2535_v28 }
  0x59   : > { %861 = vmatpush1.bf16.msra.mxu1 %v2423_v19 }
  0x5a   : > { %862 = vmatprep.subr.bf16.mxu1 %v2538_v14 }
  0x5b   : > { %2180 = vmatpush3.bf16.msra.mxu0 %v2417_v39 }
  0x5c   : > { %2181 = vmatprep.subr.bf16.mxu0 %v2535_v28 }
  0x5d   : > { %863 = vmatpush1.bf16.msra.mxu1 %v2424_v20  ;;  %v2437_v20 = vld [vmem:[%s3075_s12] sm:$0xff]  }
  0x5e   : > { %864 = vmatprep.subr.bf16.mxu1 %v2538_v14 }
  0x5f   : > { %2182 = vmatpush3.bf16.msra.mxu0 %v2418_v40  ;;  %v2431_v40 = vld [vmem:[%s3070_s7] sm:$0xff]  }
  0x60   : > { %2195 = vmatprep.subr.bf16.mxu0 %v2535_v28 }
  0x61   : > { %865 = vmatpush1.bf16.msra.mxu1 %v2425_v21 }
  0x62   : > { %866 = vmatprep.subr.bf16.mxu1 %v2538_v14 }
  0x65   : > { %867 = vmatpush1.bf16.msra.mxu1 %v2426_v22  ;;  %v2438_v22 = vld [vmem:[%s3075_s12 + $0x8] sm:$0xff]  }
  0x66   : > { %868 = vmatprep.subr.bf16.mxu1 %v2538_v14 }
  0x69   : > { %869 = vmatpush1.bf16.msra.mxu1 %v2427_v23  ;;  %v2439_v23 = vld [vmem:[%s3075_s12 + $0x10] sm:$0xff]  }
  0x6a   : > { %870 = vmatprep.subr.bf16.mxu1 %v2538_v14 }
  0x6d   : > { %871 = vmatpush1.bf16.msra.mxu1 %v2428_v24  ;;  %v2440_v24 = vld [vmem:[%s3075_s12 + $0x18] sm:$0xff]  }
  0x6e   : > { %2215 = vmatprep.subr.bf16.mxu1 %v2535_v28 }
  0xb8   : > { %v2749_v42 = vpop.permute.xlu0 %548 }
  0xb9   : > { %v552_v43 = vsel %vm551_vm8, %v545_v41, %v2749_v42 }
  0xba   : > { %v554_v44 = vpack.c.bf16 %v552_v43, %v552_v43 }
  0xbc   : > { %2184 = vmatmul.mubr.bf16.vlgmr.msra.gmra.mrb[0].mxu0 %v554_v44  ;;  %v2433_v44 = vld [vmem:[%s3070_s7 + $0x10] sm:$0xff]  }
  0xbd   : > { %2199 = vmatprep.mubr.msk.bf16.mxu0 %vm2536_vm6, %v2535_v28  ;;  %2196 = vmatpush3.bf16.msra.mxu0 %v2429_v33 }
  0xbe   : > { %2197 = vmatprep.subr.bf16.mxu0 %v2535_v28 }
  0xc1   : > { %2198 = vmatpush3.bf16.msra.mxu0 %v2430_v34 }
  0xc2   : > { %2203 = vmatprep.subr.bf16.mxu0 %v2535_v28 }
 0x11b   : > { %v716_v47 = vpop.f32.mrb[0].mxu1 }
 0x11c   : > { %v717_v48 = vadd.f32 %v716_v47, %v665_v45  ;;  %v2193_v49 = vpop.f32.mrb[1].mxu1  ;;  %v2434_v45 = vld [vmem:[%s3070_s7 + $0x18] sm:$0xff]  }
 0x11d   : > { %v719_v50 = vpop.f32.mrb[2].mxu1 }
 0x11e   : > { %730 = vrot.lane.b32.xlu0 %v717_v48, %s3078_s29  ;;  %v2194_v52 = vpop.f32.mrb[3].mxu1 }
 0x122   : > { %751 = vrot.lane.b32.xlu0 %v750_v51, %s2537_s24  ;;  %v898_v51 = vld [vmem:[%s3072_s9] sm:$0x1] }
 0x126   : > { %763 = vrot.lane.b32.xlu0 %v552_v43, %s2537_s24  ;;  %v2432_v43 = vld [vmem:[%s3070_s7 + $0x8] sm:$0xff]  }
 0x18f   : > { %v654_v54 = vpop.f32.mrb[0].mxu0 }
 0x190   : > { %v655_v55 = vadd.f32 %v654_v54, %v571_v53  ;;  %v2185_v56 = vpop.f32.mrb[1].mxu0  ;;  %v731_v61 = vpop.permute.xlu0 %730  ;;  %v2435_v53 = vld [vmem:[%s3073_s10] sm:$0xff]  }
 0x191   : > { %v657_v57 = vpop.f32.mrb[2].mxu0 }
 0x192   : > { %v722_v58 = vadd.f32 %v717_v48, %v655_v55  ;;  %v2186_v59 = vpop.f32.mrb[3].mxu0 }
 0x194   : > { %v2010_v60 = vmul.f32 -1.442695, %v722_v58  ;;  %v752_v62 = vpop.permute.xlu0 %751 }
 0x196   : > { %2463 = vpow2.f32 %v2010_v60 }
 0x198   : > { %v764_v63 = vpop.permute.xlu0 %763 }
 0x199   : > { %v768_v6 = vpack.c.bf16 %v764_v63, %v764_v63 }
 0x19b   : > { %2021 = vmatprep.mubr.msk.bf16.mxu1 %vm678_vm7, %v768_v6 }
 0x1a0   : > { %v2464_v0 = vpop.eup %2463 }
 0x1a1   : > { %v726_v7 = vadd.f32 1.0, %v2464_v0 }
 0x1a3   : > { %2465 = vrcp.f32 %v726_v7 }
 0x1ad   : > { %v2466_v8 = vpop.eup %2465 }
 0x1ae   : > { %v733_v9 = vmul.f32 %v2466_v8, %v731_v61  ;;  %v754_v10 = vmul.f32 %v2466_v8, %v752_v62  ;;  %v740_v25 = vsub.f32 1.0, %v2466_v8 }
 0x1b0   : > { %735 = vrot.lane.b32.xlu1 %v733_v9, %s3078_s29 }
 0x222   : > { %v736_v11 = vpop.permute.xlu1 %735 }
 0x223   : > { %v738_v12 = vadd.f32 %v736_v11, %v655_v55  ;;  %v2436_v55 = vld [vmem:[%s3073_s10 + $0x8] sm:$0xff]  }
 0x225   : > { %2467 = vtanh.f32 %v738_v12 }
 0x22f   : > { %v2468_v17 = vpop.eup %2467 }
 0x230   : > { %742 = vrot.lane.b32.xlu1 %v2468_v17, %s2539_s25 }
 0x2a2   : > { %v743_v26 = vpop.permute.xlu1 %742 }
 0x2a3   : > { %v745_v27 = vmul.f32 %v743_v26, %v740_v25  ;;  %v2030_v25 = vld [vmem:[%s3074_s11] ss:$0 sm:$0xff] }
 0x2a5   : > { %v755_v29 = vadd.f32 %v754_v10, %v745_v27 }
 0x2a7   : > { %757 = vrot.lane.b32.xlu1 %v755_v29, %s2539_s25 }
 0x319   : > { %v2813_v30 = vpop.permute.xlu1 %757 }
 0x31a   : > { %761 = vst.msk [vmem:[#allocation2] sm:$0x1] %vm760_vm9, %v2813_v30  ;;  %v766_v31 = vsel %vm678_vm7, %v2813_v30, %v764_v63 }
 0x31b   : > { %v767_v32 = vpack.c.bf16 %v766_v31, %v766_v31 }
 0x31d   : > { %885 = vmatmul.mubr.bf16.vlgmr.msra.gmra.mrb[4].mxu1 %v767_v32 }
 0x31e   : > { %2219 = vmatprep.mubr.msk.bf16.mxu1 %vm2536_vm6, %v2535_v28  ;;  %2216 = vmatpush3.bf16.msra.mxu1 %v2435_v53 }
 0x31f   : > { %2217 = vmatprep.subr.bf16.mxu1 %v2535_v28 }
 0x322   : > { %2218 = vmatpush3.bf16.msra.mxu1 %v2436_v55 }
 0x323   : > { %2231 = vmatprep.subr.bf16.mxu1 %v2535_v28 }
 0x3f0   : > { %v886_v35 = vpop.f32.mrb[4].mxu1 }
 0x3f1   : > { %2469 = vtanh.f32 %v886_v35  ;;  %v888_v36 = vpop.f32.mrb[5].mxu1 }
 0x3f2   : > { %v889_v37 = vpop.f32.mrb[6].mxu1 }
 0x3f3   : > { %v890_v38 = vpop.f32.mrb[7].mxu1 }
 0x3fb   : > { %v2470_v39 = vpop.eup %2469 }
 0x3fc   : > { %v893_v41 = vpack.c.bf16 %v2470_v39, %v2470_v39 }
 0x3fe   : > { %2200 = vmatmul.mubr.msk.bf16.vlgmr.msra.gmra.mrb[4].mxu0 %vm678_vm7, %v893_v41 }
 0x3ff   : > { %2204 = vmatpush3.bf16.msra.mxu0 %v2431_v40  ;;  %2211 = vmatprep.mubr.msk.bf16.mxu0 %vm2536_vm6, %v2535_v28 }
 0x400   : > { %2205 = vmatprep.subr.bf16.mxu0 %v2535_v28 }
 0x403   : > { %2206 = vmatpush3.bf16.msra.mxu0 %v2432_v43 }
 0x404   : > { %2207 = vmatprep.subr.bf16.mxu0 %v2535_v28 }
 0x407   : > { %2208 = vmatpush3.bf16.msra.mxu0 %v2433_v44 }
 0x408   : > { %2209 = vmatprep.subr.bf16.mxu0 %v2535_v28 }
 0x40b   : > { %2210 = vmatpush3.bf16.msra.mxu0 %v2434_v45 }
 0x40c   : > { %2223 = vmatprep.subr.bf16.mxu0 %v2535_v28 }
 0x40e   : > { %2212 = vmatmul.mubr.msk.bf16.vlgmr.msra.gmra.mrb[8].mxu0 %vm551_vm8, %v2692_v5 }
 0x40f   : > { %2227 = vmatprep.mubr.msk.bf16.mxu0 %vm2536_vm6, %v2535_v28  ;;  %2224 = vmatpush3.bf16.msra.mxu0 %v2439_v23  ;;  %v2445_v23 = vld [vmem:[%s3069_s6 + $0x70] sm:$0xff]  }
 0x410   : > { %2225 = vmatprep.subr.bf16.mxu0 %v2535_v28 }
 0x413   : > { %2226 = vmatpush3.bf16.msra.mxu0 %v2440_v24  ;;  %v2446_v24 = vld [vmem:[%s3069_s6 + $0x78] sm:$0xff]  }
 0x414   : > { %1425 = vmatprep.subr.bf16.mxu0 %v2538_v14 }
 0x4d1   : > { %v948_v47 = vpop.f32.mrb[4].mxu0 }
 0x4d2   : > { %v2201_v48 = vpop.f32.mrb[5].mxu0  ;;  %v949_v52 = vadd.f32 %v948_v47, %v898_v51 }
 0x4d3   : > { %v951_v49 = vpop.f32.mrb[6].mxu0 }
 0x4d4   : > { %v2202_v50 = vpop.f32.mrb[7].mxu0  ;;  %v965_v54 = vrot.slane %v949_v52, %v2759_v46 }
 0x4e1   : > { %v1027_v56 = vpop.f32.mrb[8].mxu0 }
 0x4e2   : > { %v1028_v57 = vadd.f32 %v1027_v56, %v965_v54  ;;  %v2213_v58 = vpop.f32.mrb[9].mxu0 }
 0x4e3   : > { %v1030_v59 = vpop.f32.mrb[10].mxu0  ;;  %v2040_v58 = vld [vmem:[%s3076_s13] ss:$0 sm:$0xff] }
 0x4e4   : > { %v1031_v60 = vadd.f32 %v1030_v59, %v965_v54  ;;  %v2214_v61 = vpop.f32.mrb[11].mxu0 }
 0x4e6   : > { %v2354_v62 = vpack.i.bf16 %v1031_v60, %v1028_v57 }
 0x4e8   : > { %2355 = vrot.lane.b32.xlu0 %v2354_v62, %s3078_s29  ;;  %2350 = vrot.lane.b32.xlu1 %v2354_v62, %s2539_s25 }
 0x4ec   : > { %2360 = vrot.lane.b32.xlu1 %v2354_v62, %s2537_s24 }
 0x55a   : > { %v2356_v63 = vpop.permute.xlu0 %2355  ;;  %v2351_v0 = vpop.permute.xlu1 %2350 }
 0x55b   : > { %v2353_v6 = vunpack.i.h.bf16 %v2351_v0  ;;  %v2352_v7 = vunpack.i.l.bf16 %v2351_v0  ;;  %v2358_v8 = vunpack.i.h.bf16 %v2356_v63  ;;  %v2357_v9 = vunpack.i.l.bf16 %v2356_v63 }
 0x55d   : > { %v1043_v10 = vmax.f32 %v1031_v60, %v2353_v6  ;;  %v1042_v11 = vmax.f32 %v1028_v57, %v2352_v7 }
 0x55e   : > { %v2361_v12 = vpop.permute.xlu1 %2360 }
 0x55f   : > { %v2363_v13 = vunpack.i.h.bf16 %v2361_v12  ;;  %v2362_v15 = vunpack.i.l.bf16 %v2361_v12  ;;  %v1050_v16 = vmax.f32 %v1042_v11, %v2357_v9  ;;  %v1051_v17 = vmax.f32 %v1043_v10, %v2358_v8 }
 0x561   : > { %v1058_v18 = vmax.f32 %v1050_v16, %v2362_v15  ;;  %v1059_v19 = vmax.f32 %v1051_v17, %v2363_v13 }
 0x563   : > { %v1060_v21 = vpack.c.bf16 %v1059_v19, %v1058_v18  ;;  %v2441_v19 = vld [vmem:[%s3069_s6 + $0x50] sm:$0xff]  }
 0x565   : > { %2220 = vmatmul.mubr.msk.bf16.vlgmr.msra.gmra.mrb[8].mxu1 %vm678_vm7, %v1060_v21 }
 0x566   : > { %2232 = vmatpush3.bf16.msra.mxu1 %v2437_v20  ;;  %2235 = vmatprep.mubr.msk.bf16.mxu1 %vm2536_vm6, %v2535_v28  ;;  %v2442_v20 = vld [vmem:[%s3069_s6 + $0x58] sm:$0xff]  }
 0x567   : > { %2233 = vmatprep.subr.bf16.mxu1 %v2535_v28 }
 0x56a   : > { %2234 = vmatpush3.bf16.msra.mxu1 %v2438_v22  ;;  %v2444_v22 = vld [vmem:[%s3069_s6 + $0x68] sm:$0xff]  }
 0x56b   : > { %2239 = vmatprep.subr.bf16.mxu1 %v2535_v28 }
 0x56d   : > { %2236 = vmatmul.mubr.msk.bf16.vlgmr.msra.gmra.mrb[12].mxu1 %vm678_vm7, %v1060_v21  ;;  %v2443_v21 = vld [vmem:[%s3069_s6 + $0x60] sm:$0xff]  }
 0x56e   : > { %2243 = vmatprep.mubr.msk.bf16.mxu1 %vm2536_vm6, %v2535_v28 }
 0x638   : > { %v1121_v26 = vpop.f32.mrb[8].mxu1 }
 0x639   : > { %v2221_v27 = vpop.f32.mrb[9].mxu1  ;;  %v1122_v31 = vadd.f32 %v2030_v25, %v1121_v26  ;;  %v2448_v26 = vld [vmem:[%s3069_s6 + $0x88] sm:$0xff]  }
 0x63a   : > { %v1124_v29 = vpop.f32.mrb[10].mxu1  ;;  %v2449_v27 = vld [vmem:[%s3069_s6 + $0x90] sm:$0xff]  }
 0x63b   : > { %v1125_v32 = vadd.f32 %v2030_v25, %v1124_v29  ;;  %v2222_v33 = vpop.f32.mrb[11].mxu1  ;;  %v2447_v25 = vld [vmem:[%s3069_s6 + $0x80] sm:$0xff]  }
 0x63d   : > { %v2369_v34 = vpack.i.bf16 %v1125_v32, %v1122_v31 }
 0x63f   : > { %2370 = vrot.lane.b32.xlu1 %v2369_v34, %s3078_s29  ;;  %2365 = vrot.lane.b32.xlu0 %v2369_v34, %s2539_s25 }
 0x640   : > { %v1265_v35 = vpop.f32.mrb[12].mxu1 }
 0x641   : > { %v2237_v36 = vpop.f32.mrb[13].mxu1 }
 0x642   : > { %v1268_v37 = vpop.f32.mrb[14].mxu1 }
 0x643   : > { %2375 = vrot.lane.b32.xlu0 %v2369_v34, %s2537_s24  ;;  %v2238_v38 = vpop.f32.mrb[15].mxu1 }
 0x6b1   : > { %v2371_v39 = vpop.permute.xlu1 %2370  ;;  %v2366_v40 = vpop.permute.xlu0 %2365 }
 0x6b2   : > { %v2368_v41 = vunpack.i.h.bf16 %v2366_v40  ;;  %v2367_v43 = vunpack.i.l.bf16 %v2366_v40  ;;  %v2373_v44 = vunpack.i.h.bf16 %v2371_v39  ;;  %v2372_v45 = vunpack.i.l.bf16 %v2371_v39 }
 0x6b4   : > { %v1137_v47 = vmax.f32 %v1125_v32, %v2368_v41  ;;  %v1136_v48 = vmax.f32 %v1122_v31, %v2367_v43 }
 0x6b5   : > { %v2376_v49 = vpop.permute.xlu0 %2375 }
 0x6b6   : > { %v2378_v50 = vunpack.i.h.bf16 %v2376_v49  ;;  %v2377_v51 = vunpack.i.l.bf16 %v2376_v49  ;;  %v1144_v52 = vmax.f32 %v1136_v48, %v2372_v45  ;;  %v1145_v53 = vmax.f32 %v1137_v47, %v2373_v44  ;;  %v2450_v47 = vld [vmem:[%s3069_s6 + $0x98] sm:$0xff]  }
 0x6b8   : > { %v1152_v54 = vmax.f32 %v1144_v52, %v2377_v51  ;;  %v1153_v55 = vmax.f32 %v1145_v53, %v2378_v50 }
 0x6ba   : > { %v1162_v56 = vpack.c.bf16 %v1153_v55, %v1152_v54 }
 0x6bc   : > { %2228 = vmatmul.mubr.msk.bf16.vlgmr.msra.gmra.mrb[12].mxu0 %vm678_vm7, %v1162_v56 }
 0x6bd   : > { %1426 = vmatpush1.bf16.msra.mxu0 %v2441_v19 }
 0x6be   : > { %1427 = vmatprep.subr.bf16.mxu0 %v2538_v14 }
 0x6c1   : > { %1428 = vmatpush1.bf16.msra.mxu0 %v2442_v20 }
 0x6c2   : > { %1429 = vmatprep.subr.bf16.mxu0 %v2538_v14 }
 0x6c5   : > { %1430 = vmatpush1.bf16.msra.mxu0 %v2443_v21 }
 0x6c6   : > { %1431 = vmatprep.subr.bf16.mxu0 %v2538_v14 }
 0x6c9   : > { %1432 = vmatpush1.bf16.msra.mxu0 %v2444_v22  ;;  %v2459_v22 = vld [vmem:[%s3073_s10 + $0x18] sm:$0xff]  }
 0x6ca   : > { %1433 = vmatprep.subr.bf16.mxu0 %v2538_v14 }
 0x6cd   : > { %1434 = vmatpush1.bf16.msra.mxu0 %v2445_v23  ;;  %v2460_v23 = vld [vmem:[%s3075_s12 + $0x28] sm:$0xff]  }
 0x6ce   : > { %1435 = vmatprep.subr.bf16.mxu0 %v2538_v14 }
 0x6d1   : > { %1436 = vmatpush1.bf16.msra.mxu0 %v2446_v24 }
 0x6d2   : > { %1437 = vmatprep.subr.bf16.mxu0 %v2538_v14 }
 0x6d5   : > { %1438 = vmatpush1.bf16.msra.mxu0 %v2447_v25 }
 0x6d6   : > { %1439 = vmatprep.subr.bf16.mxu0 %v2538_v14 }
 0x6d9   : > { %1440 = vmatpush1.bf16.msra.mxu0 %v2448_v26 }
 0x6da   : > { %1441 = vmatprep.subr.bf16.mxu0 %v2538_v14 }
 0x6dd   : > { %1442 = vmatpush1.bf16.msra.mxu0 %v2449_v27 }
 0x6de   : > { %1443 = vmatprep.subr.bf16.mxu0 %v2538_v14 }
 0x6e1   : > { %1444 = vmatpush1.bf16.msra.mxu0 %v2450_v47  ;;  %v2461_v47 = vld [vmem:[%s3075_s12 + $0x30] sm:$0xff]  }
 0x6e2   : > { %2275 = vmatprep.subr.bf16.mxu0 %v2535_v28 }
 0x78f   : > { %v1212_v57 = vpop.f32.mrb[12].mxu0 }
 0x790   : > { %v1266_v59 = vadd.f32 %v1265_v35, %v1212_v57  ;;  %v2229_v60 = vpop.f32.mrb[13].mxu0 }
 0x791   : > { %v1215_v61 = vpop.f32.mrb[14].mxu0 }
 0x792   : > { %v1269_v62 = vadd.f32 %v1268_v37, %v1215_v61  ;;  %v2230_v63 = vpop.f32.mrb[15].mxu0  ;;  %v1279_v0 = vadd.f32 %v2040_v58, %v1266_v59  ;;  %v2452_v59 = vld [vmem:[%s3071_s8 + $0x18] sm:$0xff]  }
 0x794   : > { %v1282_v6 = vsel %vm1281_vm10, %v1279_v0, -inf  ;;  %v1280_v7 = vadd.f32 %v2040_v58, %v1269_v62  ;;  %v2453_v0 = vld [vmem:[%s3070_s7 + $0x20] sm:$0xff]  }
 0x795   : > { %1283 = vmax.xlane.f32.xlu1 %v1282_v6 }
 0x796   : > { %v1285_v8 = vsel %vm1281_vm10, %v1280_v7, -inf  ;;  %v2454_v7 = vld [vmem:[%s3070_s7 + $0x28] sm:$0xff]  }
 0x797   : > { %1286 = vmax.xlane.f32.xlu0 %v1285_v8  ;;  %v2455_v8 = vld [vmem:[%s3070_s7 + $0x30] sm:$0xff]  }
 0x822   : > { %v1284_v9 = vpop.xlane.xlu1 %1283 }
 0x824   : > { %v1287_v10 = vpop.xlane.xlu0 %1286 }
 0x825   : > { %v1288_v11 = vmax.f32 %v1284_v9, %v1287_v10 }
 0x827   : > { %v1289_v12 = vrot.slane %v1288_v11, 4 }
 0x829   : > { %v1290_v13 = vmax.f32 %v1288_v11, %v1289_v12 }
 0x82b   : > { %v1291_v15 = vrot.slane %v1290_v13, 2 }
 0x82d   : > { %v1292_v16 = vmax.f32 %v1290_v13, %v1291_v15  ;;  %v2076_v15 = vld [vmem:[%s3072_s9 + $0x1] sm:$0x1] }
 0x82f   : > { %v1293_v17 = vrot.slane %v1292_v16, 1 }
 0x831   : > { %v1294_v18 = vmax.f32 %v1292_v16, %v1293_v17  ;;  %v2457_v17 = vld [vmem:[%s3073_s10 + $0x10] sm:$0xff]  }
 0x833   : > { %2283 = vpush %v1294_v18 }
 0x864   : > { %s2284_s18 = spop %2283 }
 0x865   : > { %v1296_v29 = vstv %s2284_s18 }
 0x866   : > { %vm1297_vm11 = vcmp.ge.f32.partialorder %v1284_v9, %v1296_v29  ;;  %vm1298_vm12 = vcmp.ge.f32.partialorder %v1287_v10, %v1296_v29  ;;  %v2456_v9 = vld [vmem:[%s3070_s7 + $0x38] sm:$0xff]  }
 0x867   : > { %v1299_v31 = vsel %vm1297_vm11, %v2673_v1, 16  ;;  %v1300_v32 = vsel %vm1298_vm12, %v2676_v2, 16  ;;  %vm1908_vm11 = vcmask 1040384  }
 0x868   : > { %vm1301_vm13 = vcmp.lt.s32.totalorder %v1299_v31, %v1300_v32 }
 0x869   : > { %v1302_v33 = vsel %vm1301_vm13, %v1299_v31, %v1300_v32 }
 0x86a   : > { %v1303_v34 = vrot.slane %v1302_v33, 4 }
 0x86c   : > { %vm1304_vm14 = vcmp.lt.s32.totalorder %v1302_v33, %v1303_v34 }
 0x86d   : > { %v1305_v35 = vsel %vm1304_vm14, %v1302_v33, %v1303_v34 }
 0x86e   : > { %v1306_v36 = vrot.slane %v1305_v35, 2 }
 0x870   : > { %vm1307_vm15 = vcmp.lt.s32.totalorder %v1305_v35, %v1306_v36 }
 0x871   : > { %v1308_v37 = vsel %vm1307_vm15, %v1305_v35, %v1306_v36 }
 0x872   : > { %v1309_v38 = vrot.slane %v1308_v37, 1 }
 0x874   : > { %vm1310_vm0 = vcmp.lt.s32.totalorder %v1308_v37, %v1309_v38 }
 0x875   : > { %v1311_v39 = vsel %vm1310_vm0, %v1308_v37, %v1309_v38 }
 0x876   : > { %2285 = vpush %v1311_v39 }
 0x8a7   : > { %s2286_s23 = spop %2285 }
 0x8a8   : > { %v2938_v14 = vstv %s2286_s23 }
 0x8a9   : > { %vm1314_vm1 = vcmp.eq.s32.totalorder %v2673_v1, %v2938_v14  ;;  %vm1315_vm2 = vcmp.eq.s32.totalorder %v2676_v2, %v2938_v14 }
 0x8aa   : > { %v1320_v40 = vsel %vm1314_vm1, %v2686_v3, 0.0  ;;  %v1321_v41 = vsel %vm1315_vm2, %v2688_v4, 0.0 }
 0x8ab   : > { %v1322_v43 = vsel %vm551_vm8, %v1320_v40, 0.0  ;;  %v1323_v44 = vsel %vm551_vm8, %v1321_v41, 0.0 }
 0x8ac   : > { %v1324_v45 = vadd.f32 %v1323_v44, %v1322_v43 }
 0x8ae   : > { %v1325_v48 = vrot.slane %v1324_v45, 4 }
 0x8b0   : > { %v1326_v49 = vadd.f32 %v1325_v48, %v1324_v45  ;;  %v2462_v48 = vld [vmem:[%s3075_s12 + $0x38] sm:$0xff]  }
 0x8b2   : > { %v1327_v50 = vrot.slane %v1326_v49, 2 }
 0x8b4   : > { %v1328_v51 = vadd.f32 %v1327_v50, %v1326_v49  ;;  %v2098_v49 = vld [vmem:[%s3074_s11 + $0x1] ss:$0 sm:$0xff] }
 0x8b6   : > { %v1329_v52 = vrot.slane %v1328_v51, 1 }
 0x8b8   : > { %v1330_v53 = vadd.f32 %v1329_v52, %v1328_v51 }
 0x8ba   : > { %v1333_v54 = vsel %vm551_vm8, %v1330_v53, %v2749_v42  ;;  %1332 = vst.msk [vmem:[#allocation3] sm:$0x1] %vm1331_vm3, %v1330_v53  ;;  %v2451_v42 = vld [vmem:[%s3071_s8 + $0x10] sm:$0xff]  }
 0x8bb   : > { %1335 = vrot.lane.b32.xlu0 %v1333_v54, %s2537_s24  ;;  %2240 = vmatpush3.bf16.msra.mxu1 %v2451_v42 }
 0x8bc   : > { %2241 = vmatprep.subr.bf16.mxu1 %v2535_v28 }
 0x8bf   : > { %2242 = vmatpush3.bf16.msra.mxu1 %v2452_v59 }
 0x8c0   : > { %2247 = vmatprep.subr.bf16.mxu1 %v2535_v28 }
 0x92d   : > { %v1336_v55 = vpop.permute.xlu0 %1335 }
 0x92e   : > { %v1338_v56 = vsel %vm678_vm7, %v2813_v30, %v1336_v55  ;;  %v1340_v57 = vpack.c.bf16 %v1336_v55, %v1336_v55 }
 0x92f   : > { %v1339_v58 = vpack.c.bf16 %v1338_v56, %v1338_v56 }
 0x930   : > { %2071 = vmatprep.mubr.msk.bf16.mxu0 %vm678_vm7, %v1340_v57 }
 0x931   : > { %1458 = vmatmul.mubr.bf16.vlgmr.msra.gmra.mrb[16].mxu0 %v1339_v58 }
 0x932   : > { %2279 = vmatprep.mubr.msk.bf16.mxu0 %vm2536_vm6, %v2535_v28 }
 0xa04   : > { %v1459_v30 = vpop.f32.mrb[16].mxu0 }
 0xa05   : > { %2471 = vtanh.f32 %v1459_v30  ;;  %v1461_v60 = vpop.f32.mrb[17].mxu0 }
 0xa06   : > { %v1462_v61 = vpop.f32.mrb[18].mxu0 }
 0xa07   : > { %v1463_v62 = vpop.f32.mrb[19].mxu0 }
 0xa0f   : > { %v2472_v63 = vpop.eup %2471 }
 0xa10   : > { %v1466_v6 = vpack.c.bf16 %v2472_v63, %v2472_v63 }
 0xa12   : > { %2244 = vmatmul.mubr.msk.bf16.vlgmr.msra.gmra.mrb[16].mxu1 %vm678_vm7, %v1466_v6 }
 0xa13   : > { %2248 = vmatpush3.bf16.msra.mxu1 %v2453_v0  ;;  %2255 = vmatprep.mubr.msk.bf16.mxu1 %vm2536_vm6, %v2535_v28 }
 0xa14   : > { %2249 = vmatprep.subr.bf16.mxu1 %v2535_v28 }
 0xa17   : > { %2250 = vmatpush3.bf16.msra.mxu1 %v2454_v7 }
 0xa18   : > { %2251 = vmatprep.subr.bf16.mxu1 %v2535_v28 }
 0xa1b   : > { %2252 = vmatpush3.bf16.msra.mxu1 %v2455_v8 }
 0xa1c   : > { %2253 = vmatprep.subr.bf16.mxu1 %v2535_v28 }
 0xa1f   : > { %2254 = vmatpush3.bf16.msra.mxu1 %v2456_v9 }
 0xa20   : > { %2259 = vmatprep.subr.bf16.mxu1 %v2535_v28 }
 0xa22   : > { %2256 = vmatmul.mubr.msk.bf16.vlgmr.msra.gmra.mrb[20].mxu1 %vm551_vm8, %v2692_v5  ;;  %v2458_v5 = vld [vmem:[%s3075_s12 + $0x20] sm:$0xff]  }
 0xa23   : > { %2263 = vmatprep.mubr.msk.bf16.mxu1 %vm2536_vm6, %v2535_v28  ;;  %2260 = vmatpush3.bf16.msra.mxu1 %v2457_v17  ;;  %v2117_v17 = vld [vmem:[%s3076_s13 + $0x1] ss:$0 sm:$0xff] }
 0xa24   : > { %2276 = vmatpush3.bf16.msra.mxu0 %v2458_v5  ;;  %2261 = vmatprep.subr.bf16.mxu1 %v2535_v28 }
 0xa25   : > { %2277 = vmatprep.subr.bf16.mxu0 %v2535_v28 }
 0xa27   : > { %2262 = vmatpush3.bf16.msra.mxu1 %v2459_v22 }
 0xa28   : > { %2278 = vmatpush3.bf16.msra.mxu0 %v2460_v23  ;;  %2267 = vmatprep.subr.bf16.mxu1 %v2535_v28 }
 0xae5   : > { %v1523_v10 = vpop.f32.mrb[16].mxu1 }
 0xae6   : > { %v2245_v11 = vpop.f32.mrb[17].mxu1  ;;  %v1524_v16 = vadd.f32 %v2076_v15, %v1523_v10 }
 0xae7   : > { %v1526_v12 = vpop.f32.mrb[18].mxu1 }
 0xae8   : > { %v2246_v13 = vpop.f32.mrb[19].mxu1  ;;  %v1541_v18 = vrot.slane %v1524_v16, %v2759_v46 }
 0xaf5   : > { %v1600_v19 = vpop.f32.mrb[20].mxu1 }
 0xaf6   : > { %v1601_v20 = vadd.f32 %v1600_v19, %v1541_v18  ;;  %v2257_v21 = vpop.f32.mrb[21].mxu1 }
 0xaf7   : > { %v1603_v24 = vpop.f32.mrb[22].mxu1 }
 0xaf8   : > { %v1604_v25 = vadd.f32 %v1603_v24, %v1541_v18  ;;  %v2258_v46 = vpop.f32.mrb[23].mxu1 }
 0xafa   : > { %v2389_v26 = vpack.i.bf16 %v1604_v25, %v1601_v20 }
 0xafc   : > { %2390 = vrot.lane.b32.xlu0 %v2389_v26, %s2537_s24  ;;  %2380 = vrot.lane.b32.xlu1 %v2389_v26, %s2539_s25 }
 0xb00   : > { %2385 = vrot.lane.b32.xlu1 %v2389_v26, %s3082_s21 }
 0xb6e   : > { %v2381_v27 = vpop.permute.xlu1 %2380  ;;  %v2391_v32 = vpop.permute.xlu0 %2390 }
 0xb6f   : > { %v2383_v29 = vunpack.i.h.bf16 %v2381_v27  ;;  %v2382_v31 = vunpack.i.l.bf16 %v2381_v27  ;;  %v2393_v38 = vunpack.i.h.bf16 %v2391_v32  ;;  %v2392_v39 = vunpack.i.l.bf16 %v2391_v32 }
 0xb71   : > { %v1616_v34 = vmax.f32 %v1604_v25, %v2383_v29  ;;  %v1615_v35 = vmax.f32 %v1601_v20, %v2382_v31 }
 0xb72   : > { %v2386_v33 = vpop.permute.xlu1 %2385 }
 0xb73   : > { %v2388_v36 = vunpack.i.h.bf16 %v2386_v33  ;;  %v2387_v37 = vunpack.i.l.bf16 %v2386_v33 }
 0xb75   : > { %v1623_v40 = vmax.f32 %v1615_v35, %v2387_v37  ;;  %v1624_v41 = vmax.f32 %v1616_v34, %v2388_v36 }
 0xb77   : > { %v1631_v43 = vmax.f32 %v1623_v40, %v2392_v39  ;;  %v1632_v44 = vmax.f32 %v1624_v41, %v2393_v38 }
 0xb79   : > { %v1633_v45 = vpack.c.bf16 %v1632_v44, %v1631_v43 }
 0xb7b   : > { %2264 = vmatmul.mubr.msk.bf16.vlgmr.msra.gmra.mrb[24].mxu1 %vm678_vm7, %v1633_v45  ;;  %2280 = vmatmul.mubr.msk.bf16.vlgmr.msra.gmra.mrb[20].mxu0 %vm678_vm7, %v1633_v45 }
 0xb7c   : > { %2271 = vmatprep.mubr.msk.bf16.mxu1 %vm2536_vm6, %v2535_v28  ;;  %2268 = vmatpush3.bf16.msra.mxu1 %v2461_v47 }
 0xb7d   : > { %2269 = vmatprep.subr.bf16.mxu1 %v2535_v28 }
 0xb80   : > { %2270 = vmatpush3.bf16.msra.mxu1 %v2462_v48 }
 0xc4e   : > { %v1696_v50 = vpop.f32.mrb[24].mxu1  ;;  %v1841_v51 = vpop.f32.mrb[20].mxu0 }
 0xc4f   : > { %v2265_v52 = vpop.f32.mrb[25].mxu1  ;;  %v2281_v53 = vpop.f32.mrb[21].mxu0  ;;  %v1697_v56 = vadd.f32 %v2098_v49, %v1696_v50 }
 0xc50   : > { %v1699_v54 = vpop.f32.mrb[26].mxu1  ;;  %v1844_v55 = vpop.f32.mrb[22].mxu0 }
 0xc51   : > { %v1700_v57 = vadd.f32 %v2098_v49, %v1699_v54  ;;  %v2266_v58 = vpop.f32.mrb[27].mxu1  ;;  %v2282_v42 = vpop.f32.mrb[23].mxu0 }
 0xc53   : > { %v2399_v28 = vpack.i.bf16 %v1700_v57, %v1697_v56 }
 0xc55   : > { %2400 = vrot.lane.b32.xlu0 %v2399_v28, %s3082_s21  ;;  %2395 = vrot.lane.b32.xlu1 %v2399_v28, %s2539_s25 }
 0xc59   : > { %2405 = vrot.lane.b32.xlu1 %v2399_v28, %s2537_s24 }
 0xcc7   : > { %v2401_v59 = vpop.permute.xlu0 %2400  ;;  %v2396_v30 = vpop.permute.xlu1 %2395 }
 0xcc8   : > { %v2398_v60 = vunpack.i.h.bf16 %v2396_v30  ;;  %v2397_v61 = vunpack.i.l.bf16 %v2396_v30  ;;  %v2403_v62 = vunpack.i.h.bf16 %v2401_v59  ;;  %v2402_v63 = vunpack.i.l.bf16 %v2401_v59 }
 0xcca   : > { %v1712_v0 = vmax.f32 %v1700_v57, %v2398_v60  ;;  %v1711_v6 = vmax.f32 %v1697_v56, %v2397_v61 }
 0xccb   : > { %v2406_v7 = vpop.permute.xlu1 %2405 }
 0xccc   : > { %v2408_v8 = vunpack.i.h.bf16 %v2406_v7  ;;  %v2407_v9 = vunpack.i.l.bf16 %v2406_v7  ;;  %v1719_v10 = vmax.f32 %v1711_v6, %v2402_v63  ;;  %v1720_v11 = vmax.f32 %v1712_v0, %v2403_v62 }
 0xcce   : > { %v1727_v12 = vmax.f32 %v1719_v10, %v2407_v9  ;;  %v1728_v13 = vmax.f32 %v1720_v11, %v2408_v8 }
 0xcd0   : > { %v1738_v15 = vpack.c.bf16 %v1728_v13, %v1727_v12 }
 0xcd2   : > { %2272 = vmatmul.mubr.msk.bf16.vlgmr.msra.gmra.mrb[28].mxu1 %vm678_vm7, %v1738_v15 }
 0xda5   : > { %v1788_v16 = vpop.f32.mrb[28].mxu1 }
 0xda6   : > { %v1842_v5 = vadd.f32 %v1841_v51, %v1788_v16  ;;  %v2273_v18 = vpop.f32.mrb[29].mxu1 }
 0xda7   : > { %v1791_v19 = vpop.f32.mrb[30].mxu1 }
 0xda8   : > { %v1845_v20 = vadd.f32 %v1844_v55, %v1791_v19  ;;  %v2274_v21 = vpop.f32.mrb[31].mxu1  ;;  %v1856_v22 = vadd.f32 %v2117_v17, %v1842_v5 }
 0xdaa   : > { %v1858_v23 = vsel %vm1281_vm10, %v1856_v22, -inf  ;;  %v1857_v24 = vadd.f32 %v2117_v17, %v1845_v20 }
 0xdab   : > { %1859 = vmax.xlane.f32.xlu0 %v1858_v23 }
 0xdac   : > { %v1861_v25 = vsel %vm1281_vm10, %v1857_v24, -inf }
 0xdad   : > { %1862 = vmax.xlane.f32.xlu1 %v1861_v25 }
 0xe38   : > { %v1860_v46 = vpop.xlane.xlu0 %1859 }
 0xe3a   : > { %v1863_v26 = vpop.xlane.xlu1 %1862 }
 0xe3b   : > { %v1864_v27 = vmax.f32 %v1860_v46, %v1863_v26 }
 0xe3d   : > { %v1865_v29 = vrot.slane %v1864_v27, 4 }
 0xe3f   : > { %v1866_v31 = vmax.f32 %v1864_v27, %v1865_v29 }
 0xe41   : > { %v1867_v32 = vrot.slane %v1866_v31, 2 }
 0xe43   : > { %v1868_v33 = vmax.f32 %v1866_v31, %v1867_v32 }
 0xe45   : > { %v1869_v34 = vrot.slane %v1868_v33, 1 }
 0xe47   : > { %v1870_v35 = vmax.f32 %v1868_v33, %v1869_v34 }
 0xe49   : > { %2287 = vpush %v1870_v35 }
 0xe7a   : > { %s2288_s23 = spop %2287 }
 0xe7b   : > { %v1872_v36 = vstv %s2288_s23 }
 0xe7c   : > { %vm1873_vm4 = vcmp.ge.f32.partialorder %v1860_v46, %v1872_v36  ;;  %vm1874_vm5 = vcmp.ge.f32.partialorder %v1863_v26, %v1872_v36 }
 0xe7d   : > { %v1875_v37 = vsel %vm1873_vm4, %v2673_v1, 16  ;;  %v1876_v38 = vsel %vm1874_vm5, %v2676_v2, 16 }
 0xe7e   : > { %vm1877_vm6 = vcmp.lt.s32.totalorder %v1875_v37, %v1876_v38 }
 0xe7f   : > { %v1878_v39 = vsel %vm1877_vm6, %v1875_v37, %v1876_v38 }
 0xe80   : > { %v1879_v40 = vrot.slane %v1878_v39, 4 }
 0xe82   : > { %vm1880_vm7 = vcmp.lt.s32.totalorder %v1878_v39, %v1879_v40 }
 0xe83   : > { %v1881_v41 = vsel %vm1880_vm7, %v1878_v39, %v1879_v40 }
 0xe84   : > { %v1882_v43 = vrot.slane %v1881_v41, 2 }
 0xe86   : > { %vm1883_vm9 = vcmp.lt.s32.totalorder %v1881_v41, %v1882_v43 }
 0xe87   : > { %v1884_v44 = vsel %vm1883_vm9, %v1881_v41, %v1882_v43 }
 0xe88   : > { %v1885_v45 = vrot.slane %v1884_v44, 1 }
 0xe8a   : > { %vm1886_vm10 = vcmp.lt.s32.totalorder %v1884_v44, %v1885_v45 }
 0xe8b   : > { %v1887_v47 = vsel %vm1886_vm10, %v1884_v44, %v1885_v45 }
 0xe8c   : > { %2289 = vpush %v1887_v47 }
 0xebd   : > { %s2290_s21 = spop %2289 }
 0xebe   : > { %v1889_v48 = vstv %s2290_s21 }
 0xebf   : > { %vm1890_vm12 = vcmp.eq.s32.totalorder %v2673_v1, %v1889_v48  ;;  %vm1891_vm13 = vcmp.eq.s32.totalorder %v2676_v2, %v1889_v48  ;;  %v1909_v49 = vsel %vm1908_vm11, %v2938_v14, %v1889_v48 }
 0xec0   : > { %v1896_v50 = vsel %vm1890_vm12, %v2686_v3, 0.0  ;;  %v1897_v51 = vsel %vm1891_vm13, %v2688_v4, 0.0  ;;  %1910 = vst [vmem:[%s2684_s27] sm:$0x3] %v1909_v49 }
 0xec1   : > { %v1898_v52 = vsel %vm551_vm8, %v1896_v50, 0.0  ;;  %v1899_v53 = vsel %vm551_vm8, %v1897_v51, 0.0 }
 0xec2   : > { %v1900_v54 = vadd.f32 %v1899_v53, %v1898_v52 }
 0xec4   : > { %v1901_v55 = vrot.slane %v1900_v54, 4 }
 0xec6   : > { %v1902_v56 = vadd.f32 %v1901_v55, %v1900_v54 }
 0xec8   : > { %v1903_v57 = vrot.slane %v1902_v56, 2 }
 0xeca   : > { %v1904_v58 = vadd.f32 %v1903_v57, %v1902_v56 }
 0xecc   : > { %v1905_v42 = vrot.slane %v1904_v58, 1 }
 0xece   : > { %v1906_v1 = vadd.f32 %v1905_v42, %v1904_v58 }
 0xed0   : > { %1907 = vst.msk [vmem:[#allocation3 + $0x1] sm:$0x1] %vm1331_vm3, %v1906_v1 }
 0xed1 PF: > { %s25_s17 = sadd.s32 1, %s2530_s17   ;;  %s3083_s29 = smov %s2522_s15 }
 0xed2   : > { %p22_p4 = scmp.ge.s32.totalorder %s25_s17, 6   ;;  %s3084_s30 = smov %s2526_s16 }
 0xed3   : > { %s3085_s15 = smov %s3088_s19  ;;  %s3086_s16 = smov %s3092_s20 }
 0xed4   :  { %24 = sbr.rel (!%p22_p4) target bundleno = 3 (0x3), region = 123 }
 0xedb   :  { %1930 = vsyncpa [#allocation5], 1 }
 0xedc   :  { %1932 = vsyncpa [#allocation5 + $0x1], 1 }

</bundles_post_ra>
